<compile_context>
chip_gen: v6e
topology: v6e:2x2x1
jax: 0.10.0
libtpu: 0.0.40
codegen_flags: <defaults>
</compile_context>

<pallas_src>
import functools
import math

import jax
import jax.numpy as jnp
from jax import lax
from jax.experimental import pallas as pl
from jax.experimental.pallas import tpu as pltpu


_DTYPE = jnp.bfloat16          # storage dtype for weights & activations
_LN_EPS = 1e-12
_NEG_INF = -1e9                # mask fill value (matches the reference impl)
_APPROX_RECIP = True           # EUP approx reciprocal in softmax normalization


# ----------------------------------------------------------------------------
# per-generation sizing helpers
# ----------------------------------------------------------------------------
@functools.lru_cache(maxsize=None)
def _vmem_budget():
    """vmem_limit_bytes derived from the actual TPU generation.

    v5e/v6e (128 MiB physical) -> 64 MiB budget; v7x (64 MiB) -> 32 MiB.
    """
    cap = 64 * 1024 * 1024
    try:
        if hasattr(pltpu, "get_tpu_info"):
            info = pltpu.get_tpu_info()
            cap = int(getattr(info, "vmem_capacity_bytes", cap) or cap)
    except Exception:
        pass
    return int(min(cap // 2, 96 * 1024 * 1024))


def _round_up(x, m):
    return ((x + m - 1) // m) * m


def _dim_plan(dim, max_tile):
    """Return (padded_dim, tile); tile divides padded_dim.

    Small dims -> single full-width block (always a legal block shape).
    Large dims -> padded to a multiple of max_tile (a multiple of 8 and 128).
    """
    if dim <= max_tile:
        return dim, dim
    return _round_up(dim, max_tile), max_tile


def _pad2(x, r, c):
    if x.shape == (r, c):
        return x
    return jnp.pad(x, ((0, r - x.shape[0]), (0, c - x.shape[1])))


# ----------------------------------------------------------------------------
# Pallas kernels
# ----------------------------------------------------------------------------
def _linear_kernel(x_ref, w_ref, b_ref, o_ref, acc_ref, *, activation):
    @pl.when(pl.program_id(2) == 0)
    def _init():
        acc_ref[...] = jnp.zeros_like(acc_ref)

    acc_ref[...] += jnp.dot(x_ref[...], w_ref[...],
                            preferred_element_type=jnp.float32)

    @pl.when(pl.program_id(2) == pl.num_programs(2) - 1)
    def _fin():
        y = acc_ref[...] + b_ref[...].astype(jnp.float32)
        if activation == "relu":
            y = jnp.maximum(y, 0.0)
        o_ref[...] = y.astype(o_ref.dtype)


def linear(x2d, w, b, activation=None, out_dtype=None):
    """(M, K) @ (K, N) + b -> (M, N).  Tiled MXU matmul, f32 VMEM accumulator."""
    M, K = x2d.shape
    N = w.shape[1]
    out_dtype = out_dtype or x2d.dtype
    budget = _vmem_budget()
    max_mn = 512 if budget >= 64 * 1024 * 1024 else 256
    Mp, tm = _dim_plan(M, max_mn)
    Np, tn = _dim_plan(N, max_mn)
    Kp, tk = _dim_plan(K, 512)
    x_p = _pad2(x2d, Mp, Kp)
    w_p = _pad2(w, Kp, Np)
    b_p = _pad2(b.reshape(1, N), 1, Np)
    grid = (Mp // tm, Np // tn, Kp // tk)
    # TODO(synk): sweep pipeline_mode=pl.Buffered(3) on the weight BlockSpec for
    #             large K and confirm via bundle dump whether DMA is exposed.
    out = pl.pallas_call(
        functools.partial(_linear_kernel, activation=activation),
        grid=grid,
        in_specs=[
            pl.BlockSpec((tm, tk), lambda i, j, k: (i, k)),
            pl.BlockSpec((tk, tn), lambda i, j, k: (k, j)),
            pl.BlockSpec((1, tn), lambda i, j, k: (0, j)),
        ],
        out_specs=pl.BlockSpec((tm, tn), lambda i, j, k: (i, j)),
        out_shape=jax.ShapeDtypeStruct((Mp, Np), out_dtype),
        scratch_shapes=[pltpu.VMEM((tm, tn), jnp.float32)],
        compiler_params=pltpu.CompilerParams(
            dimension_semantics=("parallel", "parallel", "arbitrary"),
            vmem_limit_bytes=budget,
        ),
    )(x_p, w_p, b_p)
    if (Mp, Np) != (M, N):
        out = out[:M, :N]
    return out


def _linear_ln_kernel(x_ref, w_ref, b_ref, r_ref, g_ref, be_ref, o_ref, acc_ref,
                      *, eps):
    @pl.when(pl.program_id(1) == 0)
    def _init():
        acc_ref[...] = jnp.zeros_like(acc_ref)

    acc_ref[...] += jnp.dot(x_ref[...], w_ref[...],
                            preferred_element_type=jnp.float32)

    @pl.when(pl.program_id(1) == pl.num_programs(1) - 1)
    def _fin():
        # fused: bias + residual add + LayerNorm, all on the resident tile
        y = (acc_ref[...] + b_ref[...].astype(jnp.float32)
             + r_ref[...].astype(jnp.float32))
        mean = jnp.mean(y, axis=-1, keepdims=True)
        var = jnp.mean((y - mean) ** 2, axis=-1, keepdims=True)
        y = (y - mean) * lax.rsqrt(var + eps)
        o_ref[...] = (y * g_ref[...].astype(jnp.float32)
                      + be_ref[...].astype(jnp.float32)).astype(o_ref.dtype)


def linear_ln_residual(x2d, w, b, res2d, gamma, beta, eps=_LN_EPS,
                       out_dtype=None):
    """LayerNorm(x @ w + b + res).  N (= d_model) is kept un-tiled so the full
    row is resident at finalize; residual + LN fused into the matmul epilogue."""
    M, K = x2d.shape
    N = w.shape[1]
    out_dtype = out_dtype or x2d.dtype
    budget = _vmem_budget()
    max_m = 512 if budget >= 64 * 1024 * 1024 else 256
    Mp, tm = _dim_plan(M, max_m)
    Kp, tk = _dim_plan(K, 512)
    x_p = _pad2(x2d, Mp, Kp)
    w_p = _pad2(w, Kp, N)
    r_p = _pad2(res2d, Mp, N)
    grid = (Mp // tm, Kp // tk)
    out = pl.pallas_call(
        functools.partial(_linear_ln_kernel, eps=eps),
        grid=grid,
        in_specs=[
            pl.BlockSpec((tm, tk), lambda i, k: (i, k)),
            pl.BlockSpec((tk, N), lambda i, k: (k, 0)),
            pl.BlockSpec((1, N), lambda i, k: (0, 0)),
            pl.BlockSpec((tm, N), lambda i, k: (i, 0)),
            pl.BlockSpec((1, N), lambda i, k: (0, 0)),
            pl.BlockSpec((1, N), lambda i, k: (0, 0)),
        ],
        out_specs=pl.BlockSpec((tm, N), lambda i, k: (i, 0)),
        out_shape=jax.ShapeDtypeStruct((Mp, N), out_dtype),
        scratch_shapes=[pltpu.VMEM((tm, N), jnp.float32)],
        compiler_params=pltpu.CompilerParams(
            dimension_semantics=("parallel", "arbitrary"),
            vmem_limit_bytes=budget,
        ),
    )(x_p, w_p, b.reshape(1, N), r_p, gamma.reshape(1, N), beta.reshape(1, N))
    if Mp != M:
        out = out[:M]
    return out


def _flash_kernel(q_ref, k_ref, v_ref, qpad_ref, kpad_ref, o_ref,
                  m_sc, l_sc, acc_sc, *, n_heads, causal):
    """Flash attention: one (batch, q-tile) per (grid0, grid1); Sk streamed on
    grid axis 2 with online-softmax accumulators in VMEM scratch.

    q_ref: (1, tq, D) bf16   k_ref / v_ref: (1, tk, D) bf16
    qpad_ref: (1, tq, 1) f32 (1 = keep query row)
    kpad_ref: (1, 1, tk) f32 (1 = keep key column)
    m_sc / l_sc: (H, tq, 1) f32,  acc_sc: (tq, D) f32.
    """
    qi = pl.program_id(1)
    ki = pl.program_id(2)
    tq, D = q_ref.shape[1], q_ref.shape[2]
    tk = k_ref.shape[1]
    dh = D // n_heads

    @pl.when(ki == 0)
    def _init():
        m_sc[...] = jnp.full_like(m_sc, -1e30)
        l_sc[...] = jnp.zeros_like(l_sc)
        acc_sc[...] = jnp.zeros_like(acc_sc)

    # mask for this (tq, tk) tile: key-pad & query-pad (+ causal), built from
    # tiny pad vectors; fully-masked query rows end up as a uniform softmax,
    # matching the reference's masked_fill(-1e9) behaviour.
    keep = (kpad_ref[0] > 0.0) & (qpad_ref[0] > 0.0)          # (tq, tk)
    if causal:
        row = qi * tq + lax.broadcasted_iota(jnp.int32, (tq, tk), 0)
        col = ki * tk + lax.broadcasted_iota(jnp.int32, (tq, tk), 1)
        keep = keep & (col <= row)

    q = q_ref[0]                                              # (tq, D) bf16
    k = k_ref[0]
    v = v_ref[0]
    neg = jnp.float32(_NEG_INF)

    # Static head loop: heads are contiguous dh-lane slices; QK^T via
    # dot_general (no transpose); 1/sqrt(dh) is pre-folded into W_q.
    # TODO(synk): when dh is 128-aligned, batch heads into one batched
    #             dot_general (heads as a batch dim) to fill the 256-wide MXU.
    for h in range(n_heads):
        lo = h * dh
        s = lax.dot_general(q[:, lo:lo + dh], k[:, lo:lo + dh],
                            (((1,), (1,)), ((), ())),
                            preferred_element_type=jnp.float32)   # (tq, tk)
        s = jnp.where(keep, s, neg)
        m_old = m_sc[h]                                            # (tq, 1)
        m_new = jnp.maximum(m_old, jnp.max(s, axis=-1, keepdims=True))
        alpha = jnp.exp(m_old - m_new)
        p = jnp.exp(s - m_new)                                     # f32
        l_sc[h] = alpha * l_sc[h] + jnp.sum(p, axis=-1, keepdims=True)
        m_sc[h] = m_new
        pv = jnp.dot(p.astype(v.dtype), v[:, lo:lo + dh],
                     preferred_element_type=jnp.float32)           # (tq, dh)
        acc_sc[:, lo:lo + dh] = alpha * acc_sc[:, lo:lo + dh] + pv

    @pl.when(ki == pl.num_programs(2) - 1)
    def _fin():
        for h in range(n_heads):
            lo = h * dh
            l_h = l_sc[h]
            inv = pl.reciprocal(l_h, approx=True) if _APPROX_RECIP else 1.0 / l_h
            acc_sc[:, lo:lo + dh] = acc_sc[:, lo:lo + dh] * inv
        o_ref[0] = acc_sc[...].astype(o_ref.dtype)    # one lane-dense store


def flash_mha(q_arr, q_col, k_arr, k_col, v_arr, v_col, qpad, kpad,
              *, d_model, n_heads, causal):
    """q_arr: (B, Sq, cq*D) holding Q in column block q_col (width D = d_model);
    k_arr / v_arr: (B, Sk, c*D) holding K / V in column blocks k_col / v_col.
    The column-block trick lets fused QKV / KV projections be consumed directly
    without XLA lane slices.  qpad: (B, Sq, 1) f32, kpad: (B, 1, Sk) f32."""
    D = d_model
    B, Sq = q_arr.shape[0], q_arr.shape[1]
    Sk = k_arr.shape[1]
    budget = _vmem_budget()
    max_t = 256 if budget >= 64 * 1024 * 1024 else 128
    Sqp, tq = _dim_plan(Sq, max_t)
    Skp, tk = _dim_plan(Sk, max_t)
    if Sqp != Sq:
        q_arr = jnp.pad(q_arr, ((0, 0), (0, Sqp - Sq), (0, 0)))
        qpad = jnp.pad(qpad, ((0, 0), (0, Sqp - Sq), (0, 0)))
    if Skp != Sk:
        k_arr = jnp.pad(k_arr, ((0, 0), (0, Skp - Sk), (0, 0)))
        v_arr = jnp.pad(v_arr, ((0, 0), (0, Skp - Sk), (0, 0)))
        kpad = jnp.pad(kpad, ((0, 0), (0, 0), (0, Skp - Sk)))  # padded keys masked

    grid = (B, Sqp // tq, Skp // tk)
    out = pl.pallas_call(
        functools.partial(_flash_kernel, n_heads=n_heads, causal=causal),
        grid=grid,
        in_specs=[
            pl.BlockSpec((1, tq, D), lambda b, qi, ki, c=q_col: (b, qi, c)),
            pl.BlockSpec((1, tk, D), lambda b, qi, ki, c=k_col: (b, ki, c)),
            pl.BlockSpec((1, tk, D), lambda b, qi, ki, c=v_col: (b, ki, c)),
            pl.BlockSpec((1, tq, 1), lambda b, qi, ki: (b, qi, 0)),
            pl.BlockSpec((1, 1, tk), lambda b, qi, ki: (b, 0, ki)),
        ],
        out_specs=pl.BlockSpec((1, tq, D), lambda b, qi, ki: (b, qi, 0)),
        out_shape=jax.ShapeDtypeStruct((B, Sqp, D), q_arr.dtype),
        scratch_shapes=[
            pltpu.VMEM((n_heads, tq, 1), jnp.float32),   # running max  m
            pltpu.VMEM((n_heads, tq, 1), jnp.float32),   # running sum  l
            pltpu.VMEM((tq, D), jnp.float32),            # output accumulator
        ],
        compiler_params=pltpu.CompilerParams(
            dimension_semantics=("parallel", "parallel", "arbitrary"),
            vmem_limit_bytes=budget,
        ),
    )(q_arr, k_arr, v_arr, qpad, kpad)
    if Sqp != Sq:
        out = out[:, :Sq, :]
    return out


# ----------------------------------------------------------------------------
# Model building blocks (JAX glue around the Pallas kernels)
# ----------------------------------------------------------------------------
def mha_self_core(p, x, qpad, kpad, causal, n_heads):
    B, S, D = x.shape
    qkv = linear(x.reshape(B * S, D), p["w_qkv"], p["b_qkv"]).reshape(B, S, 3 * D)
    if D % 128 == 0:
        # fused QKV tensor consumed directly via BlockSpec column blocks
        return flash_mha(qkv, 0, qkv, 1, qkv, 2, qpad, kpad,
                         d_model=D, n_heads=n_heads, causal=causal)
    # toy fallback: D-wide lane blocks are not 128-aligned -> slice once in XLA
    q, k, v = qkv[..., :D], qkv[..., D:2 * D], qkv[..., 2 * D:]
    return flash_mha(q, 0, k, 0, v, 0, qpad, kpad,
                     d_model=D, n_heads=n_heads, causal=causal)


def mha_cross_core(p, x_q, x_kv, qpad, kpad, n_heads):
    B, Sq, D = x_q.shape
    Sk = x_kv.shape[1]
    q = linear(x_q.reshape(B * Sq, D), p["wq"], p["bq"]).reshape(B, Sq, D)
    kv = linear(x_kv.reshape(B * Sk, D), p["w_kv"], p["b_kv"]).reshape(B, Sk, 2 * D)
    if D % 128 == 0:
        return flash_mha(q, 0, kv, 0, kv, 1, qpad, kpad,
                         d_model=D, n_heads=n_heads, causal=False)
    k, v = kv[..., :D], kv[..., D:]
    return flash_mha(q, 0, k, 0, v, 0, qpad, kpad,
                     d_model=D, n_heads=n_heads, causal=False)


def encoder_layer(p, x, q_ones, src_kpad, n_heads):
    B, S, D = x.shape
    res = x
    o = mha_self_core(p["attn"], x, q_ones, src_kpad, False, n_heads)
    x = linear_ln_residual(o.reshape(B * S, D), p["attn"]["wo"], p["attn"]["bo"],
                           res.reshape(B * S, D), p["ln1_g"], p["ln1_b"]
                           ).reshape(B, S, D)
    res = x
    h = linear(x.reshape(B * S, D), p["ffn"]["w1"], p["ffn"]["b1"],
               activation="relu")
    x = linear_ln_residual(h, p["ffn"]["w2"], p["ffn"]["b2"],
                           res.reshape(B * S, D), p["ln2_g"], p["ln2_b"]
                           ).reshape(B, S, D)
    return x


def decoder_layer(p, x, enc, trg_qpad, trg_kones, trg_qones, src_kpad, n_heads):
    B, St, D = x.shape
    res = x
    o = mha_self_core(p["self_attn"], x, trg_qpad, trg_kones, True, n_heads)
    x = linear_ln_residual(o.reshape(B * St, D), p["self_attn"]["wo"],
                           p["self_attn"]["bo"], res.reshape(B * St, D),
                           p["ln1_g"], p["ln1_b"]).reshape(B, St, D)
    res = x
    o = mha_cross_core(p["cross_attn"], x, enc, trg_qones, src_kpad, n_heads)
    x = linear_ln_residual(o.reshape(B * St, D), p["cross_attn"]["wo"],
                           p["cross_attn"]["bo"], res.reshape(B * St, D),
                           p["ln2_g"], p["ln2_b"]).reshape(B, St, D)
    res = x
    h = linear(x.reshape(B * St, D), p["ffn"]["w1"], p["ffn"]["b1"],
               activation="relu")
    x = linear_ln_residual(h, p["ffn"]["w2"], p["ffn"]["b2"],
                           res.reshape(B * St, D), p["ln3_g"], p["ln3_b"]
                           ).reshape(B, St, D)
    return x


def sinusoid_pos_encoding(max_len, d_model):
    pos = jnp.arange(max_len, dtype=jnp.float32)[:, None]
    i2 = jnp.arange(0, d_model, 2, dtype=jnp.float32)[None, :]
    angle = pos / jnp.power(10000.0, i2 / float(d_model))
    pe = jnp.zeros((max_len, d_model), jnp.float32)
    pe = pe.at[:, 0::2].set(jnp.sin(angle))
    pe = pe.at[:, 1::2].set(jnp.cos(angle))
    return pe


def transformer_forward(params, src, trg, cfg):
    n_heads = cfg["n_heads"]
    B, Ss = src.shape
    St = trg.shape[1]

    # Tiny pad vectors; full (Sq, Sk) masks are built in-kernel.
    # PyTorch src_mask = (src != pad)[:,None,None,:] -> masks KEY columns.
    # PyTorch trg_mask = (trg != pad)[:,None,:,None] & tril -> QUERY rows + causal.
    src_kpad = (src != cfg["src_pad_idx"]).astype(jnp.float32).reshape(B, 1, Ss)
    trg_qpad = (trg != cfg["trg_pad_idx"]).astype(jnp.float32).reshape(B, St, 1)
    src_qones = jnp.ones((B, Ss, 1), jnp.float32)
    trg_kones = jnp.ones((B, 1, St), jnp.float32)
    trg_qones = jnp.ones((B, St, 1), jnp.float32)

    pe = params["pos_enc"]

    # Encoder  (embedding gather stays in XLA)
    x = jnp.take(params["enc_tok_emb"], src, axis=0) + pe[None, :Ss]
    for lp in params["enc_layers"]:
        x = encoder_layer(lp, x, src_qones, src_kpad, n_heads)
    enc_src = x

    # Decoder
    y = jnp.take(params["dec_tok_emb"], trg, axis=0) + pe[None, :St]
    for lp in params["dec_layers"]:
        y = decoder_layer(lp, y, enc_src, trg_qpad, trg_kones, trg_qones,
                          src_kpad, n_heads)

    D = y.shape[-1]
    out = linear(y.reshape(B * St, D), params["out_w"], params["out_b"],
                 out_dtype=jnp.float32)
    return out.reshape(B, St, cfg["dec_voc_size"])


# ----------------------------------------------------------------------------
# Deterministic parameter initialization (bf16 weights, f32 biases/LN params)
# ----------------------------------------------------------------------------
def init_params(key, cfg):
    d_model, d_ff = cfg["d_model"], cfg["d_ff"]
    n_heads = cfg["n_heads"]
    head_scale = 1.0 / math.sqrt(d_model // n_heads)
    dt = _DTYPE
    keys = iter(jax.random.split(key, 4096))

    def wmat(din, dout, scale_cols=None, col_scale=1.0):
        m = 0.02 * jax.random.normal(next(keys), (din, dout), jnp.float32)
        if scale_cols is not None:
            # fold 1/sqrt(Dh) into the Q projection (one-time weight transform)
            m = m.at[:, :scale_cols].multiply(col_scale)
        return m.astype(dt)

    def zeros_b(n):
        return jnp.zeros((n,), jnp.float32)

    def self_attn_params():
        return {
            "w_qkv": wmat(d_model, 3 * d_model, scale_cols=d_model,
                          col_scale=head_scale),
            "b_qkv": zeros_b(3 * d_model),
            "wo": wmat(d_model, d_model), "bo": zeros_b(d_model),
        }

    def cross_attn_params():
        return {
            "wq": wmat(d_model, d_model, scale_cols=d_model,
                       col_scale=head_scale),
            "bq": zeros_b(d_model),
            "w_kv": wmat(d_model, 2 * d_model), "b_kv": zeros_b(2 * d_model),
            "wo": wmat(d_model, d_model), "bo": zeros_b(d_model),
        }

    def ffn_params():
        return {"w1": wmat(d_model, d_ff), "b1": zeros_b(d_ff),
                "w2": wmat(d_ff, d_model), "b2": zeros_b(d_model)}

    def ln():
        return jnp.ones((d_model,), jnp.float32), jnp.zeros((d_model,), jnp.float32)

    def enc_layer_params():
        g1, b1 = ln(); g2, b2 = ln()
        return {"attn": self_attn_params(), "ln1_g": g1, "ln1_b": b1,
                "ffn": ffn_params(), "ln2_g": g2, "ln2_b": b2}

    def dec_layer_params():
        g1, b1 = ln(); g2, b2 = ln(); g3, b3 = ln()
        return {"self_attn": self_attn_params(), "ln1_g": g1, "ln1_b": b1,
                "cross_attn": cross_attn_params(), "ln2_g": g2, "ln2_b": b2,
                "ffn": ffn_params(), "ln3_g": g3, "ln3_b": b3}

    params = {
        "enc_tok_emb": (0.02 * jax.random.normal(
            next(keys), (cfg["enc_voc_size"], d_model), jnp.float32)).astype(dt),
        "dec_tok_emb": (0.02 * jax.random.normal(
            next(keys), (cfg["dec_voc_size"], d_model), jnp.float32)).astype(dt),
        "pos_enc": sinusoid_pos_encoding(cfg["max_len"], d_model).astype(dt),
        "enc_layers": [enc_layer_params() for _ in range(cfg["n_layers"])],
        "dec_layers": [dec_layer_params() for _ in range(cfg["n_layers"])],
        "out_w": wmat(d_model, cfg["dec_voc_size"]),
        "out_b": zeros_b(cfg["dec_voc_size"]),
    }
    return params


# ----------------------------------------------------------------------------
# Main
# ----------------------------------------------------------------------------
if __name__ == "__main__":
    cfg = dict(
        src_pad_idx=0,
        trg_pad_idx=0,
        trg_sos_idx=1,          # unused in forward (only for decoding loops)
        enc_voc_size=32,
        dec_voc_size=32,
        d_model=32,
        d_ff=64,
        n_heads=4,
        max_len=8,
        n_layers=2,
        drop_prob=0.1,          # inference mode -> dropout is identity
    )
    B, S = 2, 8

    key = jax.random.PRNGKey(0)
    kp, ks, kt = jax.random.split(key, 3)
    params = init_params(kp, cfg)

    src = jax.random.randint(ks, (B, S), 2, cfg["enc_voc_size"]).astype(jnp.int32)
    trg = jax.random.randint(kt, (B, S), 2, cfg["dec_voc_size"]).astype(jnp.int32)
    # introduce some padding so the masks actually do something
    src = src.at[0, -2:].set(cfg["src_pad_idx"])
    trg = trg.at[1, -3:].set(cfg["trg_pad_idx"])

    fwd = jax.jit(lambda p, s, t: transformer_forward(p, s, t, cfg))
    out = fwd(params, src, trg)
    out = jax.block_until_ready(out)

    assert out.shape == (B, S, cfg["dec_voc_size"]), out.shape
    assert bool(jnp.all(jnp.isfinite(out)))
    print("KERNEL_OK")
</pallas_src>

<mosaic_0001>
module attributes {stable_mosaic.version = 11 : i64} {
  func.func @_linear_kernel(%arg0: i32, %arg1: i32, %arg2: i32, %arg3: memref<16x32xbf16, #tpu.memory_space<vmem>>, %arg4: memref<32x96xbf16, #tpu.memory_space<vmem>>, %arg5: memref<1x96xf32, #tpu.memory_space<vmem>>, %arg6: memref<16x96xbf16, #tpu.memory_space<vmem>>, %arg7: memref<16x96xf32, #tpu.memory_space<vmem>>) attributes {dimension_semantics = [#tpu.dimension_semantics<parallel>, #tpu.dimension_semantics<parallel>, #tpu.dimension_semantics<arbitrary>], iteration_bounds = array<i64: 1, 1, 1>, scalar_prefetch = 0 : i64, scratch_operands = 1 : i64, tpu.core_type = #tpu.core_type<tc>, window_params = [{transform_indices = @transform_0, window_bounds = array<i64: 16, 32>}, {transform_indices = @transform_1, window_bounds = array<i64: 32, 96>}, {transform_indices = @transform_2, window_bounds = array<i64: 1, 96>}, {transform_indices = @transform_3, window_bounds = array<i64: 16, 96>}]} {
    %c0_i32 = arith.constant 0 : i32
    %0 = arith.cmpi eq, %arg2, %c0_i32 : i32
    %1 = arith.extui %0 : i1 to i32
    %c0_i32_0 = arith.constant 0 : i32
    %2 = arith.cmpi ne, %1, %c0_i32_0 : i32
    scf.if %2 {
      %cst_10 = arith.constant 0.000000e+00 : f32
      %12 = vector.broadcast %cst_10 : f32 to vector<16x96xf32>
      %c0_11 = arith.constant 0 : index
      %c0_12 = arith.constant 0 : index
      %13 = vector.load %arg7[%c0_11, %c0_12] : memref<16x96xf32, #tpu.memory_space<vmem>>, vector<16x96xf32>
      tpu.vector_store %arg7[%c0_11, %c0_12], %12 {strides = array<i32>} : memref<16x96xf32, #tpu.memory_space<vmem>>, vector<16x96xf32>,
    } else {
    }
    %c0 = arith.constant 0 : index
    %c0_1 = arith.constant 0 : index
    %3 = vector.load %arg7[%c0, %c0_1] : memref<16x96xf32, #tpu.memory_space<vmem>>, vector<16x96xf32>
    %c0_2 = arith.constant 0 : index
    %c0_3 = arith.constant 0 : index
    %4 = vector.load %arg3[%c0_2, %c0_3] : memref<16x32xbf16, #tpu.memory_space<vmem>>, vector<16x32xbf16>
    %c0_4 = arith.constant 0 : index
    %c0_5 = arith.constant 0 : index
    %5 = vector.load %arg4[%c0_4, %c0_5] : memref<32x96xbf16, #tpu.memory_space<vmem>>, vector<32x96xbf16>
    %cst = arith.constant dense<0.000000e+00> : vector<16x96xf32>
    %6 = tpu.matmul %4, %5, %cst {dimension_numbers = #tpu.dot_dimension_numbers<[1], [0], [0], [1], [0, 0, 1, 1], [], []>} : vector<16x32xbf16>, vector<32x96xbf16>, vector<16x96xf32> -> vector<16x96xf32>
    %7 = arith.addf %3, %6 : vector<16x96xf32>
    %c0_6 = arith.constant 0 : index
    %c0_7 = arith.constant 0 : index
    %8 = vector.load %arg7[%c0_6, %c0_7] : memref<16x96xf32, #tpu.memory_space<vmem>>, vector<16x96xf32>
    tpu.vector_store %arg7[%c0_6, %c0_7], %7 {strides = array<i32>} : memref<16x96xf32, #tpu.memory_space<vmem>>, vector<16x96xf32>,
    %c0_i32_8 = arith.constant 0 : i32
    %9 = arith.cmpi eq, %arg2, %c0_i32_8 : i32
    %10 = arith.extui %9 : i1 to i32
    %c0_i32_9 = arith.constant 0 : i32
    %11 = arith.cmpi ne, %10, %c0_i32_9 : i32
    scf.if %11 {
      %c0_10 = arith.constant 0 : index
      %c0_11 = arith.constant 0 : index
      %12 = vector.load %arg7[%c0_10, %c0_11] : memref<16x96xf32, #tpu.memory_space<vmem>>, vector<16x96xf32>
      %c0_12 = arith.constant 0 : index
      %c0_13 = arith.constant 0 : index
      %13 = vector.load %arg5[%c0_12, %c0_13] : memref<1x96xf32, #tpu.memory_space<vmem>>, vector<1x96xf32>
      %14 = vector.broadcast %13 : vector<1x96xf32> to vector<16x96xf32>
      %15 = arith.addf %12, %14 : vector<16x96xf32>
      %16 = arith.truncf %15 : vector<16x96xf32> to vector<16x96xbf16>
      %c0_14 = arith.constant 0 : index
      %c0_15 = arith.constant 0 : index
      %17 = vector.load %arg6[%c0_14, %c0_15] : memref<16x96xbf16, #tpu.memory_space<vmem>>, vector<16x96xbf16>
      tpu.vector_store %arg6[%c0_14, %c0_15], %16 {strides = array<i32>} : memref<16x96xbf16, #tpu.memory_space<vmem>>, vector<16x96xbf16>,
    } else {
    }
    return
  }
  func.func @transform_0(%arg0: i32, %arg1: i32, %arg2: i32) -> (i32, i32) {
    %c0_i32 = arith.constant 0 : i32
    return %arg0, %arg2 : i32, i32
  }
  func.func @transform_1(%arg0: i32, %arg1: i32, %arg2: i32) -> (i32, i32) {
    %c0_i32 = arith.constant 0 : i32
    return %arg2, %arg1 : i32, i32
  }
  func.func @transform_2(%arg0: i32, %arg1: i32, %arg2: i32) -> (i32, i32) {
    %c0_i32 = arith.constant 0 : i32
    %c0_i32_0 = arith.constant 0 : i32
    return %c0_i32, %arg1 : i32, i32
  }
  func.func @transform_3(%arg0: i32, %arg1: i32, %arg2: i32) -> (i32, i32) {
    %c0_i32 = arith.constant 0 : i32
    return %arg0, %arg1 : i32, i32
  }
}

module attributes {stable_mosaic.version = 11 : i64} {
  func.func @_linear_kernel(%arg0: i32, %arg1: i32, %arg2: i32, %arg3: memref<16x32xbf16, #tpu.memory_space<vmem>>, %arg4: memref<32x64xbf16, #tpu.memory_space<vmem>>, %arg5: memref<1x64xf32, #tpu.memory_space<vmem>>, %arg6: memref<16x64xbf16, #tpu.memory_space<vmem>>, %arg7: memref<16x64xf32, #tpu.memory_space<vmem>>) attributes {dimension_semantics = [#tpu.dimension_semantics<parallel>, #tpu.dimension_semantics<parallel>, #tpu.dimension_semantics<arbitrary>], iteration_bounds = array<i64: 1, 1, 1>, scalar_prefetch = 0 : i64, scratch_operands = 1 : i64, tpu.core_type = #tpu.core_type<tc>, window_params = [{transform_indices = @transform_0, window_bounds = array<i64: 16, 32>}, {transform_indices = @transform_1, window_bounds = array<i64: 32, 64>}, {transform_indices = @transform_2, window_bounds = array<i64: 1, 64>}, {transform_indices = @transform_3, window_bounds = array<i64: 16, 64>}]} {
    %c0_i32 = arith.constant 0 : i32
    %0 = arith.cmpi eq, %arg2, %c0_i32 : i32
    %1 = arith.extui %0 : i1 to i32
    %c0_i32_0 = arith.constant 0 : i32
    %2 = arith.cmpi ne, %1, %c0_i32_0 : i32
    scf.if %2 {
      %cst_10 = arith.constant 0.000000e+00 : f32
      %12 = vector.broadcast %cst_10 : f32 to vector<16x64xf32>
      %c0_11 = arith.constant 0 : index
      %c0_12 = arith.constant 0 : index
      %13 = vector.load %arg7[%c0_11, %c0_12] : memref<16x64xf32, #tpu.memory_space<vmem>>, vector<16x64xf32>
      tpu.vector_store %arg7[%c0_11, %c0_12], %12 {strides = array<i32>} : memref<16x64xf32, #tpu.memory_space<vmem>>, vector<16x64xf32>,
    } else {
    }
    %c0 = arith.constant 0 : index
    %c0_1 = arith.constant 0 : index
    %3 = vector.load %arg7[%c0, %c0_1] : memref<16x64xf32, #tpu.memory_space<vmem>>, vector<16x64xf32>
    %c0_2 = arith.constant 0 : index
    %c0_3 = arith.constant 0 : index
    %4 = vector.load %arg3[%c0_2, %c0_3] : memref<16x32xbf16, #tpu.memory_space<vmem>>, vector<16x32xbf16>
    %c0_4 = arith.constant 0 : index
    %c0_5 = arith.constant 0 : index
    %5 = vector.load %arg4[%c0_4, %c0_5] : memref<32x64xbf16, #tpu.memory_space<vmem>>, vector<32x64xbf16>
    %cst = arith.constant dense<0.000000e+00> : vector<16x64xf32>
    %6 = tpu.matmul %4, %5, %cst {dimension_numbers = #tpu.dot_dimension_numbers<[1], [0], [0], [1], [0, 0, 1, 1], [], []>} : vector<16x32xbf16>, vector<32x64xbf16>, vector<16x64xf32> -> vector<16x64xf32>
    %7 = arith.addf %3, %6 : vector<16x64xf32>
    %c0_6 = arith.constant 0 : index
    %c0_7 = arith.constant 0 : index
    %8 = vector.load %arg7[%c0_6, %c0_7] : memref<16x64xf32, #tpu.memory_space<vmem>>, vector<16x64xf32>
    tpu.vector_store %arg7[%c0_6, %c0_7], %7 {strides = array<i32>} : memref<16x64xf32, #tpu.memory_space<vmem>>, vector<16x64xf32>,
    %c0_i32_8 = arith.constant 0 : i32
    %9 = arith.cmpi eq, %arg2, %c0_i32_8 : i32
    %10 = arith.extui %9 : i1 to i32
    %c0_i32_9 = arith.constant 0 : i32
    %11 = arith.cmpi ne, %10, %c0_i32_9 : i32
    scf.if %11 {
      %c0_10 = arith.constant 0 : index
      %c0_11 = arith.constant 0 : index
      %12 = vector.load %arg7[%c0_10, %c0_11] : memref<16x64xf32, #tpu.memory_space<vmem>>, vector<16x64xf32>
      %c0_12 = arith.constant 0 : index
      %c0_13 = arith.constant 0 : index
      %13 = vector.load %arg5[%c0_12, %c0_13] : memref<1x64xf32, #tpu.memory_space<vmem>>, vector<1x64xf32>
      %14 = vector.broadcast %13 : vector<1x64xf32> to vector<16x64xf32>
      %15 = arith.addf %12, %14 : vector<16x64xf32>
      %cst_14 = arith.constant 0.000000e+00 : f32
      %16 = vector.broadcast %cst_14 : f32 to vector<16x64xf32>
      %17 = arith.maximumf %15, %16 : vector<16x64xf32>
      %18 = arith.truncf %17 : vector<16x64xf32> to vector<16x64xbf16>
      %c0_15 = arith.constant 0 : index
      %c0_16 = arith.constant 0 : index
      %19 = vector.load %arg6[%c0_15, %c0_16] : memref<16x64xbf16, #tpu.memory_space<vmem>>, vector<16x64xbf16>
      tpu.vector_store %arg6[%c0_15, %c0_16], %18 {strides = array<i32>} : memref<16x64xbf16, #tpu.memory_space<vmem>>, vector<16x64xbf16>,
    } else {
    }
    return
  }
  func.func @transform_0(%arg0: i32, %arg1: i32, %arg2: i32) -> (i32, i32) {
    %c0_i32 = arith.constant 0 : i32
    return %arg0, %arg2 : i32, i32
  }
  func.func @transform_1(%arg0: i32, %arg1: i32, %arg2: i32) -> (i32, i32) {
    %c0_i32 = arith.constant 0 : i32
    return %arg2, %arg1 : i32, i32
  }
  func.func @transform_2(%arg0: i32, %arg1: i32, %arg2: i32) -> (i32, i32) {
    %c0_i32 = arith.constant 0 : i32
    %c0_i32_0 = arith.constant 0 : i32
    return %c0_i32, %arg1 : i32, i32
  }
  func.func @transform_3(%arg0: i32, %arg1: i32, %arg2: i32) -> (i32, i32) {
    %c0_i32 = arith.constant 0 : i32
    return %arg0, %arg1 : i32, i32
  }
}

module attributes {stable_mosaic.version = 11 : i64} {
  func.func @_flash_kernel(%arg0: i32, %arg1: i32, %arg2: i32, %arg3: memref<1x8x32xbf16, #tpu.memory_space<vmem>>, %arg4: memref<1x8x32xbf16, #tpu.memory_space<vmem>>, %arg5: memref<1x8x32xbf16, #tpu.memory_space<vmem>>, %arg6: memref<1x8x1xf32, #tpu.memory_space<vmem>>, %arg7: memref<1x1x8xf32, #tpu.memory_space<vmem>>, %arg8: memref<1x8x32xbf16, #tpu.memory_space<vmem>>, %arg9: memref<4x8x1xf32, #tpu.memory_space<vmem>>, %arg10: memref<4x8x1xf32, #tpu.memory_space<vmem>>, %arg11: memref<8x32xf32, #tpu.memory_space<vmem>>) attributes {dimension_semantics = [#tpu.dimension_semantics<parallel>, #tpu.dimension_semantics<parallel>, #tpu.dimension_semantics<arbitrary>], iteration_bounds = array<i64: 2, 1, 1>, scalar_prefetch = 0 : i64, scratch_operands = 3 : i64, tpu.core_type = #tpu.core_type<tc>, window_params = [{transform_indices = @transform_0, window_bounds = array<i64: 1, 8, 32>}, {transform_indices = @transform_1, window_bounds = array<i64: 1, 8, 32>}, {transform_indices = @transform_2, window_bounds = array<i64: 1, 8, 32>}, {transform_indices = @transform_3, window_bounds = array<i64: 1, 8, 1>}, {transform_indices = @transform_4, window_bounds = array<i64: 1, 1, 8>}, {transform_indices = @transform_5, window_bounds = array<i64: 1, 8, 32>}]} {
    %c0_i32 = arith.constant 0 : i32
    %0 = arith.cmpi eq, %arg2, %c0_i32 : i32
    %1 = arith.extui %0 : i1 to i32
    %c0_i32_0 = arith.constant 0 : i32
    %2 = arith.cmpi ne, %1, %c0_i32_0 : i32
    scf.if %2 {
      %cst_96 = arith.constant -1.000000e+30 : f32
      %163 = vector.broadcast %cst_96 : f32 to vector<4x8x1xf32>
      %c0_97 = arith.constant 0 : index
      %c0_98 = arith.constant 0 : index
      %c0_99 = arith.constant 0 : index
      %164 = vector.load %arg9[%c0_97, %c0_98, %c0_99] : memref<4x8x1xf32, #tpu.memory_space<vmem>>, vector<4x8x1xf32>
      tpu.vector_store %arg9[%c0_97, %c0_98, %c0_99], %163 {strides = array<i32>} : memref<4x8x1xf32, #tpu.memory_space<vmem>>, vector<4x8x1xf32>,
      %cst_100 = arith.constant 0.000000e+00 : f32
      %165 = vector.broadcast %cst_100 : f32 to vector<4x8x1xf32>
      %c0_101 = arith.constant 0 : index
      %c0_102 = arith.constant 0 : index
      %c0_103 = arith.constant 0 : index
      %166 = vector.load %arg10[%c0_101, %c0_102, %c0_103] : memref<4x8x1xf32, #tpu.memory_space<vmem>>, vector<4x8x1xf32>
      tpu.vector_store %arg10[%c0_101, %c0_102, %c0_103], %165 {strides = array<i32>} : memref<4x8x1xf32, #tpu.memory_space<vmem>>, vector<4x8x1xf32>,
      %cst_104 = arith.constant 0.000000e+00 : f32
      %167 = vector.broadcast %cst_104 : f32 to vector<8x32xf32>
      %c0_105 = arith.constant 0 : index
      %c0_106 = arith.constant 0 : index
      %168 = vector.load %arg11[%c0_105, %c0_106] : memref<8x32xf32, #tpu.memory_space<vmem>>, vector<8x32xf32>
      tpu.vector_store %arg11[%c0_105, %c0_106], %167 {strides = array<i32>} : memref<8x32xf32, #tpu.memory_space<vmem>>, vector<8x32xf32>,
    } else {
    }
    %c0 = arith.constant 0 : index
    %c0_1 = arith.constant 0 : index
    %c0_2 = arith.constant 0 : index
    %3 = vector.load %arg7[%c0, %c0_1, %c0_2] : memref<1x1x8xf32, #tpu.memory_space<vmem>>, vector<1x1x8xf32>
    %4 = vector.shape_cast %3 : vector<1x1x8xf32> to vector<1x8xf32>
    %cst = arith.constant 0.000000e+00 : f32
    %5 = vector.broadcast %cst : f32 to vector<1x8xf32>
    %6 = arith.cmpf ogt, %4, %5 : vector<1x8xf32>
    %c0_3 = arith.constant 0 : index
    %c0_4 = arith.constant 0 : index
    %c0_5 = arith.constant 0 : index
    %7 = vector.load %arg6[%c0_3, %c0_4, %c0_5] : memref<1x8x1xf32, #tpu.memory_space<vmem>>, vector<1x8x1xf32>
    %8 = vector.shape_cast %7 : vector<1x8x1xf32> to vector<8x1xf32>
    %cst_6 = arith.constant 0.000000e+00 : f32
    %9 = vector.broadcast %cst_6 : f32 to vector<8x1xf32>
    %10 = arith.cmpf ogt, %8, %9 : vector<8x1xf32>
    %11 = vector.broadcast %6 : vector<1x8xi1> to vector<8x8xi1>
    %12 = vector.broadcast %10 : vector<8x1xi1> to vector<8x8xi1>
    %13 = arith.andi %11, %12 : vector<8x8xi1>
    %c0_7 = arith.constant 0 : index
    %c0_8 = arith.constant 0 : index
    %c0_9 = arith.constant 0 : index
    %14 = vector.load %arg3[%c0_7, %c0_8, %c0_9] : memref<1x8x32xbf16, #tpu.memory_space<vmem>>, vector<1x8x32xbf16>
    %15 = vector.shape_cast %14 : vector<1x8x32xbf16> to vector<8x32xbf16>
    %c0_10 = arith.constant 0 : index
    %c0_11 = arith.constant 0 : index
    %c0_12 = arith.constant 0 : index
    %16 = vector.load %arg4[%c0_10, %c0_11, %c0_12] : memref<1x8x32xbf16, #tpu.memory_space<vmem>>, vector<1x8x32xbf16>
    %17 = vector.shape_cast %16 : vector<1x8x32xbf16> to vector<8x32xbf16>
    %c0_13 = arith.constant 0 : index
    %c0_14 = arith.constant 0 : index
    %c0_15 = arith.constant 0 : index
    %18 = vector.load %arg5[%c0_13, %c0_14, %c0_15] : memref<1x8x32xbf16, #tpu.memory_space<vmem>>, vector<1x8x32xbf16>
    %19 = vector.shape_cast %18 : vector<1x8x32xbf16> to vector<8x32xbf16>
    %20 = vector.extract_strided_slice %15 {offsets = [0, 0], sizes = [8, 8], strides = [1, 1]} : vector<8x32xbf16> to vector<8x8xbf16>
    %21 = vector.extract_strided_slice %17 {offsets = [0, 0], sizes = [8, 8], strides = [1, 1]} : vector<8x32xbf16> to vector<8x8xbf16>
    %cst_16 = arith.constant dense<0.000000e+00> : vector<8x8xf32>
    %22 = tpu.matmul %20, %21, %cst_16 {dimension_numbers = #tpu.dot_dimension_numbers<[1], [1], [0], [0], [0, 0, 1, 0], [], []>} : vector<8x8xbf16>, vector<8x8xbf16>, vector<8x8xf32> -> vector<8x8xf32>
    %cst_17 = arith.constant -1.000000e+09 : f32
    %23 = vector.broadcast %cst_17 : f32 to vector<8x8xf32>
    %24 = arith.select %13, %22, %23 : vector<8x8xi1>, vector<8x8xf32>
    %c0_18 = arith.constant 0 : index
    %c0_19 = arith.constant 0 : index
    %c0_20 = arith.constant 0 : index
    %25 = vector.load %arg9[%c0_18, %c0_19, %c0_20] : memref<4x8x1xf32, #tpu.memory_space<vmem>>, vector<1x8x1xf32>
    %26 = vector.shape_cast %25 : vector<1x8x1xf32> to vector<8x1xf32>
    %cst_21 = arith.constant dense<0xFF800000> : vector<8xf32>
    %27 = vector.multi_reduction <maximumf>, %24, %cst_21 [1] : vector<8x8xf32> to vector<8xf32>
    %28 = vector.shape_cast %27 : vector<8xf32> to vector<8x1xf32>
    %29 = arith.maximumf %26, %28 : vector<8x1xf32>
    %30 = arith.subf %26, %29 : vector<8x1xf32>
    %31 = math.exp %30 : vector<8x1xf32>
    %32 = vector.broadcast %29 : vector<8x1xf32> to vector<8x8xf32>
    %33 = arith.subf %24, %32 : vector<8x8xf32>
    %34 = math.exp %33 : vector<8x8xf32>
    %c0_22 = arith.constant 0 : index
    %c0_23 = arith.constant 0 : index
    %c0_24 = arith.constant 0 : index
    %35 = vector.load %arg10[%c0_22, %c0_23, %c0_24] : memref<4x8x1xf32, #tpu.memory_space<vmem>>, vector<1x8x1xf32>
    %36 = vector.shape_cast %35 : vector<1x8x1xf32> to vector<8x1xf32>
    %37 = arith.mulf %31, %36 : vector<8x1xf32>
    %cst_25 = arith.constant dense<0.000000e+00> : vector<8xf32>
    %38 = vector.multi_reduction <add>, %34, %cst_25 [1] : vector<8x8xf32> to vector<8xf32>
    %39 = vector.shape_cast %38 : vector<8xf32> to vector<8x1xf32>
    %40 = arith.addf %37, %39 : vector<8x1xf32>
    %c0_26 = arith.constant 0 : index
    %c0_27 = arith.constant 0 : index
    %c0_28 = arith.constant 0 : index
    %41 = vector.load %arg10[%c0_26, %c0_27, %c0_28] : memref<4x8x1xf32, #tpu.memory_space<vmem>>, vector<1x8x1xf32>
    %42 = vector.shape_cast %41 : vector<1x8x1xf32> to vector<8x1xf32>
    %43 = vector.shape_cast %40 : vector<8x1xf32> to vector<1x8x1xf32>
    tpu.vector_store %arg10[%c0_26, %c0_27, %c0_28], %43 {strides = array<i32>} : memref<4x8x1xf32, #tpu.memory_space<vmem>>, vector<1x8x1xf32>,
    %c0_29 = arith.constant 0 : index
    %c0_30 = arith.constant 0 : index
    %c0_31 = arith.constant 0 : index
    %44 = vector.load %arg9[%c0_29, %c0_30, %c0_31] : memref<4x8x1xf32, #tpu.memory_space<vmem>>, vector<1x8x1xf32>
    %45 = vector.shape_cast %44 : vector<1x8x1xf32> to vector<8x1xf32>
    %46 = vector.shape_cast %29 : vector<8x1xf32> to vector<1x8x1xf32>
    tpu.vector_store %arg9[%c0_29, %c0_30, %c0_31], %46 {strides = array<i32>} : memref<4x8x1xf32, #tpu.memory_space<vmem>>, vector<1x8x1xf32>,
    %47 = arith.truncf %34 : vector<8x8xf32> to vector<8x8xbf16>
    %48 = vector.extract_strided_slice %19 {offsets = [0, 0], sizes = [8, 8], strides = [1, 1]} : vector<8x32xbf16> to vector<8x8xbf16>
    %cst_32 = arith.constant dense<0.000000e+00> : vector<8x8xf32>
    %49 = tpu.matmul %47, %48, %cst_32 {dimension_numbers = #tpu.dot_dimension_numbers<[1], [0], [0], [1], [0, 0, 1, 1], [], []>} : vector<8x8xbf16>, vector<8x8xbf16>, vector<8x8xf32> -> vector<8x8xf32>
    %c0_33 = arith.constant 0 : index
    %c0_34 = arith.constant 0 : index
    %50 = vector.load %arg11[%c0_33, %c0_34] : memref<8x32xf32, #tpu.memory_space<vmem>>, vector<8x8xf32>
    %51 = vector.broadcast %31 : vector<8x1xf32> to vector<8x8xf32>
    %52 = arith.mulf %51, %50 : vector<8x8xf32>
    %53 = arith.addf %52, %49 : vector<8x8xf32>
    %c0_35 = arith.constant 0 : index
    %c0_36 = arith.constant 0 : index
    %54 = vector.load %arg11[%c0_35, %c0_36] : memref<8x32xf32, #tpu.memory_space<vmem>>, vector<8x8xf32>
    tpu.vector_store %arg11[%c0_35, %c0_36], %53 {strides = array<i32>} : memref<8x32xf32, #tpu.memory_space<vmem>>, vector<8x8xf32>,
    %55 = vector.extract_strided_slice %15 {offsets = [0, 8], sizes = [8, 8], strides = [1, 1]} : vector<8x32xbf16> to vector<8x8xbf16>
    %56 = vector.extract_strided_slice %17 {offsets = [0, 8], sizes = [8, 8], strides = [1, 1]} : vector<8x32xbf16> to vector<8x8xbf16>
    %cst_37 = arith.constant dense<0.000000e+00> : vector<8x8xf32>
    %57 = tpu.matmul %55, %56, %cst_37 {dimension_numbers = #tpu.dot_dimension_numbers<[1], [1], [0], [0], [0, 0, 1, 0], [], []>} : vector<8x8xbf16>, vector<8x8xbf16>, vector<8x8xf32> -> vector<8x8xf32>
    %cst_38 = arith.constant -1.000000e+09 : f32
    %58 = vector.broadcast %cst_38 : f32 to vector<8x8xf32>
    %59 = arith.select %13, %57, %58 : vector<8x8xi1>, vector<8x8xf32>
    %c1 = arith.constant 1 : index
    %c0_39 = arith.constant 0 : index
    %c0_40 = arith.constant 0 : index
    %60 = vector.load %arg9[%c1, %c0_39, %c0_40] : memref<4x8x1xf32, #tpu.memory_space<vmem>>, vector<1x8x1xf32>
    %61 = vector.shape_cast %60 : vector<1x8x1xf32> to vector<8x1xf32>
    %cst_41 = arith.constant dense<0xFF800000> : vector<8xf32>
    %62 = vector.multi_reduction <maximumf>, %59, %cst_41 [1] : vector<8x8xf32> to vector<8xf32>
    %63 = vector.shape_cast %62 : vector<8xf32> to vector<8x1xf32>
    %64 = arith.maximumf %61, %63 : vector<8x1xf32>
    %65 = arith.subf %61, %64 : vector<8x1xf32>
    %66 = math.exp %65 : vector<8x1xf32>
    %67 = vector.broadcast %64 : vector<8x1xf32> to vector<8x8xf32>
    %68 = arith.subf %59, %67 : vector<8x8xf32>
    %69 = math.exp %68 : vector<8x8xf32>
    %c1_42 = arith.constant 1 : index
    %c0_43 = arith.constant 0 : index
    %c0_44 = arith.constant 0 : index
    %70 = vector.load %arg10[%c1_42, %c0_43, %c0_44] : memref<4x8x1xf32, #tpu.memory_space<vmem>>, vector<1x8x1xf32>
    %71 = vector.shape_cast %70 : vector<1x8x1xf32> to vector<8x1xf32>
    %72 = arith.mulf %66, %71 : vector<8x1xf32>
    %cst_45 = arith.constant dense<0.000000e+00> : vector<8xf32>
    %73 = vector.multi_reduction <add>, %69, %cst_45 [1] : vector<8x8xf32> to vector<8xf32>
    %74 = vector.shape_cast %73 : vector<8xf32> to vector<8x1xf32>
    %75 = arith.addf %72, %74 : vector<8x1xf32>
    %c1_46 = arith.constant 1 : index
    %c0_47 = arith.constant 0 : index
    %c0_48 = arith.constant 0 : index
    %76 = vector.load %arg10[%c1_46, %c0_47, %c0_48] : memref<4x8x1xf32, #tpu.memory_space<vmem>>, vector<1x8x1xf32>
    %77 = vector.shape_cast %76 : vector<1x8x1xf32> to vector<8x1xf32>
    %78 = vector.shape_cast %75 : vector<8x1xf32> to vector<1x8x1xf32>
    tpu.vector_store %arg10[%c1_46, %c0_47, %c0_48], %78 {strides = array<i32>} : memref<4x8x1xf32, #tpu.memory_space<vmem>>, vector<1x8x1xf32>,
    %c1_49 = arith.constant 1 : index
    %c0_50 = arith.constant 0 : index
    %c0_51 = arith.constant 0 : index
    %79 = vector.load %arg9[%c1_49, %c0_50, %c0_51] : memref<4x8x1xf32, #tpu.memory_space<vmem>>, vector<1x8x1xf32>
    %80 = vector.shape_cast %79 : vector<1x8x1xf32> to vector<8x1xf32>
    %81 = vector.shape_cast %64 : vector<8x1xf32> to vector<1x8x1xf32>
    tpu.vector_store %arg9[%c1_49, %c0_50, %c0_51], %81 {strides = array<i32>} : memref<4x8x1xf32, #tpu.memory_space<vmem>>, vector<1x8x1xf32>,
    %82 = arith.truncf %69 : vector<8x8xf32> to vector<8x8xbf16>
    %83 = vector.extract_strided_slice %19 {offsets = [0, 8], sizes = [8, 8], strides = [1, 1]} : vector<8x32xbf16> to vector<8x8xbf16>
    %cst_52 = arith.constant dense<0.000000e+00> : vector<8x8xf32>
    %84 = tpu.matmul %82, %83, %cst_52 {dimension_numbers = #tpu.dot_dimension_numbers<[1], [0], [0], [1], [0, 0, 1, 1], [], []>} : vector<8x8xbf16>, vector<8x8xbf16>, vector<8x8xf32> -> vector<8x8xf32>
    %c0_53 = arith.constant 0 : index
    %c8 = arith.constant 8 : index
    %85 = vector.load %arg11[%c0_53, %c8] : memref<8x32xf32, #tpu.memory_space<vmem>>, vector<8x8xf32>
    %86 = vector.broadcast %66 : vector<8x1xf32> to vector<8x8xf32>
    %87 = arith.mulf %86, %85 : vector<8x8xf32>
    %88 = arith.addf %87, %84 : vector<8x8xf32>
    %c0_54 = arith.constant 0 : index
    %c8_55 = arith.constant 8 : index
    %89 = vector.load %arg11[%c0_54, %c8_55] : memref<8x32xf32, #tpu.memory_space<vmem>>, vector<8x8xf32>
    tpu.vector_store %arg11[%c0_54, %c8_55], %88 {strides = array<i32>} : memref<8x32xf32, #tpu.memory_space<vmem>>, vector<8x8xf32>,
    %90 = vector.extract_strided_slice %15 {offsets = [0, 16], sizes = [8, 8], strides = [1, 1]} : vector<8x32xbf16> to vector<8x8xbf16>
    %91 = vector.extract_strided_slice %17 {offsets = [0, 16], sizes = [8, 8], strides = [1, 1]} : vector<8x32xbf16> to vector<8x8xbf16>
    %cst_56 = arith.constant dense<0.000000e+00> : vector<8x8xf32>
    %92 = tpu.matmul %90, %91, %cst_56 {dimension_numbers = #tpu.dot_dimension_numbers<[1], [1], [0], [0], [0, 0, 1, 0], [], []>} : vector<8x8xbf16>, vector<8x8xbf16>, vector<8x8xf32> -> vector<8x8xf32>
    %cst_57 = arith.constant -1.000000e+09 : f32
    %93 = vector.broadcast %cst_57 : f32 to vector<8x8xf32>
    %94 = arith.select %13, %92, %93 : vector<8x8xi1>, vector<8x8xf32>
    %c2 = arith.constant 2 : index
    %c0_58 = arith.constant 0 : index
    %c0_59 = arith.constant 0 : index
    %95 = vector.load %arg9[%c2, %c0_58, %c0_59] : memref<4x8x1xf32, #tpu.memory_space<vmem>>, vector<1x8x1xf32>
    %96 = vector.shape_cast %95 : vector<1x8x1xf32> to vector<8x1xf32>
    %cst_60 = arith.constant dense<0xFF800000> : vector<8xf32>
    %97 = vector.multi_reduction <maximumf>, %94, %cst_60 [1] : vector<8x8xf32> to vector<8xf32>
    %98 = vector.shape_cast %97 : vector<8xf32> to vector<8x1xf32>
    %99 = arith.maximumf %96, %98 : vector<8x1xf32>
    %100 = arith.subf %96, %99 : vector<8x1xf32>
    %101 = math.exp %100 : vector<8x1xf32>
    %102 = vector.broadcast %99 : vector<8x1xf32> to vector<8x8xf32>
    %103 = arith.subf %94, %102 : vector<8x8xf32>
    %104 = math.exp %103 : vector<8x8xf32>
    %c2_61 = arith.constant 2 : index
    %c0_62 = arith.constant 0 : index
    %c0_63 = arith.constant 0 : index
    %105 = vector.load %arg10[%c2_61, %c0_62, %c0_63] : memref<4x8x1xf32, #tpu.memory_space<vmem>>, vector<1x8x1xf32>
    %106 = vector.shape_cast %105 : vector<1x8x1xf32> to vector<8x1xf32>
    %107 = arith.mulf %101, %106 : vector<8x1xf32>
    %cst_64 = arith.constant dense<0.000000e+00> : vector<8xf32>
    %108 = vector.multi_reduction <add>, %104, %cst_64 [1] : vector<8x8xf32> to vector<8xf32>
    %109 = vector.shape_cast %108 : vector<8xf32> to vector<8x1xf32>
    %110 = arith.addf %107, %109 : vector<8x1xf32>
    %c2_65 = arith.constant 2 : index
    %c0_66 = arith.constant 0 : index
    %c0_67 = arith.constant 0 : index
    %111 = vector.load %arg10[%c2_65, %c0_66, %c0_67] : memref<4x8x1xf32, #tpu.memory_space<vmem>>, vector<1x8x1xf32>
    %112 = vector.shape_cast %111 : vector<1x8x1xf32> to vector<8x1xf32>
    %113 = vector.shape_cast %110 : vector<8x1xf32> to vector<1x8x1xf32>
    tpu.vector_store %arg10[%c2_65, %c0_66, %c0_67], %113 {strides = array<i32>} : memref<4x8x1xf32, #tpu.memory_space<vmem>>, vector<1x8x1xf32>,
    %c2_68 = arith.constant 2 : index
    %c0_69 = arith.constant 0 : index
    %c0_70 = arith.constant 0 : index
    %114 = vector.load %arg9[%c2_68, %c0_69, %c0_70] : memref<4x8x1xf32, #tpu.memory_space<vmem>>, vector<1x8x1xf32>
    %115 = vector.shape_cast %114 : vector<1x8x1xf32> to vector<8x1xf32>
    %116 = vector.shape_cast %99 : vector<8x1xf32> to vector<1x8x1xf32>
    tpu.vector_store %arg9[%c2_68, %c0_69, %c0_70], %116 {strides = array<i32>} : memref<4x8x1xf32, #tpu.memory_space<vmem>>, vector<1x8x1xf32>,
    %117 = arith.truncf %104 : vector<8x8xf32> to vector<8x8xbf16>
    %118 = vector.extract_strided_slice %19 {offsets = [0, 16], sizes = [8, 8], strides = [1, 1]} : vector<8x32xbf16> to vector<8x8xbf16>
    %cst_71 = arith.constant dense<0.000000e+00> : vector<8x8xf32>
    %119 = tpu.matmul %117, %118, %cst_71 {dimension_numbers = #tpu.dot_dimension_numbers<[1], [0], [0], [1], [0, 0, 1, 1], [], []>} : vector<8x8xbf16>, vector<8x8xbf16>, vector<8x8xf32> -> vector<8x8xf32>
    %c0_72 = arith.constant 0 : index
    %c16 = arith.constant 16 : index
    %120 = vector.load %arg11[%c0_72, %c16] : memref<8x32xf32, #tpu.memory_space<vmem>>, vector<8x8xf32>
    %121 = vector.broadcast %101 : vector<8x1xf32> to vector<8x8xf32>
    %122 = arith.mulf %121, %120 : vector<8x8xf32>
    %123 = arith.addf %122, %119 : vector<8x8xf32>
    %c0_73 = arith.constant 0 : index
    %c16_74 = arith.constant 16 : index
    %124 = vector.load %arg11[%c0_73, %c16_74] : memref<8x32xf32, #tpu.memory_space<vmem>>, vector<8x8xf32>
    tpu.vector_store %arg11[%c0_73, %c16_74], %123 {strides = array<i32>} : memref<8x32xf32, #tpu.memory_space<vmem>>, vector<8x8xf32>,
    %125 = vector.extract_strided_slice %15 {offsets = [0, 24], sizes = [8, 8], strides = [1, 1]} : vector<8x32xbf16> to vector<8x8xbf16>
    %126 = vector.extract_strided_slice %17 {offsets = [0, 24], sizes = [8, 8], strides = [1, 1]} : vector<8x32xbf16> to vector<8x8xbf16>
    %cst_75 = arith.constant dense<0.000000e+00> : vector<8x8xf32>
    %127 = tpu.matmul %125, %126, %cst_75 {dimension_numbers = #tpu.dot_dimension_numbers<[1], [1], [0], [0], [0, 0, 1, 0], [], []>} : vector<8x8xbf16>, vector<8x8xbf16>, vector<8x8xf32> -> vector<8x8xf32>
    %cst_76 = arith.constant -1.000000e+09 : f32
    %128 = vector.broadcast %cst_76 : f32 to vector<8x8xf32>
    %129 = arith.select %13, %127, %128 : vector<8x8xi1>, vector<8x8xf32>
    %c3 = arith.constant 3 : index
    %c0_77 = arith.constant 0 : index
    %c0_78 = arith.constant 0 : index
    %130 = vector.load %arg9[%c3, %c0_77, %c0_78] : memref<4x8x1xf32, #tpu.memory_space<vmem>>, vector<1x8x1xf32>
    %131 = vector.shape_cast %130 : vector<1x8x1xf32> to vector<8x1xf32>
    %cst_79 = arith.constant dense<0xFF800000> : vector<8xf32>
    %132 = vector.multi_reduction <maximumf>, %129, %cst_79 [1] : vector<8x8xf32> to vector<8xf32>
    %133 = vector.shape_cast %132 : vector<8xf32> to vector<8x1xf32>
    %134 = arith.maximumf %131, %133 : vector<8x1xf32>
    %135 = arith.subf %131, %134 : vector<8x1xf32>
    %136 = math.exp %135 : vector<8x1xf32>
    %137 = vector.broadcast %134 : vector<8x1xf32> to vector<8x8xf32>
    %138 = arith.subf %129, %137 : vector<8x8xf32>
    %139 = math.exp %138 : vector<8x8xf32>
    %c3_80 = arith.constant 3 : index
    %c0_81 = arith.constant 0 : index
    %c0_82 = arith.constant 0 : index
    %140 = vector.load %arg10[%c3_80, %c0_81, %c0_82] : memref<4x8x1xf32, #tpu.memory_space<vmem>>, vector<1x8x1xf32>
    %141 = vector.shape_cast %140 : vector<1x8x1xf32> to vector<8x1xf32>
    %142 = arith.mulf %136, %141 : vector<8x1xf32>
    %cst_83 = arith.constant dense<0.000000e+00> : vector<8xf32>
    %143 = vector.multi_reduction <add>, %139, %cst_83 [1] : vector<8x8xf32> to vector<8xf32>
    %144 = vector.shape_cast %143 : vector<8xf32> to vector<8x1xf32>
    %145 = arith.addf %142, %144 : vector<8x1xf32>
    %c3_84 = arith.constant 3 : index
    %c0_85 = arith.constant 0 : index
    %c0_86 = arith.constant 0 : index
    %146 = vector.load %arg10[%c3_84, %c0_85, %c0_86] : memref<4x8x1xf32, #tpu.memory_space<vmem>>, vector<1x8x1xf32>
    %147 = vector.shape_cast %146 : vector<1x8x1xf32> to vector<8x1xf32>
    %148 = vector.shape_cast %145 : vector<8x1xf32> to vector<1x8x1xf32>
    tpu.vector_store %arg10[%c3_84, %c0_85, %c0_86], %148 {strides = array<i32>} : memref<4x8x1xf32, #tpu.memory_space<vmem>>, vector<1x8x1xf32>,
    %c3_87 = arith.constant 3 : index
    %c0_88 = arith.constant 0 : index
    %c0_89 = arith.constant 0 : index
    %149 = vector.load %arg9[%c3_87, %c0_88, %c0_89] : memref<4x8x1xf32, #tpu.memory_space<vmem>>, vector<1x8x1xf32>
    %150 = vector.shape_cast %149 : vector<1x8x1xf32> to vector<8x1xf32>
    %151 = vector.shape_cast %134 : vector<8x1xf32> to vector<1x8x1xf32>
    tpu.vector_store %arg9[%c3_87, %c0_88, %c0_89], %151 {strides = array<i32>} : memref<4x8x1xf32, #tpu.memory_space<vmem>>, vector<1x8x1xf32>,
    %152 = arith.truncf %139 : vector<8x8xf32> to vector<8x8xbf16>
    %153 = vector.extract_strided_slice %19 {offsets = [0, 24], sizes = [8, 8], strides = [1, 1]} : vector<8x32xbf16> to vector<8x8xbf16>
    %cst_90 = arith.constant dense<0.000000e+00> : vector<8x8xf32>
    %154 = tpu.matmul %152, %153, %cst_90 {dimension_numbers = #tpu.dot_dimension_numbers<[1], [0], [0], [1], [0, 0, 1, 1], [], []>} : vector<8x8xbf16>, vector<8x8xbf16>, vector<8x8xf32> -> vector<8x8xf32>
    %c0_91 = arith.constant 0 : index
    %c24 = arith.constant 24 : index
    %155 = vector.load %arg11[%c0_91, %c24] : memref<8x32xf32, #tpu.memory_space<vmem>>, vector<8x8xf32>
    %156 = vector.broadcast %136 : vector<8x1xf32> to vector<8x8xf32>
    %157 = arith.mulf %156, %155 : vector<8x8xf32>
    %158 = arith.addf %157, %154 : vector<8x8xf32>
    %c0_92 = arith.constant 0 : index
    %c24_93 = arith.constant 24 : index
    %159 = vector.load %arg11[%c0_92, %c24_93] : memref<8x32xf32, #tpu.memory_space<vmem>>, vector<8x8xf32>
    tpu.vector_store %arg11[%c0_92, %c24_93], %158 {strides = array<i32>} : memref<8x32xf32, #tpu.memory_space<vmem>>, vector<8x8xf32>,
    %c0_i32_94 = arith.constant 0 : i32
    %160 = arith.cmpi eq, %arg2, %c0_i32_94 : i32
    %161 = arith.extui %160 : i1 to i32
    %c0_i32_95 = arith.constant 0 : i32
    %162 = arith.cmpi ne, %161, %c0_i32_95 : i32
    scf.if %162 {
      %c0_96 = arith.constant 0 : index
      %c0_97 = arith.constant 0 : index
      %c0_98 = arith.constant 0 : index
      %163 = vector.load %arg10[%c0_96, %c0_97, %c0_98] : memref<4x8x1xf32, #tpu.memory_space<vmem>>, vector<1x8x1xf32>
      %164 = vector.shape_cast %163 : vector<1x8x1xf32> to vector<8x1xf32>
      %165 = tpu.reciprocal %164 {approx = true} : vector<8x1xf32> -> vector<8x1xf32>
      %c0_99 = arith.constant 0 : index
      %c0_100 = arith.constant 0 : index
      %166 = vector.load %arg11[%c0_99, %c0_100] : memref<8x32xf32, #tpu.memory_space<vmem>>, vector<8x8xf32>
      %167 = vector.broadcast %165 : vector<8x1xf32> to vector<8x8xf32>
      %168 = arith.mulf %166, %167 : vector<8x8xf32>
      %c0_101 = arith.constant 0 : index
      %c0_102 = arith.constant 0 : index
      %169 = vector.load %arg11[%c0_101, %c0_102] : memref<8x32xf32, #tpu.memory_space<vmem>>, vector<8x8xf32>
      tpu.vector_store %arg11[%c0_101, %c0_102], %168 {strides = array<i32>} : memref<8x32xf32, #tpu.memory_space<vmem>>, vector<8x8xf32>,
      %c1_103 = arith.constant 1 : index
      %c0_104 = arith.constant 0 : index
      %c0_105 = arith.constant 0 : index
      %170 = vector.load %arg10[%c1_103, %c0_104, %c0_105] : memref<4x8x1xf32, #tpu.memory_space<vmem>>, vector<1x8x1xf32>
      %171 = vector.shape_cast %170 : vector<1x8x1xf32> to vector<8x1xf32>
      %172 = tpu.reciprocal %171 {approx = true} : vector<8x1xf32> -> vector<8x1xf32>
      %c0_106 = arith.constant 0 : index
      %c8_107 = arith.constant 8 : index
      %173 = vector.load %arg11[%c0_106, %c8_107] : memref<8x32xf32, #tpu.memory_space<vmem>>, vector<8x8xf32>
      %174 = vector.broadcast %172 : vector<8x1xf32> to vector<8x8xf32>
      %175 = arith.mulf %173, %174 : vector<8x8xf32>
      %c0_108 = arith.constant 0 : index
      %c8_109 = arith.constant 8 : index
      %176 = vector.load %arg11[%c0_108, %c8_109] : memref<8x32xf32, #tpu.memory_space<vmem>>, vector<8x8xf32>
      tpu.vector_store %arg11[%c0_108, %c8_109], %175 {strides = array<i32>} : memref<8x32xf32, #tpu.memory_space<vmem>>, vector<8x8xf32>,
      %c2_110 = arith.constant 2 : index
      %c0_111 = arith.constant 0 : index
      %c0_112 = arith.constant 0 : index
      %177 = vector.load %arg10[%c2_110, %c0_111, %c0_112] : memref<4x8x1xf32, #tpu.memory_space<vmem>>, vector<1x8x1xf32>
      %178 = vector.shape_cast %177 : vector<1x8x1xf32> to vector<8x1xf32>
      %179 = tpu.reciprocal %178 {approx = true} : vector<8x1xf32> -> vector<8x1xf32>
      %c0_113 = arith.constant 0 : index
      %c16_114 = arith.constant 16 : index
      %180 = vector.load %arg11[%c0_113, %c16_114] : memref<8x32xf32, #tpu.memory_space<vmem>>, vector<8x8xf32>
      %181 = vector.broadcast %179 : vector<8x1xf32> to vector<8x8xf32>
      %182 = arith.mulf %180, %181 : vector<8x8xf32>
      %c0_115 = arith.constant 0 : index
      %c16_116 = arith.constant 16 : index
      %183 = vector.load %arg11[%c0_115, %c16_116] : memref<8x32xf32, #tpu.memory_space<vmem>>, vector<8x8xf32>
      tpu.vector_store %arg11[%c0_115, %c16_116], %182 {strides = array<i32>} : memref<8x32xf32, #tpu.memory_space<vmem>>, vector<8x8xf32>,
      %c3_117 = arith.constant 3 : index
      %c0_118 = arith.constant 0 : index
      %c0_119 = arith.constant 0 : index
      %184 = vector.load %arg10[%c3_117, %c0_118, %c0_119] : memref<4x8x1xf32, #tpu.memory_space<vmem>>, vector<1x8x1xf32>
      %185 = vector.shape_cast %184 : vector<1x8x1xf32> to vector<8x1xf32>
      %186 = tpu.reciprocal %185 {approx = true} : vector<8x1xf32> -> vector<8x1xf32>
      %c0_120 = arith.constant 0 : index
      %c24_121 = arith.constant 24 : index
      %187 = vector.load %arg11[%c0_120, %c24_121] : memref<8x32xf32, #tpu.memory_space<vmem>>, vector<8x8xf32>
      %188 = vector.broadcast %186 : vector<8x1xf32> to vector<8x8xf32>
      %189 = arith.mulf %187, %188 : vector<8x8xf32>
      %c0_122 = arith.constant 0 : index
      %c24_123 = arith.constant 24 : index
      %190 = vector.load %arg11[%c0_122, %c24_123] : memref<8x32xf32, #tpu.memory_space<vmem>>, vector<8x8xf32>
      tpu.vector_store %arg11[%c0_122, %c24_123], %189 {strides = array<i32>} : memref<8x32xf32, #tpu.memory_space<vmem>>, vector<8x8xf32>,
      %c0_124 = arith.constant 0 : index
      %c0_125 = arith.constant 0 : index
      %191 = vector.load %arg11[%c0_124, %c0_125] : memref<8x32xf32, #tpu.memory_space<vmem>>, vector<8x32xf32>
      %192 = arith.truncf %191 : vector<8x32xf32> to vector<8x32xbf16>
      %c0_126 = arith.constant 0 : index
      %c0_127 = arith.constant 0 : index
      %c0_128 = arith.constant 0 : index
      %193 = vector.load %arg8[%c0_126, %c0_127, %c0_128] : memref<1x8x32xbf16, #tpu.memory_space<vmem>>, vector<1x8x32xbf16>
      %194 = vector.shape_cast %193 : vector<1x8x32xbf16> to vector<8x32xbf16>
      %195 = vector.shape_cast %192 : vector<8x32xbf16> to vector<1x8x32xbf16>
      tpu.vector_store %arg8[%c0_126, %c0_127, %c0_128], %195 {strides = array<i32>} : memref<1x8x32xbf16, #tpu.memory_space<vmem>>, vector<1x8x32xbf16>,
    } else {
    }
    return
  }
  func.func @transform_0(%arg0: i32, %arg1: i32, %arg2: i32) -> (i32, i32, i32) {
    %c0_i32 = arith.constant 0 : i32
    %c0_i32_0 = arith.constant 0 : i32
    return %arg0, %arg1, %c0_i32 : i32, i32, i32
  }
  func.func @transform_1(%arg0: i32, %arg1: i32, %arg2: i32) -> (i32, i32, i32) {
    %c0_i32 = arith.constant 0 : i32
    %c0_i32_0 = arith.constant 0 : i32
    return %arg0, %arg2, %c0_i32 : i32, i32, i32
  }
  func.func @transform_2(%arg0: i32, %arg1: i32, %arg2: i32) -> (i32, i32, i32) {
    %c0_i32 = arith.constant 0 : i32
    %c0_i32_0 = arith.constant 0 : i32
    return %arg0, %arg2, %c0_i32 : i32, i32, i32
  }
  func.func @transform_3(%arg0: i32, %arg1: i32, %arg2: i32) -> (i32, i32, i32) {
    %c0_i32 = arith.constant 0 : i32
    %c0_i32_0 = arith.constant 0 : i32
    return %arg0, %arg1, %c0_i32 : i32, i32, i32
  }
  func.func @transform_4(%arg0: i32, %arg1: i32, %arg2: i32) -> (i32, i32, i32) {
    %c0_i32 = arith.constant 0 : i32
    %c0_i32_0 = arith.constant 0 : i32
    return %arg0, %c0_i32, %arg2 : i32, i32, i32
  }
  func.func @transform_5(%arg0: i32, %arg1: i32, %arg2: i32) -> (i32, i32, i32) {
    %c0_i32 = arith.constant 0 : i32
    %c0_i32_0 = arith.constant 0 : i32
    return %arg0, %arg1, %c0_i32 : i32, i32, i32
  }
}

module attributes {stable_mosaic.version = 11 : i64} {
  func.func @_linear_ln_kernel(%arg0: i32, %arg1: i32, %arg2: memref<16x32xbf16, #tpu.memory_space<vmem>>, %arg3: memref<32x32xbf16, #tpu.memory_space<vmem>>, %arg4: memref<1x32xf32, #tpu.memory_space<vmem>>, %arg5: memref<16x32xbf16, #tpu.memory_space<vmem>>, %arg6: memref<1x32xf32, #tpu.memory_space<vmem>>, %arg7: memref<1x32xf32, #tpu.memory_space<vmem>>, %arg8: memref<16x32xbf16, #tpu.memory_space<vmem>>, %arg9: memref<16x32xf32, #tpu.memory_space<vmem>>) attributes {dimension_semantics = [#tpu.dimension_semantics<parallel>, #tpu.dimension_semantics<arbitrary>], iteration_bounds = array<i64: 1, 1>, scalar_prefetch = 0 : i64, scratch_operands = 1 : i64, tpu.core_type = #tpu.core_type<tc>, window_params = [{transform_indices = @transform_0, window_bounds = array<i64: 16, 32>}, {transform_indices = @transform_1, window_bounds = array<i64: 32, 32>}, {pipeline_mode = #tpu.pipeline_mode<synchronous>, transform_indices = @transform_2, window_bounds = array<i64: 1, 32>}, {transform_indices = @transform_3, window_bounds = array<i64: 16, 32>}, {pipeline_mode = #tpu.pipeline_mode<synchronous>, transform_indices = @transform_4, window_bounds = array<i64: 1, 32>}, {pipeline_mode = #tpu.pipeline_mode<synchronous>, transform_indices = @transform_5, window_bounds = array<i64: 1, 32>}, {transform_indices = @transform_6, window_bounds = array<i64: 16, 32>}]} {
    %c0_i32 = arith.constant 0 : i32
    %0 = arith.cmpi eq, %arg1, %c0_i32 : i32
    %1 = arith.extui %0 : i1 to i32
    %c0_i32_0 = arith.constant 0 : i32
    %2 = arith.cmpi ne, %1, %c0_i32_0 : i32
    scf.if %2 {
      %cst_10 = arith.constant 0.000000e+00 : f32
      %12 = vector.broadcast %cst_10 : f32 to vector<16x32xf32>
      %c0_11 = arith.constant 0 : index
      %c0_12 = arith.constant 0 : index
      %13 = vector.load %arg9[%c0_11, %c0_12] : memref<16x32xf32, #tpu.memory_space<vmem>>, vector<16x32xf32>
      tpu.vector_store %arg9[%c0_11, %c0_12], %12 {strides = array<i32>} : memref<16x32xf32, #tpu.memory_space<vmem>>, vector<16x32xf32>,
    } else {
    }
    %c0 = arith.constant 0 : index
    %c0_1 = arith.constant 0 : index
    %3 = vector.load %arg9[%c0, %c0_1] : memref<16x32xf32, #tpu.memory_space<vmem>>, vector<16x32xf32>
    %c0_2 = arith.constant 0 : index
    %c0_3 = arith.constant 0 : index
    %4 = vector.load %arg2[%c0_2, %c0_3] : memref<16x32xbf16, #tpu.memory_space<vmem>>, vector<16x32xbf16>
    %c0_4 = arith.constant 0 : index
    %c0_5 = arith.constant 0 : index
    %5 = vector.load %arg3[%c0_4, %c0_5] : memref<32x32xbf16, #tpu.memory_space<vmem>>, vector<32x32xbf16>
    %cst = arith.constant dense<0.000000e+00> : vector<16x32xf32>
    %6 = tpu.matmul %4, %5, %cst {dimension_numbers = #tpu.dot_dimension_numbers<[1], [0], [0], [1], [0, 0, 1, 1], [], []>} : vector<16x32xbf16>, vector<32x32xbf16>, vector<16x32xf32> -> vector<16x32xf32>
    %7 = arith.addf %3, %6 : vector<16x32xf32>
    %c0_6 = arith.constant 0 : index
    %c0_7 = arith.constant 0 : index
    %8 = vector.load %arg9[%c0_6, %c0_7] : memref<16x32xf32, #tpu.memory_space<vmem>>, vector<16x32xf32>
    tpu.vector_store %arg9[%c0_6, %c0_7], %7 {strides = array<i32>} : memref<16x32xf32, #tpu.memory_space<vmem>>, vector<16x32xf32>,
    %c0_i32_8 = arith.constant 0 : i32
    %9 = arith.cmpi eq, %arg1, %c0_i32_8 : i32
    %10 = arith.extui %9 : i1 to i32
    %c0_i32_9 = arith.constant 0 : i32
    %11 = arith.cmpi ne, %10, %c0_i32_9 : i32
    scf.if %11 {
      %c0_10 = arith.constant 0 : index
      %c0_11 = arith.constant 0 : index
      %12 = vector.load %arg9[%c0_10, %c0_11] : memref<16x32xf32, #tpu.memory_space<vmem>>, vector<16x32xf32>
      %c0_12 = arith.constant 0 : index
      %c0_13 = arith.constant 0 : index
      %13 = vector.load %arg4[%c0_12, %c0_13] : memref<1x32xf32, #tpu.memory_space<vmem>>, vector<1x32xf32>
      %14 = vector.broadcast %13 : vector<1x32xf32> to vector<16x32xf32>
      %15 = arith.addf %12, %14 : vector<16x32xf32>
      %c0_14 = arith.constant 0 : index
      %c0_15 = arith.constant 0 : index
      %16 = vector.load %arg5[%c0_14, %c0_15] : memref<16x32xbf16, #tpu.memory_space<vmem>>, vector<16x32xbf16>
      %17 = arith.extf %16 : vector<16x32xbf16> to vector<16x32xf32>
      %18 = arith.addf %15, %17 : vector<16x32xf32>
      %cst_16 = arith.constant dense<0.000000e+00> : vector<16xf32>
      %19 = vector.multi_reduction <add>, %18, %cst_16 [1] : vector<16x32xf32> to vector<16xf32>
      %20 = vector.shape_cast %19 : vector<16xf32> to vector<16x1xf32>
      %cst_17 = arith.constant 3.200000e+01 : f32
      %21 = vector.broadcast %cst_17 : f32 to vector<16x1xf32>
      %22 = arith.divf %20, %21 : vector<16x1xf32>
      %23 = vector.broadcast %22 : vector<16x1xf32> to vector<16x32xf32>
      %24 = arith.subf %18, %23 : vector<16x32xf32>
      %25 = arith.mulf %24, %24 : vector<16x32xf32>
      %cst_18 = arith.constant dense<0.000000e+00> : vector<16xf32>
      %26 = vector.multi_reduction <add>, %25, %cst_18 [1] : vector<16x32xf32> to vector<16xf32>
      %27 = vector.shape_cast %26 : vector<16xf32> to vector<16x1xf32>
      %cst_19 = arith.constant 3.200000e+01 : f32
      %28 = vector.broadcast %cst_19 : f32 to vector<16x1xf32>
      %29 = arith.divf %27, %28 : vector<16x1xf32>
      %30 = vector.broadcast %22 : vector<16x1xf32> to vector<16x32xf32>
      %31 = arith.subf %18, %30 : vector<16x32xf32>
      %cst_20 = arith.constant 9.99999996E-13 : f32
      %32 = vector.broadcast %cst_20 : f32 to vector<16x1xf32>
      %33 = arith.addf %29, %32 : vector<16x1xf32>
      %34 = math.rsqrt %33 : vector<16x1xf32>
      %35 = vector.broadcast %34 : vector<16x1xf32> to vector<16x32xf32>
      %36 = arith.mulf %31, %35 : vector<16x32xf32>
      %c0_21 = arith.constant 0 : index
      %c0_22 = arith.constant 0 : index
      %37 = vector.load %arg6[%c0_21, %c0_22] : memref<1x32xf32, #tpu.memory_space<vmem>>, vector<1x32xf32>
      %38 = vector.broadcast %37 : vector<1x32xf32> to vector<16x32xf32>
      %39 = arith.mulf %36, %38 : vector<16x32xf32>
      %c0_23 = arith.constant 0 : index
      %c0_24 = arith.constant 0 : index
      %40 = vector.load %arg7[%c0_23, %c0_24] : memref<1x32xf32, #tpu.memory_space<vmem>>, vector<1x32xf32>
      %41 = vector.broadcast %40 : vector<1x32xf32> to vector<16x32xf32>
      %42 = arith.addf %39, %41 : vector<16x32xf32>
      %43 = arith.truncf %42 : vector<16x32xf32> to vector<16x32xbf16>
      %c0_25 = arith.constant 0 : index
      %c0_26 = arith.constant 0 : index
      %44 = vector.load %arg8[%c0_25, %c0_26] : memref<16x32xbf16, #tpu.memory_space<vmem>>, vector<16x32xbf16>
      tpu.vector_store %arg8[%c0_25, %c0_26], %43 {strides = array<i32>} : memref<16x32xbf16, #tpu.memory_space<vmem>>, vector<16x32xbf16>,
    } else {
    }
    return
  }
  func.func @transform_0(%arg0: i32, %arg1: i32) -> (i32, i32) {
    %c0_i32 = arith.constant 0 : i32
    return %arg0, %arg1 : i32, i32
  }
  func.func @transform_1(%arg0: i32, %arg1: i32) -> (i32, i32) {
    %c0_i32 = arith.constant 0 : i32
    %c0_i32_0 = arith.constant 0 : i32
    return %arg1, %c0_i32 : i32, i32
  }
  func.func @transform_2(%arg0: i32, %arg1: i32) -> (i32, i32) {
    %c0_i32 = arith.constant 0 : i32
    %c0_i32_0 = arith.constant 0 : i32
    %c0_i32_1 = arith.constant 0 : i32
    return %c0_i32, %c0_i32_0 : i32, i32
  }
  func.func @transform_3(%arg0: i32, %arg1: i32) -> (i32, i32) {
    %c0_i32 = arith.constant 0 : i32
    %c0_i32_0 = arith.constant 0 : i32
    return %arg0, %c0_i32 : i32, i32
  }
  func.func @transform_4(%arg0: i32, %arg1: i32) -> (i32, i32) {
    %c0_i32 = arith.constant 0 : i32
    %c0_i32_0 = arith.constant 0 : i32
    %c0_i32_1 = arith.constant 0 : i32
    return %c0_i32, %c0_i32_0 : i32, i32
  }
  func.func @transform_5(%arg0: i32, %arg1: i32) -> (i32, i32) {
    %c0_i32 = arith.constant 0 : i32
    %c0_i32_0 = arith.constant 0 : i32
    %c0_i32_1 = arith.constant 0 : i32
    return %c0_i32, %c0_i32_0 : i32, i32
  }
  func.func @transform_6(%arg0: i32, %arg1: i32) -> (i32, i32) {
    %c0_i32 = arith.constant 0 : i32
    %c0_i32_0 = arith.constant 0 : i32
    return %arg0, %c0_i32 : i32, i32
  }
}

module attributes {stable_mosaic.version = 11 : i64} {
  func.func @_linear_kernel(%arg0: i32, %arg1: i32, %arg2: i32, %arg3: memref<16x32xbf16, #tpu.memory_space<vmem>>, %arg4: memref<32x64xbf16, #tpu.memory_space<vmem>>, %arg5: memref<1x64xf32, #tpu.memory_space<vmem>>, %arg6: memref<16x64xbf16, #tpu.memory_space<vmem>>, %arg7: memref<16x64xf32, #tpu.memory_space<vmem>>) attributes {dimension_semantics = [#tpu.dimension_semantics<parallel>, #tpu.dimension_semantics<parallel>, #tpu.dimension_semantics<arbitrary>], iteration_bounds = array<i64: 1, 1, 1>, scalar_prefetch = 0 : i64, scratch_operands = 1 : i64, tpu.core_type = #tpu.core_type<tc>, window_params = [{transform_indices = @transform_0, window_bounds = array<i64: 16, 32>}, {transform_indices = @transform_1, window_bounds = array<i64: 32, 64>}, {transform_indices = @transform_2, window_bounds = array<i64: 1, 64>}, {transform_indices = @transform_3, window_bounds = array<i64: 16, 64>}]} {
    %c0_i32 = arith.constant 0 : i32
    %0 = arith.cmpi eq, %arg2, %c0_i32 : i32
    %1 = arith.extui %0 : i1 to i32
    %c0_i32_0 = arith.constant 0 : i32
    %2 = arith.cmpi ne, %1, %c0_i32_0 : i32
    scf.if %2 {
      %cst_10 = arith.constant 0.000000e+00 : f32
      %12 = vector.broadcast %cst_10 : f32 to vector<16x64xf32>
      %c0_11 = arith.constant 0 : index
      %c0_12 = arith.constant 0 : index
      %13 = vector.load %arg7[%c0_11, %c0_12] : memref<16x64xf32, #tpu.memory_space<vmem>>, vector<16x64xf32>
      tpu.vector_store %arg7[%c0_11, %c0_12], %12 {strides = array<i32>} : memref<16x64xf32, #tpu.memory_space<vmem>>, vector<16x64xf32>,
    } else {
    }
    %c0 = arith.constant 0 : index
    %c0_1 = arith.constant 0 : index
    %3 = vector.load %arg7[%c0, %c0_1] : memref<16x64xf32, #tpu.memory_space<vmem>>, vector<16x64xf32>
    %c0_2 = arith.constant 0 : index
    %c0_3 = arith.constant 0 : index
    %4 = vector.load %arg3[%c0_2, %c0_3] : memref<16x32xbf16, #tpu.memory_space<vmem>>, vector<16x32xbf16>
    %c0_4 = arith.constant 0 : index
    %c0_5 = arith.constant 0 : index
    %5 = vector.load %arg4[%c0_4, %c0_5] : memref<32x64xbf16, #tpu.memory_space<vmem>>, vector<32x64xbf16>
    %cst = arith.constant dense<0.000000e+00> : vector<16x64xf32>
    %6 = tpu.matmul %4, %5, %cst {dimension_numbers = #tpu.dot_dimension_numbers<[1], [0], [0], [1], [0, 0, 1, 1], [], []>} : vector<16x32xbf16>, vector<32x64xbf16>, vector<16x64xf32> -> vector<16x64xf32>
    %7 = arith.addf %3, %6 : vector<16x64xf32>
    %c0_6 = arith.constant 0 : index
    %c0_7 = arith.constant 0 : index
    %8 = vector.load %arg7[%c0_6, %c0_7] : memref<16x64xf32, #tpu.memory_space<vmem>>, vector<16x64xf32>
    tpu.vector_store %arg7[%c0_6, %c0_7], %7 {strides = array<i32>} : memref<16x64xf32, #tpu.memory_space<vmem>>, vector<16x64xf32>,
    %c0_i32_8 = arith.constant 0 : i32
    %9 = arith.cmpi eq, %arg2, %c0_i32_8 : i32
    %10 = arith.extui %9 : i1 to i32
    %c0_i32_9 = arith.constant 0 : i32
    %11 = arith.cmpi ne, %10, %c0_i32_9 : i32
    scf.if %11 {
      %c0_10 = arith.constant 0 : index
      %c0_11 = arith.constant 0 : index
      %12 = vector.load %arg7[%c0_10, %c0_11] : memref<16x64xf32, #tpu.memory_space<vmem>>, vector<16x64xf32>
      %c0_12 = arith.constant 0 : index
      %c0_13 = arith.constant 0 : index
      %13 = vector.load %arg5[%c0_12, %c0_13] : memref<1x64xf32, #tpu.memory_space<vmem>>, vector<1x64xf32>
      %14 = vector.broadcast %13 : vector<1x64xf32> to vector<16x64xf32>
      %15 = arith.addf %12, %14 : vector<16x64xf32>
      %16 = arith.truncf %15 : vector<16x64xf32> to vector<16x64xbf16>
      %c0_14 = arith.constant 0 : index
      %c0_15 = arith.constant 0 : index
      %17 = vector.load %arg6[%c0_14, %c0_15] : memref<16x64xbf16, #tpu.memory_space<vmem>>, vector<16x64xbf16>
      tpu.vector_store %arg6[%c0_14, %c0_15], %16 {strides = array<i32>} : memref<16x64xbf16, #tpu.memory_space<vmem>>, vector<16x64xbf16>,
    } else {
    }
    return
  }
  func.func @transform_0(%arg0: i32, %arg1: i32, %arg2: i32) -> (i32, i32) {
    %c0_i32 = arith.constant 0 : i32
    return %arg0, %arg2 : i32, i32
  }
  func.func @transform_1(%arg0: i32, %arg1: i32, %arg2: i32) -> (i32, i32) {
    %c0_i32 = arith.constant 0 : i32
    return %arg2, %arg1 : i32, i32
  }
  func.func @transform_2(%arg0: i32, %arg1: i32, %arg2: i32) -> (i32, i32) {
    %c0_i32 = arith.constant 0 : i32
    %c0_i32_0 = arith.constant 0 : i32
    return %c0_i32, %arg1 : i32, i32
  }
  func.func @transform_3(%arg0: i32, %arg1: i32, %arg2: i32) -> (i32, i32) {
    %c0_i32 = arith.constant 0 : i32
    return %arg0, %arg1 : i32, i32
  }
}

module attributes {stable_mosaic.version = 11 : i64} {
  func.func @_linear_ln_kernel(%arg0: i32, %arg1: i32, %arg2: memref<16x64xbf16, #tpu.memory_space<vmem>>, %arg3: memref<64x32xbf16, #tpu.memory_space<vmem>>, %arg4: memref<1x32xf32, #tpu.memory_space<vmem>>, %arg5: memref<16x32xbf16, #tpu.memory_space<vmem>>, %arg6: memref<1x32xf32, #tpu.memory_space<vmem>>, %arg7: memref<1x32xf32, #tpu.memory_space<vmem>>, %arg8: memref<16x32xbf16, #tpu.memory_space<vmem>>, %arg9: memref<16x32xf32, #tpu.memory_space<vmem>>) attributes {dimension_semantics = [#tpu.dimension_semantics<parallel>, #tpu.dimension_semantics<arbitrary>], iteration_bounds = array<i64: 1, 1>, scalar_prefetch = 0 : i64, scratch_operands = 1 : i64, tpu.core_type = #tpu.core_type<tc>, window_params = [{transform_indices = @transform_0, window_bounds = array<i64: 16, 64>}, {transform_indices = @transform_1, window_bounds = array<i64: 64, 32>}, {pipeline_mode = #tpu.pipeline_mode<synchronous>, transform_indices = @transform_2, window_bounds = array<i64: 1, 32>}, {transform_indices = @transform_3, window_bounds = array<i64: 16, 32>}, {pipeline_mode = #tpu.pipeline_mode<synchronous>, transform_indices = @transform_4, window_bounds = array<i64: 1, 32>}, {pipeline_mode = #tpu.pipeline_mode<synchronous>, transform_indices = @transform_5, window_bounds = array<i64: 1, 32>}, {transform_indices = @transform_6, window_bounds = array<i64: 16, 32>}]} {
    %c0_i32 = arith.constant 0 : i32
    %0 = arith.cmpi eq, %arg1, %c0_i32 : i32
    %1 = arith.extui %0 : i1 to i32
    %c0_i32_0 = arith.constant 0 : i32
    %2 = arith.cmpi ne, %1, %c0_i32_0 : i32
    scf.if %2 {
      %cst_10 = arith.constant 0.000000e+00 : f32
      %12 = vector.broadcast %cst_10 : f32 to vector<16x32xf32>
      %c0_11 = arith.constant 0 : index
      %c0_12 = arith.constant 0 : index
      %13 = vector.load %arg9[%c0_11, %c0_12] : memref<16x32xf32, #tpu.memory_space<vmem>>, vector<16x32xf32>
      tpu.vector_store %arg9[%c0_11, %c0_12], %12 {strides = array<i32>} : memref<16x32xf32, #tpu.memory_space<vmem>>, vector<16x32xf32>,
    } else {
    }
    %c0 = arith.constant 0 : index
    %c0_1 = arith.constant 0 : index
    %3 = vector.load %arg9[%c0, %c0_1] : memref<16x32xf32, #tpu.memory_space<vmem>>, vector<16x32xf32>
    %c0_2 = arith.constant 0 : index
    %c0_3 = arith.constant 0 : index
    %4 = vector.load %arg2[%c0_2, %c0_3] : memref<16x64xbf16, #tpu.memory_space<vmem>>, vector<16x64xbf16>
    %c0_4 = arith.constant 0 : index
    %c0_5 = arith.constant 0 : index
    %5 = vector.load %arg3[%c0_4, %c0_5] : memref<64x32xbf16, #tpu.memory_space<vmem>>, vector<64x32xbf16>
    %cst = arith.constant dense<0.000000e+00> : vector<16x32xf32>
    %6 = tpu.matmul %4, %5, %cst {dimension_numbers = #tpu.dot_dimension_numbers<[1], [0], [0], [1], [0, 0, 1, 1], [], []>} : vector<16x64xbf16>, vector<64x32xbf16>, vector<16x32xf32> -> vector<16x32xf32>
    %7 = arith.addf %3, %6 : vector<16x32xf32>
    %c0_6 = arith.constant 0 : index
    %c0_7 = arith.constant 0 : index
    %8 = vector.load %arg9[%c0_6, %c0_7] : memref<16x32xf32, #tpu.memory_space<vmem>>, vector<16x32xf32>
    tpu.vector_store %arg9[%c0_6, %c0_7], %7 {strides = array<i32>} : memref<16x32xf32, #tpu.memory_space<vmem>>, vector<16x32xf32>,
    %c0_i32_8 = arith.constant 0 : i32
    %9 = arith.cmpi eq, %arg1, %c0_i32_8 : i32
    %10 = arith.extui %9 : i1 to i32
    %c0_i32_9 = arith.constant 0 : i32
    %11 = arith.cmpi ne, %10, %c0_i32_9 : i32
    scf.if %11 {
      %c0_10 = arith.constant 0 : index
      %c0_11 = arith.constant 0 : index
      %12 = vector.load %arg9[%c0_10, %c0_11] : memref<16x32xf32, #tpu.memory_space<vmem>>, vector<16x32xf32>
      %c0_12 = arith.constant 0 : index
      %c0_13 = arith.constant 0 : index
      %13 = vector.load %arg4[%c0_12, %c0_13] : memref<1x32xf32, #tpu.memory_space<vmem>>, vector<1x32xf32>
      %14 = vector.broadcast %13 : vector<1x32xf32> to vector<16x32xf32>
      %15 = arith.addf %12, %14 : vector<16x32xf32>
      %c0_14 = arith.constant 0 : index
      %c0_15 = arith.constant 0 : index
      %16 = vector.load %arg5[%c0_14, %c0_15] : memref<16x32xbf16, #tpu.memory_space<vmem>>, vector<16x32xbf16>
      %17 = arith.extf %16 : vector<16x32xbf16> to vector<16x32xf32>
      %18 = arith.addf %15, %17 : vector<16x32xf32>
      %cst_16 = arith.constant dense<0.000000e+00> : vector<16xf32>
      %19 = vector.multi_reduction <add>, %18, %cst_16 [1] : vector<16x32xf32> to vector<16xf32>
      %20 = vector.shape_cast %19 : vector<16xf32> to vector<16x1xf32>
      %cst_17 = arith.constant 3.200000e+01 : f32
      %21 = vector.broadcast %cst_17 : f32 to vector<16x1xf32>
      %22 = arith.divf %20, %21 : vector<16x1xf32>
      %23 = vector.broadcast %22 : vector<16x1xf32> to vector<16x32xf32>
      %24 = arith.subf %18, %23 : vector<16x32xf32>
      %25 = arith.mulf %24, %24 : vector<16x32xf32>
      %cst_18 = arith.constant dense<0.000000e+00> : vector<16xf32>
      %26 = vector.multi_reduction <add>, %25, %cst_18 [1] : vector<16x32xf32> to vector<16xf32>
      %27 = vector.shape_cast %26 : vector<16xf32> to vector<16x1xf32>
      %cst_19 = arith.constant 3.200000e+01 : f32
      %28 = vector.broadcast %cst_19 : f32 to vector<16x1xf32>
      %29 = arith.divf %27, %28 : vector<16x1xf32>
      %30 = vector.broadcast %22 : vector<16x1xf32> to vector<16x32xf32>
      %31 = arith.subf %18, %30 : vector<16x32xf32>
      %cst_20 = arith.constant 9.99999996E-13 : f32
      %32 = vector.broadcast %cst_20 : f32 to vector<16x1xf32>
      %33 = arith.addf %29, %32 : vector<16x1xf32>
      %34 = math.rsqrt %33 : vector<16x1xf32>
      %35 = vector.broadcast %34 : vector<16x1xf32> to vector<16x32xf32>
      %36 = arith.mulf %31, %35 : vector<16x32xf32>
      %c0_21 = arith.constant 0 : index
      %c0_22 = arith.constant 0 : index
      %37 = vector.load %arg6[%c0_21, %c0_22] : memref<1x32xf32, #tpu.memory_space<vmem>>, vector<1x32xf32>
      %38 = vector.broadcast %37 : vector<1x32xf32> to vector<16x32xf32>
      %39 = arith.mulf %36, %38 : vector<16x32xf32>
      %c0_23 = arith.constant 0 : index
      %c0_24 = arith.constant 0 : index
      %40 = vector.load %arg7[%c0_23, %c0_24] : memref<1x32xf32, #tpu.memory_space<vmem>>, vector<1x32xf32>
      %41 = vector.broadcast %40 : vector<1x32xf32> to vector<16x32xf32>
      %42 = arith.addf %39, %41 : vector<16x32xf32>
      %43 = arith.truncf %42 : vector<16x32xf32> to vector<16x32xbf16>
      %c0_25 = arith.constant 0 : index
      %c0_26 = arith.constant 0 : index
      %44 = vector.load %arg8[%c0_25, %c0_26] : memref<16x32xbf16, #tpu.memory_space<vmem>>, vector<16x32xbf16>
      tpu.vector_store %arg8[%c0_25, %c0_26], %43 {strides = array<i32>} : memref<16x32xbf16, #tpu.memory_space<vmem>>, vector<16x32xbf16>,
    } else {
    }
    return
  }
  func.func @transform_0(%arg0: i32, %arg1: i32) -> (i32, i32) {
    %c0_i32 = arith.constant 0 : i32
    return %arg0, %arg1 : i32, i32
  }
  func.func @transform_1(%arg0: i32, %arg1: i32) -> (i32, i32) {
    %c0_i32 = arith.constant 0 : i32
    %c0_i32_0 = arith.constant 0 : i32
    return %arg1, %c0_i32 : i32, i32
  }
  func.func @transform_2(%arg0: i32, %arg1: i32) -> (i32, i32) {
    %c0_i32 = arith.constant 0 : i32
    %c0_i32_0 = arith.constant 0 : i32
    %c0_i32_1 = arith.constant 0 : i32
    return %c0_i32, %c0_i32_0 : i32, i32
  }
  func.func @transform_3(%arg0: i32, %arg1: i32) -> (i32, i32) {
    %c0_i32 = arith.constant 0 : i32
    %c0_i32_0 = arith.constant 0 : i32
    return %arg0, %c0_i32 : i32, i32
  }
  func.func @transform_4(%arg0: i32, %arg1: i32) -> (i32, i32) {
    %c0_i32 = arith.constant 0 : i32
    %c0_i32_0 = arith.constant 0 : i32
    %c0_i32_1 = arith.constant 0 : i32
    return %c0_i32, %c0_i32_0 : i32, i32
  }
  func.func @transform_5(%arg0: i32, %arg1: i32) -> (i32, i32) {
    %c0_i32 = arith.constant 0 : i32
    %c0_i32_0 = arith.constant 0 : i32
    %c0_i32_1 = arith.constant 0 : i32
    return %c0_i32, %c0_i32_0 : i32, i32
  }
  func.func @transform_6(%arg0: i32, %arg1: i32) -> (i32, i32) {
    %c0_i32 = arith.constant 0 : i32
    %c0_i32_0 = arith.constant 0 : i32
    return %arg0, %c0_i32 : i32, i32
  }
}

module attributes {stable_mosaic.version = 11 : i64} {
  func.func @_flash_kernel(%arg0: i32, %arg1: i32, %arg2: i32, %arg3: memref<1x8x32xbf16, #tpu.memory_space<vmem>>, %arg4: memref<1x8x32xbf16, #tpu.memory_space<vmem>>, %arg5: memref<1x8x32xbf16, #tpu.memory_space<vmem>>, %arg6: memref<1x8x1xf32, #tpu.memory_space<vmem>>, %arg7: memref<1x1x8xf32, #tpu.memory_space<vmem>>, %arg8: memref<1x8x32xbf16, #tpu.memory_space<vmem>>, %arg9: memref<4x8x1xf32, #tpu.memory_space<vmem>>, %arg10: memref<4x8x1xf32, #tpu.memory_space<vmem>>, %arg11: memref<8x32xf32, #tpu.memory_space<vmem>>) attributes {dimension_semantics = [#tpu.dimension_semantics<parallel>, #tpu.dimension_semantics<parallel>, #tpu.dimension_semantics<arbitrary>], iteration_bounds = array<i64: 2, 1, 1>, scalar_prefetch = 0 : i64, scratch_operands = 3 : i64, tpu.core_type = #tpu.core_type<tc>, window_params = [{transform_indices = @transform_0, window_bounds = array<i64: 1, 8, 32>}, {transform_indices = @transform_1, window_bounds = array<i64: 1, 8, 32>}, {transform_indices = @transform_2, window_bounds = array<i64: 1, 8, 32>}, {transform_indices = @transform_3, window_bounds = array<i64: 1, 8, 1>}, {transform_indices = @transform_4, window_bounds = array<i64: 1, 1, 8>}, {transform_indices = @transform_5, window_bounds = array<i64: 1, 8, 32>}]} {
    %c0_i32 = arith.constant 0 : i32
    %0 = arith.cmpi eq, %arg2, %c0_i32 : i32
    %1 = arith.extui %0 : i1 to i32
    %c0_i32_0 = arith.constant 0 : i32
    %2 = arith.cmpi ne, %1, %c0_i32_0 : i32
    scf.if %2 {
      %cst_97 = arith.constant -1.000000e+30 : f32
      %173 = vector.broadcast %cst_97 : f32 to vector<4x8x1xf32>
      %c0_98 = arith.constant 0 : index
      %c0_99 = arith.constant 0 : index
      %c0_100 = arith.constant 0 : index
      %174 = vector.load %arg9[%c0_98, %c0_99, %c0_100] : memref<4x8x1xf32, #tpu.memory_space<vmem>>, vector<4x8x1xf32>
      tpu.vector_store %arg9[%c0_98, %c0_99, %c0_100], %173 {strides = array<i32>} : memref<4x8x1xf32, #tpu.memory_space<vmem>>, vector<4x8x1xf32>,
      %cst_101 = arith.constant 0.000000e+00 : f32
      %175 = vector.broadcast %cst_101 : f32 to vector<4x8x1xf32>
      %c0_102 = arith.constant 0 : index
      %c0_103 = arith.constant 0 : index
      %c0_104 = arith.constant 0 : index
      %176 = vector.load %arg10[%c0_102, %c0_103, %c0_104] : memref<4x8x1xf32, #tpu.memory_space<vmem>>, vector<4x8x1xf32>
      tpu.vector_store %arg10[%c0_102, %c0_103, %c0_104], %175 {strides = array<i32>} : memref<4x8x1xf32, #tpu.memory_space<vmem>>, vector<4x8x1xf32>,
      %cst_105 = arith.constant 0.000000e+00 : f32
      %177 = vector.broadcast %cst_105 : f32 to vector<8x32xf32>
      %c0_106 = arith.constant 0 : index
      %c0_107 = arith.constant 0 : index
      %178 = vector.load %arg11[%c0_106, %c0_107] : memref<8x32xf32, #tpu.memory_space<vmem>>, vector<8x32xf32>
      tpu.vector_store %arg11[%c0_106, %c0_107], %177 {strides = array<i32>} : memref<8x32xf32, #tpu.memory_space<vmem>>, vector<8x32xf32>,
    } else {
    }
    %c0 = arith.constant 0 : index
    %c0_1 = arith.constant 0 : index
    %c0_2 = arith.constant 0 : index
    %3 = vector.load %arg7[%c0, %c0_1, %c0_2] : memref<1x1x8xf32, #tpu.memory_space<vmem>>, vector<1x1x8xf32>
    %4 = vector.shape_cast %3 : vector<1x1x8xf32> to vector<1x8xf32>
    %cst = arith.constant 0.000000e+00 : f32
    %5 = vector.broadcast %cst : f32 to vector<1x8xf32>
    %6 = arith.cmpf ogt, %4, %5 : vector<1x8xf32>
    %c0_3 = arith.constant 0 : index
    %c0_4 = arith.constant 0 : index
    %c0_5 = arith.constant 0 : index
    %7 = vector.load %arg6[%c0_3, %c0_4, %c0_5] : memref<1x8x1xf32, #tpu.memory_space<vmem>>, vector<1x8x1xf32>
    %8 = vector.shape_cast %7 : vector<1x8x1xf32> to vector<8x1xf32>
    %cst_6 = arith.constant 0.000000e+00 : f32
    %9 = vector.broadcast %cst_6 : f32 to vector<8x1xf32>
    %10 = arith.cmpf ogt, %8, %9 : vector<8x1xf32>
    %11 = vector.broadcast %6 : vector<1x8xi1> to vector<8x8xi1>
    %12 = vector.broadcast %10 : vector<8x1xi1> to vector<8x8xi1>
    %13 = arith.andi %11, %12 : vector<8x8xi1>
    %c8_i32 = arith.constant 8 : i32
    %14 = arith.muli %arg1, %c8_i32 : i32
    %15 = tpu.iota {dimensions = array<i32: 0>} : vector<8x8xi32>
    %16 = vector.broadcast %14 : i32 to vector<8x8xi32>
    %17 = arith.addi %16, %15 : vector<8x8xi32>
    %c8_i32_7 = arith.constant 8 : i32
    %18 = arith.muli %arg2, %c8_i32_7 : i32
    %19 = tpu.iota {dimensions = array<i32: 1>} : vector<8x8xi32>
    %20 = vector.broadcast %18 : i32 to vector<8x8xi32>
    %21 = arith.addi %20, %19 : vector<8x8xi32>
    %22 = arith.cmpi sle, %21, %17 : vector<8x8xi32>
    %23 = arith.andi %13, %22 : vector<8x8xi1>
    %c0_8 = arith.constant 0 : index
    %c0_9 = arith.constant 0 : index
    %c0_10 = arith.constant 0 : index
    %24 = vector.load %arg3[%c0_8, %c0_9, %c0_10] : memref<1x8x32xbf16, #tpu.memory_space<vmem>>, vector<1x8x32xbf16>
    %25 = vector.shape_cast %24 : vector<1x8x32xbf16> to vector<8x32xbf16>
    %c0_11 = arith.constant 0 : index
    %c0_12 = arith.constant 0 : index
    %c0_13 = arith.constant 0 : index
    %26 = vector.load %arg4[%c0_11, %c0_12, %c0_13] : memref<1x8x32xbf16, #tpu.memory_space<vmem>>, vector<1x8x32xbf16>
    %27 = vector.shape_cast %26 : vector<1x8x32xbf16> to vector<8x32xbf16>
    %c0_14 = arith.constant 0 : index
    %c0_15 = arith.constant 0 : index
    %c0_16 = arith.constant 0 : index
    %28 = vector.load %arg5[%c0_14, %c0_15, %c0_16] : memref<1x8x32xbf16, #tpu.memory_space<vmem>>, vector<1x8x32xbf16>
    %29 = vector.shape_cast %28 : vector<1x8x32xbf16> to vector<8x32xbf16>
    %30 = vector.extract_strided_slice %25 {offsets = [0, 0], sizes = [8, 8], strides = [1, 1]} : vector<8x32xbf16> to vector<8x8xbf16>
    %31 = vector.extract_strided_slice %27 {offsets = [0, 0], sizes = [8, 8], strides = [1, 1]} : vector<8x32xbf16> to vector<8x8xbf16>
    %cst_17 = arith.constant dense<0.000000e+00> : vector<8x8xf32>
    %32 = tpu.matmul %30, %31, %cst_17 {dimension_numbers = #tpu.dot_dimension_numbers<[1], [1], [0], [0], [0, 0, 1, 0], [], []>} : vector<8x8xbf16>, vector<8x8xbf16>, vector<8x8xf32> -> vector<8x8xf32>
    %cst_18 = arith.constant -1.000000e+09 : f32
    %33 = vector.broadcast %cst_18 : f32 to vector<8x8xf32>
    %34 = arith.select %23, %32, %33 : vector<8x8xi1>, vector<8x8xf32>
    %c0_19 = arith.constant 0 : index
    %c0_20 = arith.constant 0 : index
    %c0_21 = arith.constant 0 : index
    %35 = vector.load %arg9[%c0_19, %c0_20, %c0_21] : memref<4x8x1xf32, #tpu.memory_space<vmem>>, vector<1x8x1xf32>
    %36 = vector.shape_cast %35 : vector<1x8x1xf32> to vector<8x1xf32>
    %cst_22 = arith.constant dense<0xFF800000> : vector<8xf32>
    %37 = vector.multi_reduction <maximumf>, %34, %cst_22 [1] : vector<8x8xf32> to vector<8xf32>
    %38 = vector.shape_cast %37 : vector<8xf32> to vector<8x1xf32>
    %39 = arith.maximumf %36, %38 : vector<8x1xf32>
    %40 = arith.subf %36, %39 : vector<8x1xf32>
    %41 = math.exp %40 : vector<8x1xf32>
    %42 = vector.broadcast %39 : vector<8x1xf32> to vector<8x8xf32>
    %43 = arith.subf %34, %42 : vector<8x8xf32>
    %44 = math.exp %43 : vector<8x8xf32>
    %c0_23 = arith.constant 0 : index
    %c0_24 = arith.constant 0 : index
    %c0_25 = arith.constant 0 : index
    %45 = vector.load %arg10[%c0_23, %c0_24, %c0_25] : memref<4x8x1xf32, #tpu.memory_space<vmem>>, vector<1x8x1xf32>
    %46 = vector.shape_cast %45 : vector<1x8x1xf32> to vector<8x1xf32>
    %47 = arith.mulf %41, %46 : vector<8x1xf32>
    %cst_26 = arith.constant dense<0.000000e+00> : vector<8xf32>
    %48 = vector.multi_reduction <add>, %44, %cst_26 [1] : vector<8x8xf32> to vector<8xf32>
    %49 = vector.shape_cast %48 : vector<8xf32> to vector<8x1xf32>
    %50 = arith.addf %47, %49 : vector<8x1xf32>
    %c0_27 = arith.constant 0 : index
    %c0_28 = arith.constant 0 : index
    %c0_29 = arith.constant 0 : index
    %51 = vector.load %arg10[%c0_27, %c0_28, %c0_29] : memref<4x8x1xf32, #tpu.memory_space<vmem>>, vector<1x8x1xf32>
    %52 = vector.shape_cast %51 : vector<1x8x1xf32> to vector<8x1xf32>
    %53 = vector.shape_cast %50 : vector<8x1xf32> to vector<1x8x1xf32>
    tpu.vector_store %arg10[%c0_27, %c0_28, %c0_29], %53 {strides = array<i32>} : memref<4x8x1xf32, #tpu.memory_space<vmem>>, vector<1x8x1xf32>,
    %c0_30 = arith.constant 0 : index
    %c0_31 = arith.constant 0 : index
    %c0_32 = arith.constant 0 : index
    %54 = vector.load %arg9[%c0_30, %c0_31, %c0_32] : memref<4x8x1xf32, #tpu.memory_space<vmem>>, vector<1x8x1xf32>
    %55 = vector.shape_cast %54 : vector<1x8x1xf32> to vector<8x1xf32>
    %56 = vector.shape_cast %39 : vector<8x1xf32> to vector<1x8x1xf32>
    tpu.vector_store %arg9[%c0_30, %c0_31, %c0_32], %56 {strides = array<i32>} : memref<4x8x1xf32, #tpu.memory_space<vmem>>, vector<1x8x1xf32>,
    %57 = arith.truncf %44 : vector<8x8xf32> to vector<8x8xbf16>
    %58 = vector.extract_strided_slice %29 {offsets = [0, 0], sizes = [8, 8], strides = [1, 1]} : vector<8x32xbf16> to vector<8x8xbf16>
    %cst_33 = arith.constant dense<0.000000e+00> : vector<8x8xf32>
    %59 = tpu.matmul %57, %58, %cst_33 {dimension_numbers = #tpu.dot_dimension_numbers<[1], [0], [0], [1], [0, 0, 1, 1], [], []>} : vector<8x8xbf16>, vector<8x8xbf16>, vector<8x8xf32> -> vector<8x8xf32>
    %c0_34 = arith.constant 0 : index
    %c0_35 = arith.constant 0 : index
    %60 = vector.load %arg11[%c0_34, %c0_35] : memref<8x32xf32, #tpu.memory_space<vmem>>, vector<8x8xf32>
    %61 = vector.broadcast %41 : vector<8x1xf32> to vector<8x8xf32>
    %62 = arith.mulf %61, %60 : vector<8x8xf32>
    %63 = arith.addf %62, %59 : vector<8x8xf32>
    %c0_36 = arith.constant 0 : index
    %c0_37 = arith.constant 0 : index
    %64 = vector.load %arg11[%c0_36, %c0_37] : memref<8x32xf32, #tpu.memory_space<vmem>>, vector<8x8xf32>
    tpu.vector_store %arg11[%c0_36, %c0_37], %63 {strides = array<i32>} : memref<8x32xf32, #tpu.memory_space<vmem>>, vector<8x8xf32>,
    %65 = vector.extract_strided_slice %25 {offsets = [0, 8], sizes = [8, 8], strides = [1, 1]} : vector<8x32xbf16> to vector<8x8xbf16>
    %66 = vector.extract_strided_slice %27 {offsets = [0, 8], sizes = [8, 8], strides = [1, 1]} : vector<8x32xbf16> to vector<8x8xbf16>
    %cst_38 = arith.constant dense<0.000000e+00> : vector<8x8xf32>
    %67 = tpu.matmul %65, %66, %cst_38 {dimension_numbers = #tpu.dot_dimension_numbers<[1], [1], [0], [0], [0, 0, 1, 0], [], []>} : vector<8x8xbf16>, vector<8x8xbf16>, vector<8x8xf32> -> vector<8x8xf32>
    %cst_39 = arith.constant -1.000000e+09 : f32
    %68 = vector.broadcast %cst_39 : f32 to vector<8x8xf32>
    %69 = arith.select %23, %67, %68 : vector<8x8xi1>, vector<8x8xf32>
    %c1 = arith.constant 1 : index
    %c0_40 = arith.constant 0 : index
    %c0_41 = arith.constant 0 : index
    %70 = vector.load %arg9[%c1, %c0_40, %c0_41] : memref<4x8x1xf32, #tpu.memory_space<vmem>>, vector<1x8x1xf32>
    %71 = vector.shape_cast %70 : vector<1x8x1xf32> to vector<8x1xf32>
    %cst_42 = arith.constant dense<0xFF800000> : vector<8xf32>
    %72 = vector.multi_reduction <maximumf>, %69, %cst_42 [1] : vector<8x8xf32> to vector<8xf32>
    %73 = vector.shape_cast %72 : vector<8xf32> to vector<8x1xf32>
    %74 = arith.maximumf %71, %73 : vector<8x1xf32>
    %75 = arith.subf %71, %74 : vector<8x1xf32>
    %76 = math.exp %75 : vector<8x1xf32>
    %77 = vector.broadcast %74 : vector<8x1xf32> to vector<8x8xf32>
    %78 = arith.subf %69, %77 : vector<8x8xf32>
    %79 = math.exp %78 : vector<8x8xf32>
    %c1_43 = arith.constant 1 : index
    %c0_44 = arith.constant 0 : index
    %c0_45 = arith.constant 0 : index
    %80 = vector.load %arg10[%c1_43, %c0_44, %c0_45] : memref<4x8x1xf32, #tpu.memory_space<vmem>>, vector<1x8x1xf32>
    %81 = vector.shape_cast %80 : vector<1x8x1xf32> to vector<8x1xf32>
    %82 = arith.mulf %76, %81 : vector<8x1xf32>
    %cst_46 = arith.constant dense<0.000000e+00> : vector<8xf32>
    %83 = vector.multi_reduction <add>, %79, %cst_46 [1] : vector<8x8xf32> to vector<8xf32>
    %84 = vector.shape_cast %83 : vector<8xf32> to vector<8x1xf32>
    %85 = arith.addf %82, %84 : vector<8x1xf32>
    %c1_47 = arith.constant 1 : index
    %c0_48 = arith.constant 0 : index
    %c0_49 = arith.constant 0 : index
    %86 = vector.load %arg10[%c1_47, %c0_48, %c0_49] : memref<4x8x1xf32, #tpu.memory_space<vmem>>, vector<1x8x1xf32>
    %87 = vector.shape_cast %86 : vector<1x8x1xf32> to vector<8x1xf32>
    %88 = vector.shape_cast %85 : vector<8x1xf32> to vector<1x8x1xf32>
    tpu.vector_store %arg10[%c1_47, %c0_48, %c0_49], %88 {strides = array<i32>} : memref<4x8x1xf32, #tpu.memory_space<vmem>>, vector<1x8x1xf32>,
    %c1_50 = arith.constant 1 : index
    %c0_51 = arith.constant 0 : index
    %c0_52 = arith.constant 0 : index
    %89 = vector.load %arg9[%c1_50, %c0_51, %c0_52] : memref<4x8x1xf32, #tpu.memory_space<vmem>>, vector<1x8x1xf32>
    %90 = vector.shape_cast %89 : vector<1x8x1xf32> to vector<8x1xf32>
    %91 = vector.shape_cast %74 : vector<8x1xf32> to vector<1x8x1xf32>
    tpu.vector_store %arg9[%c1_50, %c0_51, %c0_52], %91 {strides = array<i32>} : memref<4x8x1xf32, #tpu.memory_space<vmem>>, vector<1x8x1xf32>,
    %92 = arith.truncf %79 : vector<8x8xf32> to vector<8x8xbf16>
    %93 = vector.extract_strided_slice %29 {offsets = [0, 8], sizes = [8, 8], strides = [1, 1]} : vector<8x32xbf16> to vector<8x8xbf16>
    %cst_53 = arith.constant dense<0.000000e+00> : vector<8x8xf32>
    %94 = tpu.matmul %92, %93, %cst_53 {dimension_numbers = #tpu.dot_dimension_numbers<[1], [0], [0], [1], [0, 0, 1, 1], [], []>} : vector<8x8xbf16>, vector<8x8xbf16>, vector<8x8xf32> -> vector<8x8xf32>
    %c0_54 = arith.constant 0 : index
    %c8 = arith.constant 8 : index
    %95 = vector.load %arg11[%c0_54, %c8] : memref<8x32xf32, #tpu.memory_space<vmem>>, vector<8x8xf32>
    %96 = vector.broadcast %76 : vector<8x1xf32> to vector<8x8xf32>
    %97 = arith.mulf %96, %95 : vector<8x8xf32>
    %98 = arith.addf %97, %94 : vector<8x8xf32>
    %c0_55 = arith.constant 0 : index
    %c8_56 = arith.constant 8 : index
    %99 = vector.load %arg11[%c0_55, %c8_56] : memref<8x32xf32, #tpu.memory_space<vmem>>, vector<8x8xf32>
    tpu.vector_store %arg11[%c0_55, %c8_56], %98 {strides = array<i32>} : memref<8x32xf32, #tpu.memory_space<vmem>>, vector<8x8xf32>,
    %100 = vector.extract_strided_slice %25 {offsets = [0, 16], sizes = [8, 8], strides = [1, 1]} : vector<8x32xbf16> to vector<8x8xbf16>
    %101 = vector.extract_strided_slice %27 {offsets = [0, 16], sizes = [8, 8], strides = [1, 1]} : vector<8x32xbf16> to vector<8x8xbf16>
    %cst_57 = arith.constant dense<0.000000e+00> : vector<8x8xf32>
    %102 = tpu.matmul %100, %101, %cst_57 {dimension_numbers = #tpu.dot_dimension_numbers<[1], [1], [0], [0], [0, 0, 1, 0], [], []>} : vector<8x8xbf16>, vector<8x8xbf16>, vector<8x8xf32> -> vector<8x8xf32>
    %cst_58 = arith.constant -1.000000e+09 : f32
    %103 = vector.broadcast %cst_58 : f32 to vector<8x8xf32>
    %104 = arith.select %23, %102, %103 : vector<8x8xi1>, vector<8x8xf32>
    %c2 = arith.constant 2 : index
    %c0_59 = arith.constant 0 : index
    %c0_60 = arith.constant 0 : index
    %105 = vector.load %arg9[%c2, %c0_59, %c0_60] : memref<4x8x1xf32, #tpu.memory_space<vmem>>, vector<1x8x1xf32>
    %106 = vector.shape_cast %105 : vector<1x8x1xf32> to vector<8x1xf32>
    %cst_61 = arith.constant dense<0xFF800000> : vector<8xf32>
    %107 = vector.multi_reduction <maximumf>, %104, %cst_61 [1] : vector<8x8xf32> to vector<8xf32>
    %108 = vector.shape_cast %107 : vector<8xf32> to vector<8x1xf32>
    %109 = arith.maximumf %106, %108 : vector<8x1xf32>
    %110 = arith.subf %106, %109 : vector<8x1xf32>
    %111 = math.exp %110 : vector<8x1xf32>
    %112 = vector.broadcast %109 : vector<8x1xf32> to vector<8x8xf32>
    %113 = arith.subf %104, %112 : vector<8x8xf32>
    %114 = math.exp %113 : vector<8x8xf32>
    %c2_62 = arith.constant 2 : index
    %c0_63 = arith.constant 0 : index
    %c0_64 = arith.constant 0 : index
    %115 = vector.load %arg10[%c2_62, %c0_63, %c0_64] : memref<4x8x1xf32, #tpu.memory_space<vmem>>, vector<1x8x1xf32>
    %116 = vector.shape_cast %115 : vector<1x8x1xf32> to vector<8x1xf32>
    %117 = arith.mulf %111, %116 : vector<8x1xf32>
    %cst_65 = arith.constant dense<0.000000e+00> : vector<8xf32>
    %118 = vector.multi_reduction <add>, %114, %cst_65 [1] : vector<8x8xf32> to vector<8xf32>
    %119 = vector.shape_cast %118 : vector<8xf32> to vector<8x1xf32>
    %120 = arith.addf %117, %119 : vector<8x1xf32>
    %c2_66 = arith.constant 2 : index
    %c0_67 = arith.constant 0 : index
    %c0_68 = arith.constant 0 : index
    %121 = vector.load %arg10[%c2_66, %c0_67, %c0_68] : memref<4x8x1xf32, #tpu.memory_space<vmem>>, vector<1x8x1xf32>
    %122 = vector.shape_cast %121 : vector<1x8x1xf32> to vector<8x1xf32>
    %123 = vector.shape_cast %120 : vector<8x1xf32> to vector<1x8x1xf32>
    tpu.vector_store %arg10[%c2_66, %c0_67, %c0_68], %123 {strides = array<i32>} : memref<4x8x1xf32, #tpu.memory_space<vmem>>, vector<1x8x1xf32>,
    %c2_69 = arith.constant 2 : index
    %c0_70 = arith.constant 0 : index
    %c0_71 = arith.constant 0 : index
    %124 = vector.load %arg9[%c2_69, %c0_70, %c0_71] : memref<4x8x1xf32, #tpu.memory_space<vmem>>, vector<1x8x1xf32>
    %125 = vector.shape_cast %124 : vector<1x8x1xf32> to vector<8x1xf32>
    %126 = vector.shape_cast %109 : vector<8x1xf32> to vector<1x8x1xf32>
    tpu.vector_store %arg9[%c2_69, %c0_70, %c0_71], %126 {strides = array<i32>} : memref<4x8x1xf32, #tpu.memory_space<vmem>>, vector<1x8x1xf32>,
    %127 = arith.truncf %114 : vector<8x8xf32> to vector<8x8xbf16>
    %128 = vector.extract_strided_slice %29 {offsets = [0, 16], sizes = [8, 8], strides = [1, 1]} : vector<8x32xbf16> to vector<8x8xbf16>
    %cst_72 = arith.constant dense<0.000000e+00> : vector<8x8xf32>
    %129 = tpu.matmul %127, %128, %cst_72 {dimension_numbers = #tpu.dot_dimension_numbers<[1], [0], [0], [1], [0, 0, 1, 1], [], []>} : vector<8x8xbf16>, vector<8x8xbf16>, vector<8x8xf32> -> vector<8x8xf32>
    %c0_73 = arith.constant 0 : index
    %c16 = arith.constant 16 : index
    %130 = vector.load %arg11[%c0_73, %c16] : memref<8x32xf32, #tpu.memory_space<vmem>>, vector<8x8xf32>
    %131 = vector.broadcast %111 : vector<8x1xf32> to vector<8x8xf32>
    %132 = arith.mulf %131, %130 : vector<8x8xf32>
    %133 = arith.addf %132, %129 : vector<8x8xf32>
    %c0_74 = arith.constant 0 : index
    %c16_75 = arith.constant 16 : index
    %134 = vector.load %arg11[%c0_74, %c16_75] : memref<8x32xf32, #tpu.memory_space<vmem>>, vector<8x8xf32>
    tpu.vector_store %arg11[%c0_74, %c16_75], %133 {strides = array<i32>} : memref<8x32xf32, #tpu.memory_space<vmem>>, vector<8x8xf32>,
    %135 = vector.extract_strided_slice %25 {offsets = [0, 24], sizes = [8, 8], strides = [1, 1]} : vector<8x32xbf16> to vector<8x8xbf16>
    %136 = vector.extract_strided_slice %27 {offsets = [0, 24], sizes = [8, 8], strides = [1, 1]} : vector<8x32xbf16> to vector<8x8xbf16>
    %cst_76 = arith.constant dense<0.000000e+00> : vector<8x8xf32>
    %137 = tpu.matmul %135, %136, %cst_76 {dimension_numbers = #tpu.dot_dimension_numbers<[1], [1], [0], [0], [0, 0, 1, 0], [], []>} : vector<8x8xbf16>, vector<8x8xbf16>, vector<8x8xf32> -> vector<8x8xf32>
    %cst_77 = arith.constant -1.000000e+09 : f32
    %138 = vector.broadcast %cst_77 : f32 to vector<8x8xf32>
    %139 = arith.select %23, %137, %138 : vector<8x8xi1>, vector<8x8xf32>
    %c3 = arith.constant 3 : index
    %c0_78 = arith.constant 0 : index
    %c0_79 = arith.constant 0 : index
    %140 = vector.load %arg9[%c3, %c0_78, %c0_79] : memref<4x8x1xf32, #tpu.memory_space<vmem>>, vector<1x8x1xf32>
    %141 = vector.shape_cast %140 : vector<1x8x1xf32> to vector<8x1xf32>
    %cst_80 = arith.constant dense<0xFF800000> : vector<8xf32>
    %142 = vector.multi_reduction <maximumf>, %139, %cst_80 [1] : vector<8x8xf32> to vector<8xf32>
    %143 = vector.shape_cast %142 : vector<8xf32> to vector<8x1xf32>
    %144 = arith.maximumf %141, %143 : vector<8x1xf32>
    %145 = arith.subf %141, %144 : vector<8x1xf32>
    %146 = math.exp %145 : vector<8x1xf32>
    %147 = vector.broadcast %144 : vector<8x1xf32> to vector<8x8xf32>
    %148 = arith.subf %139, %147 : vector<8x8xf32>
    %149 = math.exp %148 : vector<8x8xf32>
    %c3_81 = arith.constant 3 : index
    %c0_82 = arith.constant 0 : index
    %c0_83 = arith.constant 0 : index
    %150 = vector.load %arg10[%c3_81, %c0_82, %c0_83] : memref<4x8x1xf32, #tpu.memory_space<vmem>>, vector<1x8x1xf32>
    %151 = vector.shape_cast %150 : vector<1x8x1xf32> to vector<8x1xf32>
    %152 = arith.mulf %146, %151 : vector<8x1xf32>
    %cst_84 = arith.constant dense<0.000000e+00> : vector<8xf32>
    %153 = vector.multi_reduction <add>, %149, %cst_84 [1] : vector<8x8xf32> to vector<8xf32>
    %154 = vector.shape_cast %153 : vector<8xf32> to vector<8x1xf32>
    %155 = arith.addf %152, %154 : vector<8x1xf32>
    %c3_85 = arith.constant 3 : index
    %c0_86 = arith.constant 0 : index
    %c0_87 = arith.constant 0 : index
    %156 = vector.load %arg10[%c3_85, %c0_86, %c0_87] : memref<4x8x1xf32, #tpu.memory_space<vmem>>, vector<1x8x1xf32>
    %157 = vector.shape_cast %156 : vector<1x8x1xf32> to vector<8x1xf32>
    %158 = vector.shape_cast %155 : vector<8x1xf32> to vector<1x8x1xf32>
    tpu.vector_store %arg10[%c3_85, %c0_86, %c0_87], %158 {strides = array<i32>} : memref<4x8x1xf32, #tpu.memory_space<vmem>>, vector<1x8x1xf32>,
    %c3_88 = arith.constant 3 : index
    %c0_89 = arith.constant 0 : index
    %c0_90 = arith.constant 0 : index
    %159 = vector.load %arg9[%c3_88, %c0_89, %c0_90] : memref<4x8x1xf32, #tpu.memory_space<vmem>>, vector<1x8x1xf32>
    %160 = vector.shape_cast %159 : vector<1x8x1xf32> to vector<8x1xf32>
    %161 = vector.shape_cast %144 : vector<8x1xf32> to vector<1x8x1xf32>
    tpu.vector_store %arg9[%c3_88, %c0_89, %c0_90], %161 {strides = array<i32>} : memref<4x8x1xf32, #tpu.memory_space<vmem>>, vector<1x8x1xf32>,
    %162 = arith.truncf %149 : vector<8x8xf32> to vector<8x8xbf16>
    %163 = vector.extract_strided_slice %29 {offsets = [0, 24], sizes = [8, 8], strides = [1, 1]} : vector<8x32xbf16> to vector<8x8xbf16>
    %cst_91 = arith.constant dense<0.000000e+00> : vector<8x8xf32>
    %164 = tpu.matmul %162, %163, %cst_91 {dimension_numbers = #tpu.dot_dimension_numbers<[1], [0], [0], [1], [0, 0, 1, 1], [], []>} : vector<8x8xbf16>, vector<8x8xbf16>, vector<8x8xf32> -> vector<8x8xf32>
    %c0_92 = arith.constant 0 : index
    %c24 = arith.constant 24 : index
    %165 = vector.load %arg11[%c0_92, %c24] : memref<8x32xf32, #tpu.memory_space<vmem>>, vector<8x8xf32>
    %166 = vector.broadcast %146 : vector<8x1xf32> to vector<8x8xf32>
    %167 = arith.mulf %166, %165 : vector<8x8xf32>
    %168 = arith.addf %167, %164 : vector<8x8xf32>
    %c0_93 = arith.constant 0 : index
    %c24_94 = arith.constant 24 : index
    %169 = vector.load %arg11[%c0_93, %c24_94] : memref<8x32xf32, #tpu.memory_space<vmem>>, vector<8x8xf32>
    tpu.vector_store %arg11[%c0_93, %c24_94], %168 {strides = array<i32>} : memref<8x32xf32, #tpu.memory_space<vmem>>, vector<8x8xf32>,
    %c0_i32_95 = arith.constant 0 : i32
    %170 = arith.cmpi eq, %arg2, %c0_i32_95 : i32
    %171 = arith.extui %170 : i1 to i32
    %c0_i32_96 = arith.constant 0 : i32
    %172 = arith.cmpi ne, %171, %c0_i32_96 : i32
    scf.if %172 {
      %c0_97 = arith.constant 0 : index
      %c0_98 = arith.constant 0 : index
      %c0_99 = arith.constant 0 : index
      %173 = vector.load %arg10[%c0_97, %c0_98, %c0_99] : memref<4x8x1xf32, #tpu.memory_space<vmem>>, vector<1x8x1xf32>
      %174 = vector.shape_cast %173 : vector<1x8x1xf32> to vector<8x1xf32>
      %175 = tpu.reciprocal %174 {approx = true} : vector<8x1xf32> -> vector<8x1xf32>
      %c0_100 = arith.constant 0 : index
      %c0_101 = arith.constant 0 : index
      %176 = vector.load %arg11[%c0_100, %c0_101] : memref<8x32xf32, #tpu.memory_space<vmem>>, vector<8x8xf32>
      %177 = vector.broadcast %175 : vector<8x1xf32> to vector<8x8xf32>
      %178 = arith.mulf %176, %177 : vector<8x8xf32>
      %c0_102 = arith.constant 0 : index
      %c0_103 = arith.constant 0 : index
      %179 = vector.load %arg11[%c0_102, %c0_103] : memref<8x32xf32, #tpu.memory_space<vmem>>, vector<8x8xf32>
      tpu.vector_store %arg11[%c0_102, %c0_103], %178 {strides = array<i32>} : memref<8x32xf32, #tpu.memory_space<vmem>>, vector<8x8xf32>,
      %c1_104 = arith.constant 1 : index
      %c0_105 = arith.constant 0 : index
      %c0_106 = arith.constant 0 : index
      %180 = vector.load %arg10[%c1_104, %c0_105, %c0_106] : memref<4x8x1xf32, #tpu.memory_space<vmem>>, vector<1x8x1xf32>
      %181 = vector.shape_cast %180 : vector<1x8x1xf32> to vector<8x1xf32>
      %182 = tpu.reciprocal %181 {approx = true} : vector<8x1xf32> -> vector<8x1xf32>
      %c0_107 = arith.constant 0 : index
      %c8_108 = arith.constant 8 : index
      %183 = vector.load %arg11[%c0_107, %c8_108] : memref<8x32xf32, #tpu.memory_space<vmem>>, vector<8x8xf32>
      %184 = vector.broadcast %182 : vector<8x1xf32> to vector<8x8xf32>
      %185 = arith.mulf %183, %184 : vector<8x8xf32>
      %c0_109 = arith.constant 0 : index
      %c8_110 = arith.constant 8 : index
      %186 = vector.load %arg11[%c0_109, %c8_110] : memref<8x32xf32, #tpu.memory_space<vmem>>, vector<8x8xf32>
      tpu.vector_store %arg11[%c0_109, %c8_110], %185 {strides = array<i32>} : memref<8x32xf32, #tpu.memory_space<vmem>>, vector<8x8xf32>,
      %c2_111 = arith.constant 2 : index
      %c0_112 = arith.constant 0 : index
      %c0_113 = arith.constant 0 : index
      %187 = vector.load %arg10[%c2_111, %c0_112, %c0_113] : memref<4x8x1xf32, #tpu.memory_space<vmem>>, vector<1x8x1xf32>
      %188 = vector.shape_cast %187 : vector<1x8x1xf32> to vector<8x1xf32>
      %189 = tpu.reciprocal %188 {approx = true} : vector<8x1xf32> -> vector<8x1xf32>
      %c0_114 = arith.constant 0 : index
      %c16_115 = arith.constant 16 : index
      %190 = vector.load %arg11[%c0_114, %c16_115] : memref<8x32xf32, #tpu.memory_space<vmem>>, vector<8x8xf32>
      %191 = vector.broadcast %189 : vector<8x1xf32> to vector<8x8xf32>
      %192 = arith.mulf %190, %191 : vector<8x8xf32>
      %c0_116 = arith.constant 0 : index
      %c16_117 = arith.constant 16 : index
      %193 = vector.load %arg11[%c0_116, %c16_117] : memref<8x32xf32, #tpu.memory_space<vmem>>, vector<8x8xf32>
      tpu.vector_store %arg11[%c0_116, %c16_117], %192 {strides = array<i32>} : memref<8x32xf32, #tpu.memory_space<vmem>>, vector<8x8xf32>,
      %c3_118 = arith.constant 3 : index
      %c0_119 = arith.constant 0 : index
      %c0_120 = arith.constant 0 : index
      %194 = vector.load %arg10[%c3_118, %c0_119, %c0_120] : memref<4x8x1xf32, #tpu.memory_space<vmem>>, vector<1x8x1xf32>
      %195 = vector.shape_cast %194 : vector<1x8x1xf32> to vector<8x1xf32>
      %196 = tpu.reciprocal %195 {approx = true} : vector<8x1xf32> -> vector<8x1xf32>
      %c0_121 = arith.constant 0 : index
      %c24_122 = arith.constant 24 : index
      %197 = vector.load %arg11[%c0_121, %c24_122] : memref<8x32xf32, #tpu.memory_space<vmem>>, vector<8x8xf32>
      %198 = vector.broadcast %196 : vector<8x1xf32> to vector<8x8xf32>
      %199 = arith.mulf %197, %198 : vector<8x8xf32>
      %c0_123 = arith.constant 0 : index
      %c24_124 = arith.constant 24 : index
      %200 = vector.load %arg11[%c0_123, %c24_124] : memref<8x32xf32, #tpu.memory_space<vmem>>, vector<8x8xf32>
      tpu.vector_store %arg11[%c0_123, %c24_124], %199 {strides = array<i32>} : memref<8x32xf32, #tpu.memory_space<vmem>>, vector<8x8xf32>,
      %c0_125 = arith.constant 0 : index
      %c0_126 = arith.constant 0 : index
      %201 = vector.load %arg11[%c0_125, %c0_126] : memref<8x32xf32, #tpu.memory_space<vmem>>, vector<8x32xf32>
      %202 = arith.truncf %201 : vector<8x32xf32> to vector<8x32xbf16>
      %c0_127 = arith.constant 0 : index
      %c0_128 = arith.constant 0 : index
      %c0_129 = arith.constant 0 : index
      %203 = vector.load %arg8[%c0_127, %c0_128, %c0_129] : memref<1x8x32xbf16, #tpu.memory_space<vmem>>, vector<1x8x32xbf16>
      %204 = vector.shape_cast %203 : vector<1x8x32xbf16> to vector<8x32xbf16>
      %205 = vector.shape_cast %202 : vector<8x32xbf16> to vector<1x8x32xbf16>
      tpu.vector_store %arg8[%c0_127, %c0_128, %c0_129], %205 {strides = array<i32>} : memref<1x8x32xbf16, #tpu.memory_space<vmem>>, vector<1x8x32xbf16>,
    } else {
    }
    return
  }
  func.func @transform_0(%arg0: i32, %arg1: i32, %arg2: i32) -> (i32, i32, i32) {
    %c0_i32 = arith.constant 0 : i32
    %c0_i32_0 = arith.constant 0 : i32
    return %arg0, %arg1, %c0_i32 : i32, i32, i32
  }
  func.func @transform_1(%arg0: i32, %arg1: i32, %arg2: i32) -> (i32, i32, i32) {
    %c0_i32 = arith.constant 0 : i32
    %c0_i32_0 = arith.constant 0 : i32
    return %arg0, %arg2, %c0_i32 : i32, i32, i32
  }
  func.func @transform_2(%arg0: i32, %arg1: i32, %arg2: i32) -> (i32, i32, i32) {
    %c0_i32 = arith.constant 0 : i32
    %c0_i32_0 = arith.constant 0 : i32
    return %arg0, %arg2, %c0_i32 : i32, i32, i32
  }
  func.func @transform_3(%arg0: i32, %arg1: i32, %arg2: i32) -> (i32, i32, i32) {
    %c0_i32 = arith.constant 0 : i32
    %c0_i32_0 = arith.constant 0 : i32
    return %arg0, %arg1, %c0_i32 : i32, i32, i32
  }
  func.func @transform_4(%arg0: i32, %arg1: i32, %arg2: i32) -> (i32, i32, i32) {
    %c0_i32 = arith.constant 0 : i32
    %c0_i32_0 = arith.constant 0 : i32
    return %arg0, %c0_i32, %arg2 : i32, i32, i32
  }
  func.func @transform_5(%arg0: i32, %arg1: i32, %arg2: i32) -> (i32, i32, i32) {
    %c0_i32 = arith.constant 0 : i32
    %c0_i32_0 = arith.constant 0 : i32
    return %arg0, %arg1, %c0_i32 : i32, i32, i32
  }
}

module attributes {stable_mosaic.version = 11 : i64} {
  func.func @_linear_kernel(%arg0: i32, %arg1: i32, %arg2: i32, %arg3: memref<16x32xbf16, #tpu.memory_space<vmem>>, %arg4: memref<32x32xbf16, #tpu.memory_space<vmem>>, %arg5: memref<1x32xf32, #tpu.memory_space<vmem>>, %arg6: memref<16x32xbf16, #tpu.memory_space<vmem>>, %arg7: memref<16x32xf32, #tpu.memory_space<vmem>>) attributes {dimension_semantics = [#tpu.dimension_semantics<parallel>, #tpu.dimension_semantics<parallel>, #tpu.dimension_semantics<arbitrary>], iteration_bounds = array<i64: 1, 1, 1>, scalar_prefetch = 0 : i64, scratch_operands = 1 : i64, tpu.core_type = #tpu.core_type<tc>, window_params = [{transform_indices = @transform_0, window_bounds = array<i64: 16, 32>}, {transform_indices = @transform_1, window_bounds = array<i64: 32, 32>}, {transform_indices = @transform_2, window_bounds = array<i64: 1, 32>}, {transform_indices = @transform_3, window_bounds = array<i64: 16, 32>}]} {
    %c0_i32 = arith.constant 0 : i32
    %0 = arith.cmpi eq, %arg2, %c0_i32 : i32
    %1 = arith.extui %0 : i1 to i32
    %c0_i32_0 = arith.constant 0 : i32
    %2 = arith.cmpi ne, %1, %c0_i32_0 : i32
    scf.if %2 {
      %cst_10 = arith.constant 0.000000e+00 : f32
      %12 = vector.broadcast %cst_10 : f32 to vector<16x32xf32>
      %c0_11 = arith.constant 0 : index
      %c0_12 = arith.constant 0 : index
      %13 = vector.load %arg7[%c0_11, %c0_12] : memref<16x32xf32, #tpu.memory_space<vmem>>, vector<16x32xf32>
      tpu.vector_store %arg7[%c0_11, %c0_12], %12 {strides = array<i32>} : memref<16x32xf32, #tpu.memory_space<vmem>>, vector<16x32xf32>,
    } else {
    }
    %c0 = arith.constant 0 : index
    %c0_1 = arith.constant 0 : index
    %3 = vector.load %arg7[%c0, %c0_1] : memref<16x32xf32, #tpu.memory_space<vmem>>, vector<16x32xf32>
    %c0_2 = arith.constant 0 : index
    %c0_3 = arith.constant 0 : index
    %4 = vector.load %arg3[%c0_2, %c0_3] : memref<16x32xbf16, #tpu.memory_space<vmem>>, vector<16x32xbf16>
    %c0_4 = arith.constant 0 : index
    %c0_5 = arith.constant 0 : index
    %5 = vector.load %arg4[%c0_4, %c0_5] : memref<32x32xbf16, #tpu.memory_space<vmem>>, vector<32x32xbf16>
    %cst = arith.constant dense<0.000000e+00> : vector<16x32xf32>
    %6 = tpu.matmul %4, %5, %cst {dimension_numbers = #tpu.dot_dimension_numbers<[1], [0], [0], [1], [0, 0, 1, 1], [], []>} : vector<16x32xbf16>, vector<32x32xbf16>, vector<16x32xf32> -> vector<16x32xf32>
    %7 = arith.addf %3, %6 : vector<16x32xf32>
    %c0_6 = arith.constant 0 : index
    %c0_7 = arith.constant 0 : index
    %8 = vector.load %arg7[%c0_6, %c0_7] : memref<16x32xf32, #tpu.memory_space<vmem>>, vector<16x32xf32>
    tpu.vector_store %arg7[%c0_6, %c0_7], %7 {strides = array<i32>} : memref<16x32xf32, #tpu.memory_space<vmem>>, vector<16x32xf32>,
    %c0_i32_8 = arith.constant 0 : i32
    %9 = arith.cmpi eq, %arg2, %c0_i32_8 : i32
    %10 = arith.extui %9 : i1 to i32
    %c0_i32_9 = arith.constant 0 : i32
    %11 = arith.cmpi ne, %10, %c0_i32_9 : i32
    scf.if %11 {
      %c0_10 = arith.constant 0 : index
      %c0_11 = arith.constant 0 : index
      %12 = vector.load %arg7[%c0_10, %c0_11] : memref<16x32xf32, #tpu.memory_space<vmem>>, vector<16x32xf32>
      %c0_12 = arith.constant 0 : index
      %c0_13 = arith.constant 0 : index
      %13 = vector.load %arg5[%c0_12, %c0_13] : memref<1x32xf32, #tpu.memory_space<vmem>>, vector<1x32xf32>
      %14 = vector.broadcast %13 : vector<1x32xf32> to vector<16x32xf32>
      %15 = arith.addf %12, %14 : vector<16x32xf32>
      %16 = arith.truncf %15 : vector<16x32xf32> to vector<16x32xbf16>
      %c0_14 = arith.constant 0 : index
      %c0_15 = arith.constant 0 : index
      %17 = vector.load %arg6[%c0_14, %c0_15] : memref<16x32xbf16, #tpu.memory_space<vmem>>, vector<16x32xbf16>
      tpu.vector_store %arg6[%c0_14, %c0_15], %16 {strides = array<i32>} : memref<16x32xbf16, #tpu.memory_space<vmem>>, vector<16x32xbf16>,
    } else {
    }
    return
  }
  func.func @transform_0(%arg0: i32, %arg1: i32, %arg2: i32) -> (i32, i32) {
    %c0_i32 = arith.constant 0 : i32
    return %arg0, %arg2 : i32, i32
  }
  func.func @transform_1(%arg0: i32, %arg1: i32, %arg2: i32) -> (i32, i32) {
    %c0_i32 = arith.constant 0 : i32
    return %arg2, %arg1 : i32, i32
  }
  func.func @transform_2(%arg0: i32, %arg1: i32, %arg2: i32) -> (i32, i32) {
    %c0_i32 = arith.constant 0 : i32
    %c0_i32_0 = arith.constant 0 : i32
    return %c0_i32, %arg1 : i32, i32
  }
  func.func @transform_3(%arg0: i32, %arg1: i32, %arg2: i32) -> (i32, i32) {
    %c0_i32 = arith.constant 0 : i32
    return %arg0, %arg1 : i32, i32
  }
}

module attributes {stable_mosaic.version = 11 : i64} {
  func.func @_linear_kernel(%arg0: i32, %arg1: i32, %arg2: i32, %arg3: memref<16x32xbf16, #tpu.memory_space<vmem>>, %arg4: memref<32x32xbf16, #tpu.memory_space<vmem>>, %arg5: memref<1x32xf32, #tpu.memory_space<vmem>>, %arg6: memref<16x32xf32, #tpu.memory_space<vmem>>, %arg7: memref<16x32xf32, #tpu.memory_space<vmem>>) attributes {dimension_semantics = [#tpu.dimension_semantics<parallel>, #tpu.dimension_semantics<parallel>, #tpu.dimension_semantics<arbitrary>], iteration_bounds = array<i64: 1, 1, 1>, scalar_prefetch = 0 : i64, scratch_operands = 1 : i64, tpu.core_type = #tpu.core_type<tc>, window_params = [{transform_indices = @transform_0, window_bounds = array<i64: 16, 32>}, {transform_indices = @transform_1, window_bounds = array<i64: 32, 32>}, {transform_indices = @transform_2, window_bounds = array<i64: 1, 32>}, {transform_indices = @transform_3, window_bounds = array<i64: 16, 32>}]} {
    %c0_i32 = arith.constant 0 : i32
    %0 = arith.cmpi eq, %arg2, %c0_i32 : i32
    %1 = arith.extui %0 : i1 to i32
    %c0_i32_0 = arith.constant 0 : i32
    %2 = arith.cmpi ne, %1, %c0_i32_0 : i32
    scf.if %2 {
      %cst_10 = arith.constant 0.000000e+00 : f32
      %12 = vector.broadcast %cst_10 : f32 to vector<16x32xf32>
      %c0_11 = arith.constant 0 : index
      %c0_12 = arith.constant 0 : index
      %13 = vector.load %arg7[%c0_11, %c0_12] : memref<16x32xf32, #tpu.memory_space<vmem>>, vector<16x32xf32>
      tpu.vector_store %arg7[%c0_11, %c0_12], %12 {strides = array<i32>} : memref<16x32xf32, #tpu.memory_space<vmem>>, vector<16x32xf32>,
    } else {
    }
    %c0 = arith.constant 0 : index
    %c0_1 = arith.constant 0 : index
    %3 = vector.load %arg7[%c0, %c0_1] : memref<16x32xf32, #tpu.memory_space<vmem>>, vector<16x32xf32>
    %c0_2 = arith.constant 0 : index
    %c0_3 = arith.constant 0 : index
    %4 = vector.load %arg3[%c0_2, %c0_3] : memref<16x32xbf16, #tpu.memory_space<vmem>>, vector<16x32xbf16>
    %c0_4 = arith.constant 0 : index
    %c0_5 = arith.constant 0 : index
    %5 = vector.load %arg4[%c0_4, %c0_5] : memref<32x32xbf16, #tpu.memory_space<vmem>>, vector<32x32xbf16>
    %cst = arith.constant dense<0.000000e+00> : vector<16x32xf32>
    %6 = tpu.matmul %4, %5, %cst {dimension_numbers = #tpu.dot_dimension_numbers<[1], [0], [0], [1], [0, 0, 1, 1], [], []>} : vector<16x32xbf16>, vector<32x32xbf16>, vector<16x32xf32> -> vector<16x32xf32>
    %7 = arith.addf %3, %6 : vector<16x32xf32>
    %c0_6 = arith.constant 0 : index
    %c0_7 = arith.constant 0 : index
    %8 = vector.load %arg7[%c0_6, %c0_7] : memref<16x32xf32, #tpu.memory_space<vmem>>, vector<16x32xf32>
    tpu.vector_store %arg7[%c0_6, %c0_7], %7 {strides = array<i32>} : memref<16x32xf32, #tpu.memory_space<vmem>>, vector<16x32xf32>,
    %c0_i32_8 = arith.constant 0 : i32
    %9 = arith.cmpi eq, %arg2, %c0_i32_8 : i32
    %10 = arith.extui %9 : i1 to i32
    %c0_i32_9 = arith.constant 0 : i32
    %11 = arith.cmpi ne, %10, %c0_i32_9 : i32
    scf.if %11 {
      %c0_10 = arith.constant 0 : index
      %c0_11 = arith.constant 0 : index
      %12 = vector.load %arg7[%c0_10, %c0_11] : memref<16x32xf32, #tpu.memory_space<vmem>>, vector<16x32xf32>
      %c0_12 = arith.constant 0 : index
      %c0_13 = arith.constant 0 : index
      %13 = vector.load %arg5[%c0_12, %c0_13] : memref<1x32xf32, #tpu.memory_space<vmem>>, vector<1x32xf32>
      %14 = vector.broadcast %13 : vector<1x32xf32> to vector<16x32xf32>
      %15 = arith.addf %12, %14 : vector<16x32xf32>
      %c0_14 = arith.constant 0 : index
      %c0_15 = arith.constant 0 : index
      %16 = vector.load %arg6[%c0_14, %c0_15] : memref<16x32xf32, #tpu.memory_space<vmem>>, vector<16x32xf32>
      tpu.vector_store %arg6[%c0_14, %c0_15], %15 {strides = array<i32>} : memref<16x32xf32, #tpu.memory_space<vmem>>, vector<16x32xf32>,
    } else {
    }
    return
  }
  func.func @transform_0(%arg0: i32, %arg1: i32, %arg2: i32) -> (i32, i32) {
    %c0_i32 = arith.constant 0 : i32
    return %arg0, %arg2 : i32, i32
  }
  func.func @transform_1(%arg0: i32, %arg1: i32, %arg2: i32) -> (i32, i32) {
    %c0_i32 = arith.constant 0 : i32
    return %arg2, %arg1 : i32, i32
  }
  func.func @transform_2(%arg0: i32, %arg1: i32, %arg2: i32) -> (i32, i32) {
    %c0_i32 = arith.constant 0 : i32
    %c0_i32_0 = arith.constant 0 : i32
    return %c0_i32, %arg1 : i32, i32
  }
  func.func @transform_3(%arg0: i32, %arg1: i32, %arg2: i32) -> (i32, i32) {
    %c0_i32 = arith.constant 0 : i32
    return %arg0, %arg1 : i32, i32
  }
}

</mosaic_0001>

<bundles_post_ra>
// kernel: _lambda_.32
= control target key start
LH: loop header
LB: loop body
LE: loop exit
PB: predicated region body
PF: predicated region fallthrough
CT: control target
= control target key end

     0   :  { %vm19_vm0 = vcmask 523264   ;;  %v153_v0 = vmov 0.0   ;;  %vm154_vm1 = vmmov 0   ;;  %vm47_vm2 = vcmask 261120   ;;  %s197_s1 = inlined_call_operand.vmem [shape: bf16[32,64], index: 1, kind: input, shape index: {}]   ;;  %s198_s0 = inlined_call_operand.vmem [shape: bf16[16,32], index: 0, kind: input, shape index: {}]   ;;  %s199_s2 = inlined_call_operand.vmem [shape: f32[1,64], index: 2, kind: input, shape index: {}]   ;;  %s200_s3 = inlined_call_operand.vmem [shape: bf16[16,64], index: 3, kind: output, shape index: {}]  }
   0x1   :  { %140 = vmatprep.subr.bf16.mxu0 %v153_v0  ;;  %v150_v1 = vld [vmem:[%s197_s1 + $0x8] sm:$0xff]   ;;  %144 = vmatprep.mubr.msk.bf16.mxu0 %vm154_vm1, %v153_v0  ;;  %20 = vst.msk [vmem:[#allocation2] sm:$0xff] %vm19_vm0, %v153_v0  ;;  %21 = vst.msk [vmem:[#allocation2 + $0x8] sm:$0xff] %vm19_vm0, %v153_v0  ;;  %v151_v2 = vld [vmem:[%s197_s1] sm:$0xff]   ;;  %vm121_vm3 = vcmask 519168  }
   0x2   :  { %141 = vmatpush3.bf16.msra.mxu0 %v150_v1  ;;  %v152_v3 = vld [vmem:[%s198_s0] sm:$0xff]  }
   0x3   :  { %142 = vmatprep.subr.bf16.mxu0 %v153_v0  ;;  %v132_v12 = vld [vmem:[%s199_s2] ss:$0 sm:$0xff] }
   0x6   :  { %143 = vmatpush3.bf16.msra.mxu0 %v151_v2 }
   0x8   :  { %v22_v4 = vld [vmem:[#allocation2] sm:$0xff]  ;;  %v23_v8 = vld [vmem:[#allocation2 + $0x8] sm:$0xff] }
   0x9   :  { %145 = vmatmul.mubr.msk.bf16.vlgmr.msra.gmra.mxu0 %vm47_vm2, %v152_v3 }
  0xc9   :  { %v85_v5 = vpop.f32.mrf.mxu0 }
  0xca   :  { %v92_v6 = vadd.f32 %v85_v5, %v22_v4 }
  0xcb   :  { %v146_v7 = vpop.f32.mrf.mxu0 }
  0xcc   :  { %95 = vst.msk [vmem:[#allocation2] sm:$0xff] %vm19_vm0, %v92_v6 }
  0xcd   :  { %v88_v9 = vpop.f32.mrf.mxu0 }
  0xce   :  { %v93_v10 = vadd.f32 %v88_v9, %v23_v8 }
  0xcf   :  { %v147_v11 = vpop.f32.mrf.mxu0 }
  0xd0   :  { %96 = vst.msk [vmem:[#allocation2 + $0x8] sm:$0xff] %vm19_vm0, %v93_v10 }
  0xd3   :  { %v100_v13 = vld [vmem:[#allocation2] sm:$0xff] }
  0xd4   :  { %v109_v14 = vadd.f32 %v132_v12, %v100_v13 }
  0xd6   :  { %v111_v15 = vmax.f32 %v109_v14, 0.0 }
  0xd7   :  { %v101_v16 = vld [vmem:[#allocation2 + $0x8] sm:$0xff] }
  0xd8   :  { %v135_v17 = vpack.c.bf16 %v111_v15, %v111_v15  ;;  %v110_v18 = vadd.f32 %v132_v12, %v101_v16 }
  0xda   :  { %122 = vst.msk [vmem:[%s200_s3] sm:$0xf] %vm121_vm3, %v135_v17  ;;  %v112_v19 = vmax.f32 %v110_v18, 0.0 }
  0xdc   :  { %v136_v20 = vpack.c.bf16 %v112_v19, %v112_v19 }
  0xde   :  { %123 = vst.msk [vmem:[%s200_s3 + $0x4] sm:$0xf] %vm121_vm3, %v136_v20 }

// kernel: _lambda_.29
= control target key start
LH: loop header
LB: loop body
LE: loop exit
PB: predicated region body
PF: predicated region fallthrough
CT: control target
= control target key end

     0   :  { %vm19_vm0 = vcmask 785408   ;;  %v151_v0 = vmov 0.0   ;;  %vm152_vm1 = vmmov 0   ;;  %vm47_vm2 = vcmask 261120   ;;  %s195_s1 = inlined_call_operand.vmem [shape: bf16[32,96], index: 1, kind: input, shape index: {}]   ;;  %s196_s0 = inlined_call_operand.vmem [shape: bf16[16,32], index: 0, kind: input, shape index: {}]   ;;  %s197_s2 = inlined_call_operand.vmem [shape: f32[1,96], index: 2, kind: input, shape index: {}]   ;;  %s198_s3 = inlined_call_operand.vmem [shape: bf16[16,96], index: 3, kind: output, shape index: {}]  }
   0x1   :  { %138 = vmatprep.subr.bf16.mxu0 %v151_v0  ;;  %v148_v1 = vld [vmem:[%s195_s1 + $0x8] sm:$0xff]   ;;  %142 = vmatprep.mubr.msk.bf16.mxu0 %vm152_vm1, %v151_v0  ;;  %20 = vst.msk [vmem:[#allocation2] sm:$0xff] %vm19_vm0, %v151_v0  ;;  %21 = vst.msk [vmem:[#allocation2 + $0x8] sm:$0xff] %vm19_vm0, %v151_v0  ;;  %v149_v2 = vld [vmem:[%s195_s1] sm:$0xff]   ;;  %vm119_vm3 = vcmask 781312  }
   0x2   :  { %139 = vmatpush3.bf16.msra.mxu0 %v148_v1  ;;  %v150_v3 = vld [vmem:[%s196_s0] sm:$0xff]  }
   0x3   :  { %140 = vmatprep.subr.bf16.mxu0 %v151_v0  ;;  %v130_v12 = vld [vmem:[%s197_s2] ss:$0 sm:$0xff] }
   0x6   :  { %141 = vmatpush3.bf16.msra.mxu0 %v149_v2 }
   0x8   :  { %v22_v4 = vld [vmem:[#allocation2] sm:$0xff]  ;;  %v23_v8 = vld [vmem:[#allocation2 + $0x8] sm:$0xff] }
   0x9   :  { %143 = vmatmul.mubr.msk.bf16.vlgmr.msra.gmra.mxu0 %vm47_vm2, %v150_v3 }
  0xc9   :  { %v85_v5 = vpop.f32.mrf.mxu0 }
  0xca   :  { %v92_v6 = vadd.f32 %v85_v5, %v22_v4 }
  0xcb   :  { %v144_v7 = vpop.f32.mrf.mxu0 }
  0xcc   :  { %95 = vst.msk [vmem:[#allocation2] sm:$0xff] %vm19_vm0, %v92_v6 }
  0xcd   :  { %v88_v9 = vpop.f32.mrf.mxu0 }
  0xce   :  { %v93_v10 = vadd.f32 %v88_v9, %v23_v8 }
  0xcf   :  { %v145_v11 = vpop.f32.mrf.mxu0 }
  0xd0   :  { %96 = vst.msk [vmem:[#allocation2 + $0x8] sm:$0xff] %vm19_vm0, %v93_v10 }
  0xd3   :  { %v100_v13 = vld [vmem:[#allocation2] sm:$0xff] }
  0xd4   :  { %v109_v14 = vadd.f32 %v130_v12, %v100_v13 }
  0xd6   :  { %v133_v15 = vpack.c.bf16 %v109_v14, %v109_v14 }
  0xd7   :  { %v101_v16 = vld [vmem:[#allocation2 + $0x8] sm:$0xff] }
  0xd8   :  { %120 = vst.msk [vmem:[%s198_s3] sm:$0xf] %vm119_vm3, %v133_v15  ;;  %v110_v17 = vadd.f32 %v130_v12, %v101_v16 }
  0xda   :  { %v134_v18 = vpack.c.bf16 %v110_v17, %v110_v17 }
  0xdc   :  { %121 = vst.msk [vmem:[%s198_s3 + $0x4] sm:$0xf] %vm119_vm3, %v134_v18 }

// kernel: _lambda_.31
= control target key start
LH: loop header
LB: loop body
LE: loop exit
PB: predicated region body
PF: predicated region fallthrough
CT: control target
= control target key end

     0   :  { %vm28_vm0 = vcmask 261120   ;;  %v220_v0 = vmov 0.0   ;;  %vm221_vm1 = vmmov 0   ;;  %vm178_vm2 = vcmask 257024   ;;  %s293_s1 = inlined_call_operand.vmem [shape: bf16[32,32], index: 1, kind: input, shape index: {}]   ;;  %s294_s0 = inlined_call_operand.vmem [shape: bf16[16,32], index: 0, kind: input, shape index: {}]   ;;  %s295_s3 = inlined_call_operand.vmem [shape: bf16[16,32], index: 3, kind: input, shape index: {}]   ;;  %s296_s2 = inlined_call_operand.vmem [shape: f32[1,32], index: 2, kind: input, shape index: {}]   ;;  %s297_s4 = inlined_call_operand.vmem [shape: f32[1,32], index: 4, kind: input, shape index: {}]   ;;  %s298_s5 = inlined_call_operand.vmem [shape: f32[1,32], index: 5, kind: input, shape index: {}]   ;;  %s299_s6 = inlined_call_operand.vmem [shape: bf16[16,32], index: 6, kind: output, shape index: {}]  }
   0x1   :  { %203 = vmatprep.subr.bf16.mxu0 %v220_v0  ;;  %v213_v1 = vld [vmem:[%s293_s1 + $0x8] sm:$0xff]   ;;  %207 = vmatprep.mubr.msk.bf16.mxu0 %vm221_vm1, %v220_v0  ;;  %29 = vst.msk [vmem:[#allocation2] sm:$0xff] %vm28_vm0, %v220_v0  ;;  %30 = vst.msk [vmem:[#allocation2 + $0x8] sm:$0xff] %vm28_vm0, %v220_v0  ;;  %v214_v2 = vld [vmem:[%s293_s1] sm:$0xff]  }
   0x2   :  { %204 = vmatpush3.bf16.msra.mxu0 %v213_v1  ;;  %v215_v3 = vld [vmem:[%s294_s0] sm:$0xff]  }
   0x3   :  { %205 = vmatprep.subr.bf16.mxu0 %v220_v0  ;;  %v197_v12 = vld [vmem:[%s295_s3] sm:$0xff]  }
   0x4   :  { %v189_v13 = vld [vmem:[%s296_s2] ss:$0 sm:$0xff]  ;;  %v198_v14 = vunpack.c.l.bf16 %v197_v12  ;;  %v199_v18 = vunpack.c.h.bf16 %v197_v12 }
   0x5   :  { %v190_v41 = vld [vmem:[%s297_s4] ss:$0 sm:$0xff] }
   0x6   :  { %206 = vmatpush3.bf16.msra.mxu0 %v214_v2  ;;  %v191_v43 = vld [vmem:[%s298_s5] ss:$0 sm:$0xff] }
   0x8   :  { %v31_v4 = vld [vmem:[#allocation2] sm:$0xff]  ;;  %v32_v8 = vld [vmem:[#allocation2 + $0x8] sm:$0xff] }
   0x9   :  { %208 = vmatmul.mubr.msk.bf16.vlgmr.msra.gmra.mxu0 %vm28_vm0, %v215_v3 }
  0xc9   :  { %v94_v5 = vpop.f32.mrf.mxu0 }
  0xca   :  { %v101_v6 = vadd.f32 %v94_v5, %v31_v4 }
  0xcb   :  { %v209_v7 = vpop.f32.mrf.mxu0 }
  0xcc   :  { %103 = vst.msk [vmem:[#allocation2] sm:$0xff] %vm28_vm0, %v101_v6 }
  0xcd   :  { %v97_v9 = vpop.f32.mrf.mxu0 }
  0xce   :  { %v102_v10 = vadd.f32 %v97_v9, %v32_v8 }
  0xcf   :  { %v210_v11 = vpop.f32.mrf.mxu0 }
  0xd0   :  { %104 = vst.msk [vmem:[#allocation2 + $0x8] sm:$0xff] %vm28_vm0, %v102_v10 }
  0xd3   :  { %v108_v15 = vld [vmem:[#allocation2] sm:$0xff] }
  0xd4   :  { %v117_v16 = vadd.f32 %v189_v13, %v108_v15 }
  0xd6   :  { %v123_v17 = vadd.f32 %v198_v14, %v117_v16 }
  0xd7   :  { %v109_v19 = vld [vmem:[#allocation2 + $0x8] sm:$0xff] }
  0xd8   :  { %v125_v20 = vsel %vm28_vm0, %v123_v17, 0.0  ;;  %v118_v21 = vadd.f32 %v189_v13, %v109_v19 }
  0xd9   :  { %126 = vadd.xlane.f32.xlu0 %v125_v20 }
  0xda   :  { %v124_v22 = vadd.f32 %v199_v18, %v118_v21 }
  0xdc   :  { %v128_v23 = vsel %vm28_vm0, %v124_v22, 0.0 }
  0xdd   :  { %129 = vadd.xlane.f32.xlu0 %v128_v23 }
 0x162   :  { %v127_v24 = vpop.xlane.xlu0 %126 }
 0x163   :  { %v132_v25 = vmul.f32 0.03125, %v127_v24 }
 0x165   :  { %v134_v26 = vsub.f32 %v123_v17, %v132_v25 }
 0x166   :  { %v130_v27 = vpop.xlane.xlu0 %129 }
 0x167   :  { %v133_v28 = vmul.f32 0.03125, %v130_v27  ;;  %v136_v29 = vmul.f32 %v134_v26, %v134_v26 }
 0x169   :  { %v135_v30 = vsub.f32 %v124_v22, %v133_v28  ;;  %v138_v31 = vsel %vm28_vm0, %v136_v29, 0.0 }
 0x16a   :  { %139 = vadd.xlane.f32.xlu1 %v138_v31 }
 0x16b   :  { %v137_v32 = vmul.f32 %v135_v30, %v135_v30 }
 0x16d   :  { %v141_v33 = vsel %vm28_vm0, %v137_v32, 0.0 }
 0x16e   :  { %142 = vadd.xlane.f32.xlu1 %v141_v33 }
 0x1f3   :  { %v140_v34 = vpop.xlane.xlu1 %139 }
 0x1f4   :  { %v144_v35 = vmul.f32 0.03125, %v140_v34 }
 0x1f6   :  { %v146_v36 = vadd.f32 1e-12, %v144_v35 }
 0x1f7   :  { %v143_v37 = vpop.xlane.xlu1 %142 }
 0x1f8   :  { %216 = vrsqrt.f32 %v146_v36  ;;  %v145_v38 = vmul.f32 0.03125, %v143_v37 }
 0x1fa   :  { %v147_v39 = vadd.f32 1e-12, %v145_v38 }
 0x1fc   :  { %218 = vrsqrt.f32 %v147_v39 }
 0x205   :  { %v217_v40 = vpop.eup %216 }
 0x206   :  { %v150_v42 = vmul.f32 %v217_v40, %v134_v26 }
 0x208   :  { %v159_v44 = vmul.f32 %v190_v41, %v150_v42 }
 0x209   :  { %v219_v45 = vpop.eup %218 }
 0x20a   :  { %v168_v46 = vadd.f32 %v191_v43, %v159_v44  ;;  %v151_v47 = vmul.f32 %v219_v45, %v135_v30 }
 0x20c   :  { %v194_v48 = vpack.c.bf16 %v168_v46, %v168_v46  ;;  %v160_v49 = vmul.f32 %v190_v41, %v151_v47 }
 0x20e   :  { %179 = vst.msk [vmem:[%s299_s6] sm:$0xf] %vm178_vm2, %v194_v48  ;;  %v169_v50 = vadd.f32 %v191_v43, %v160_v49 }
 0x210   :  { %v195_v51 = vpack.c.bf16 %v169_v50, %v169_v50 }
 0x212   :  { %180 = vst.msk [vmem:[%s299_s6 + $0x4] sm:$0xf] %vm178_vm2, %v195_v51 }

// kernel: _lambda_.30
= control target key start
LH: loop header
LB: loop body
LE: loop exit
PB: predicated region body
PF: predicated region fallthrough
CT: control target
= control target key end

     0   :  { %s1355_s18 = smov 0   ;;  %s1357_s19 = smov 0   ;;  %s1562_s0 = inlined_call_operand.vmem [shape: bf16[2,8,32], index: 0, kind: input, shape index: {}]   ;;  %s1563_s1 = inlined_call_operand.vmem [shape: bf16[2,8,32], index: 1, kind: input, shape index: {}]   ;;  %s1564_s2 = inlined_call_operand.vmem [shape: bf16[2,8,32], index: 2, kind: input, shape index: {}]   ;;  %s1565_s3 = inlined_call_operand.vmem [shape: f32[2,8,1], index: 3, kind: input, shape index: {}]   ;;  %s1566_s4 = inlined_call_operand.vmem [shape: f32[2,1,8], index: 4, kind: input, shape index: {}]   ;;  %s1567_s5 = inlined_call_operand.vmem [shape: bf16[2,8,32], index: 5, kind: output, shape index: {}]  }
   0x1   :  { %s1359_s20 = smov 0  }
   0x2 LB: > { %s34_s21 = sadd.s32 1, %s1309_s19  ;;  %p1146_p0 = scmp.ge.s32.totalorder %s1313_s20, 1  ;;  %s1313_s20 = sphi %s1359_s20, %s15_s20   ;;  %s1309_s19 = sphi %s1357_s19, %s1571_s19   ;;  %s1305_s18 = sphi %s1355_s18, %s1570_s18  }
   0x3   : > { %p36_p1 = scmp.ge.s32.totalorder %s34_s21, 2  ;;  %p267_p2 = scmp.lt.s32.totalorder %s1313_s20, 3 }
   0x5   : > { %s1573_s21 = smov (%p36_p1, %s34_s21), 0  ;;  %p268_p3 = pnand %p1146_p0, %p267_p2 }
   0x6   : > { %p326_p4 = scmp.lt.s32.totalorder (!%p268_p3), %s1305_s18, 1  ;;  %s1319_s14 = smov (!%p268_p3), 120  }
   0x7   : > { %271 = sbr.rel (%p268_p3) target bundleno = 1378 (0x562), region = 40  ;;  %s1320_s15 = smov (!%p268_p3), 112  }
   0x8   : > { %s1321_s16 = smov (!%p268_p3), 104   ;;  %s1322_s17 = smov (!%p268_p3), 8  }
   0xc   : > { %v1315_v0 = vmov 0.0   ;;  %vm1316_vm0 = vmmov 0   ;;  %s1575_s18 = smov (!%p326_p4, %s1305_s18), 1  ;;  %v1317_v1 = vmov 0   ;;  %vm402_vm1 = vcmask 64512  }
   0xd   : > { %1181 = vmatprep.subr.bf16.mxu0 %v1315_v0  ;;  %1183 = vmatprep.mubr.msk.bf16.mxu0 %vm1316_vm0, %v1315_v0  ;;  %s1379_s22 = sshll.u32 %s1575_s18, 2  ;;  %s1150_s23 = sshll.u32 %s1575_s18, 3  ;;  %vm372_vm4 = vcmask 7168   ;;  %v1318_v9 = vmov -1e+30   ;;  %v388_v10 = vlaneseq  ;;  %vm479_vm8 = vcmask 1043456  }
   0xe   : > { %1263 = vset.pattern.permute.xlu0 %v1317_v1  ;;  %1264 = vset.pattern.permute.xlu1 %v1317_v1  ;;  %s339_s26 = scalar_lea.vmem %s1563_s1, %s1379_s22  ;;  %s353_s29 = scalar_lea.vmem %s1565_s3, %s1150_s23  ;;  %373 = vst.msk [vmem:[#allocation2] sm:$0xff] %vm372_vm4, %v1318_v9  ;;  %374 = vst.msk [vmem:[#allocation2 + $0x8] sm:$0xff] %vm372_vm4, %v1318_v9  ;;  %vm381_vm9 = vcmask 261120   ;;  %vm679_vm10 = vcmask 130112   ;;  %vm819_vm11 = vcmask 195712   ;;  %vm959_vm12 = vcmask 261312  }
   0xf   : > { %1187 = vmatprep.subr.bf16.mxu1 %v1315_v0  ;;  %1189 = vmatprep.mubr.msk.bf16.mxu1 %vm1316_vm0, %v1315_v0  ;;  %v400_v2 = vld [vmem:[%s339_s26] sm:$0xf]  ;;  %s359_s7 = scalar_lea.vmem %s1566_s4, %s1575_s18  ;;  %s332_s10 = scalar_lea.vmem %s1562_s0, %s1379_s22  ;;  %375 = vst.msk [vmem:[#allocation2 + $0x10] sm:$0xff] %vm372_vm4, %v1318_v9  ;;  %376 = vst.msk [vmem:[#allocation2 + $0x18] sm:$0xff] %vm372_vm4, %v1318_v9  ;;  %v389_v11 = vshrl.u32 %v388_v10, 7  ;;  %vm1006_vm13 = vcmask 257024  }
  0x10   : > { %v407_v3 = vsel %vm402_vm1, %v400_v2, 0  ;;  %v385_v4 = vld [vmem:[%s353_s29] sm:$0xff]  ;;  %377 = vst.msk [vmem:[#allocation3] sm:$0xff] %vm372_vm4, %v1315_v0  ;;  %378 = vst.msk [vmem:[#allocation3 + $0x8] sm:$0xff] %vm372_vm4, %v1315_v0  ;;  %v1155_v25 = vcombine.low %v400_v2, %v400_v2  ;;  %s346_s13 = scalar_lea.vmem %s1564_s2, %s1379_s22  ;;  %s1323_s18 = smov 16  }
  0x11   : > { %1182 = vmatpush3.bf16.xpose.msra.mxu0 %v407_v3  ;;  %vm386_vm2 = vcmp.gt.f32.partialorder %v385_v4, 0.0  ;;  %v383_v5 = vld [vmem:[%s359_s7] sm:$0x1]  ;;  %379 = vst.msk [vmem:[#allocation3 + $0x10] sm:$0xff] %vm372_vm4, %v1315_v0  ;;  %380 = vst.msk [vmem:[#allocation3 + $0x18] sm:$0xff] %vm372_vm4, %v1315_v0  ;;  %v390_v12 = vsub.s32 0, %v389_v11  ;;  %s366_s26 = scalar_lea.vmem %s1567_s5, %s1379_s22 }
  0x12   : > { %v393_v6 = vsel %vm386_vm2, 1, %v1317_v1  ;;  %vm384_vm3 = vcmp.gt.f32.partialorder %v383_v5, 0.0  ;;  %1199 = vmatprep.subr.bf16.mxu0 %v1315_v0  ;;  %v399_v8 = vld [vmem:[%s332_s10] sm:$0xf]  ;;  %382 = vst.msk [vmem:[#allocation4] sm:$0xff] %vm381_vm9, %v1315_v0  ;;  %s1324_s23 = smov 24  }
  0x13   : > { %395 = vperm.xlu0 %1263, %v393_v6   ;;  %v387_v7 = vsel %vm384_vm3, 1, %v1317_v1  ;;  %v1433_v27 = vld [vmem:[%s346_s13] sm:$0xf]  ;;  %v1154_v29 = vcombine.low %v399_v8, %v399_v8 }
  0x14   : > { %v391_v13 = vrot.slane %v387_v7, %v390_v12  ;;  %v481_v28 = vsel %vm479_vm8, %v1433_v27, 0  ;;  %v1157_v7 = vcombine.low %v1433_v27, %v1433_v27 }
  0x15   : > { %v1419_v22 = vld [vmem:[#allocation2] sm:$0xff]  ;;  %1188 = vmatpush3.bf16.msra.mxu1 %v481_v28  ;;  %v1477_v4 = vld [vmem:[#allocation2 + $0x8] sm:$0xff] }
  0x16   : > { %vm392_vm5 = vcmp.eq.s32.totalorder %v391_v13, 1  ;;  %1193 = vmatprep.subr.bf16.mxu1 %v1315_v0  ;;  %v1490_v9 = vld [vmem:[#allocation2 + $0x10] sm:$0xff] }
  0x18   : > { %1184 = vmatmul.mubr.msk.bf16.vlgmr.msra.gmra.mxu0 %vm402_vm1, %v399_v8 }
  0x19   : > { %1201 = vmatprep.mubr.msk.bf16.mxu0 %vm1316_vm0, %v1315_v0 }
  0x8e   : > { %v396_v14 = vpop.permute.xlu0 %395 }
  0x8f   : > { %vm397_vm6 = vcmp.eq.s32.totalorder %v396_v14, 1  ;;  %v1501_v14 = vld [vmem:[#allocation2 + $0x18] sm:$0xff] }
  0x90   : > { %vm1412_vm7 = vmand %vm392_vm5, %vm397_vm6 }
  0xd8   : > { %v443_v16 = vpop.f32.mrf.mxu0 }
  0xd9   : > { %v449_v17 = vsel %vm1412_vm7, %v443_v16, -1e+09 }
  0xda   : > { %v1185_v18 = vpop.f32.mrf.mxu0  ;;  %v451_v19 = vsel %vm402_vm1, %v449_v17, -inf }
  0xdb   : > { %452 = vmax.xlane.f32.xlu0 %v451_v19 }
  0xdc   : > { %v446_v20 = vpop.f32.mrf.mxu0 }
  0xde   : > { %v1186_v21 = vpop.f32.mrf.mxu0 }
 0x164   : > { %v453_v23 = vpop.xlane.xlu0 %452 }
 0x165   : > { %v1422_v24 = vmax.f32 %v1419_v22, %v453_v23 }
 0x167   : > { %v455_v26 = vsub.f32 %v1419_v22, %v1422_v24  ;;  %474 = vst.msk [vmem:[#allocation2] sm:$0xff] %vm372_vm4, %v1422_v24  ;;  %460 = vperm.xlu1 %1264, %v1422_v24  }
 0x169   : > { %v456_v3 = vmul.f32 1.442695, %v455_v26  ;;  %v523_v26 = vld [vmem:[#allocation4] sm:$0xff] }
 0x16b   : > { %540 = vrot.lane.b32.xlu1 %v1155_v25, %s1319_s14 }
 0x16f   : > { %535 = vrot.lane.b32.xlu1 %v1154_v29, %s1319_s14 }
 0x173   : > { %683 = vrot.lane.b32.xlu1 %v1155_v25, %s1320_s15 }
 0x177   : > { %681 = vrot.lane.b32.xlu1 %v1154_v29, %s1320_s15 }
 0x17b   : > { %823 = vrot.lane.b32.xlu1 %v1155_v25, %s1321_s16 }
 0x17f   : > { %821 = vrot.lane.b32.xlu1 %v1154_v29, %s1321_s16 }
 0x1e2   : > { %v461_v30 = vpop.permute.xlu1 %460 }
 0x1e3   : > { %v463_v31 = vsub.f32 %v449_v17, %v461_v30 }
 0x1e5   : > { %v464_v32 = vmul.f32 1.442695, %v463_v31 }
 0x1e6   : > { %v541_v33 = vpop.permute.xlu1 %540 }
 0x1e7   : > { %1267 = vpow2.f32 %v464_v32  ;;  %v546_v36 = vsel %vm402_vm1, %v541_v33, 0 }
 0x1e8   : > { %1269 = vpow2.f32 %v456_v3 }
 0x1ea   : > { %v536_v34 = vpop.permute.xlu1 %535 }
 0x1ee   : > { %v684_v38 = vpop.permute.xlu1 %683 }
 0x1ef   : > { %v689_v40 = vsel %vm402_vm1, %v684_v38, 0 }
 0x1f2   : > { %v682_v39 = vpop.permute.xlu1 %681 }
 0x1f4   : > { %v1444_v35 = vpop.eup %1267 }
 0x1f5   : > { %v475_v37 = vpack.c.bf16 %v1444_v35, %v1444_v35  ;;  %v1270_v13 = vpop.eup %1269  ;;  %v468_v18 = vsel %vm402_vm1, %v1444_v35, 0.0 }
 0x1f6   : > { %v824_v41 = vpop.permute.xlu1 %823 }
 0x1f7   : > { %1190 = vmatmul.mubr.msk.bf16.vlgmr.msra.gmra.mxu1 %vm402_vm1, %v475_v37  ;;  %v829_v42 = vsel %vm402_vm1, %v824_v41, 0 }
 0x1f8   : > { %1194 = vmatpush3.bf16.xpose.msra.mxu1 %v546_v36  ;;  %1195 = vmatprep.mubr.msk.bf16.mxu1 %vm1316_vm0, %v1315_v0 }
 0x1f9   : > { %1205 = vmatprep.subr.bf16.mxu1 %v1315_v0 }
 0x1fa   : > { %v822_v43 = vpop.permute.xlu1 %821 }
 0x1ff   : > { %1196 = vmatmul.mubr.msk.bf16.vlgmr.msra.gmra.mxu1 %vm402_vm1, %v536_v34 }
 0x200   : > { %1206 = vmatpush3.bf16.xpose.msra.mxu1 %v689_v40  ;;  %1207 = vmatprep.mubr.msk.bf16.mxu1 %vm1316_vm0, %v1315_v0 }
 0x201   : > { %1217 = vmatprep.subr.bf16.mxu1 %v1315_v0 }
 0x207   : > { %1208 = vmatmul.mubr.msk.bf16.vlgmr.msra.gmra.mxu1 %vm402_vm1, %v682_v39 }
 0x208   : > { %1218 = vmatpush3.bf16.xpose.msra.mxu1 %v829_v42  ;;  %1219 = vmatprep.mubr.msk.bf16.mxu1 %vm1316_vm0, %v1315_v0 }
 0x20f   : > { %1220 = vmatmul.mubr.msk.bf16.vlgmr.msra.gmra.mxu1 %vm402_vm1, %v822_v43 }
 0x2b7   : > { %v1463_v44 = vpop.f32.mrf.mxu1 }
 0x2b9   : > { %v1191_v45 = vpop.f32.mrf.mxu1 }
 0x2bb   : > { %v520_v46 = vpop.f32.mrf.mxu1 }
 0x2bd   : > { %v1192_v47 = vpop.f32.mrf.mxu1 }
 0x2bf   : > { %v582_v48 = vpop.f32.mrf.mxu1 }
 0x2c0   : > { %v588_v49 = vsel %vm1412_vm7, %v582_v48, -1e+09 }
 0x2c1   : > { %v1197_v50 = vpop.f32.mrf.mxu1  ;;  %v591_v51 = vsel %vm402_vm1, %v588_v49, -inf }
 0x2c2   : > { %592 = vmax.xlane.f32.xlu1 %v591_v51 }
 0x2c3   : > { %v585_v52 = vpop.f32.mrf.mxu1 }
 0x2c5   : > { %v1198_v53 = vpop.f32.mrf.mxu1 }
 0x2c7   : > { %v725_v54 = vpop.f32.mrf.mxu1 }
 0x2c8   : > { %v731_v55 = vsel %vm1412_vm7, %v725_v54, -1e+09  ;;  %v607_v54 = vld [vmem:[#allocation3 + $0x8] sm:$0xff] }
 0x2c9   : > { %v1209_v56 = vpop.f32.mrf.mxu1  ;;  %v734_v57 = vsel %vm402_vm1, %v731_v55, -inf }
 0x2ca   : > { %735 = vmax.xlane.f32.xlu0 %v734_v57 }
 0x2cb   : > { %v728_v58 = vpop.f32.mrf.mxu1 }
 0x2cd   : > { %v1210_v59 = vpop.f32.mrf.mxu1 }
 0x2ce   : > { %v750_v59 = vld [vmem:[#allocation3 + $0x10] sm:$0xff] }
 0x2cf   : > { %v865_v60 = vpop.f32.mrf.mxu1 }
 0x2d0   : > { %v871_v61 = vsel %vm1412_vm7, %v865_v60, -1e+09 }
 0x2d1   : > { %v1221_v62 = vpop.f32.mrf.mxu1  ;;  %v874_v63 = vsel %vm402_vm1, %v871_v61, -inf }
 0x2d2   : > { %875 = vmax.xlane.f32.xlu0 %v874_v63 }
 0x2d3   : > { %v868_v1 = vpop.f32.mrf.mxu1 }
 0x2d4   : > { %v890_v1 = vld [vmem:[#allocation3 + $0x18] sm:$0xff] }
 0x2d5   : > { %v1222_v2 = vpop.f32.mrf.mxu1 }
 0x34b   : > { %v593_v5 = vpop.xlane.xlu1 %592 }
 0x34c   : > { %v1480_v6 = vmax.f32 %v1477_v4, %v593_v5 }
 0x34e   : > { %v595_v8 = vsub.f32 %v1477_v4, %v1480_v6  ;;  %614 = vst.msk [vmem:[#allocation2 + $0x8] sm:$0xff] %vm372_vm4, %v1480_v6  ;;  %600 = vperm.xlu0 %1263, %v1480_v6  }
 0x350   : > { %v596_v47 = vmul.f32 1.442695, %v595_v8 }
 0x352   : > { %619 = vrot.lane.b32.xlu0 %v1157_v7, %s1319_s14 }
 0x353   : > { %v736_v10 = vpop.xlane.xlu0 %735 }
 0x354   : > { %v1494_v11 = vmax.f32 %v1490_v9, %v736_v10 }
 0x356   : > { %v738_v12 = vsub.f32 %v1490_v9, %v1494_v11  ;;  %757 = vst.msk [vmem:[#allocation2 + $0x10] sm:$0xff] %vm372_vm4, %v1494_v11  ;;  %743 = vperm.xlu1 %1264, %v1494_v11  }
 0x35a   : > { %526 = vperm.xlu1 %1264, %v1270_v13  }
 0x35b   : > { %v876_v15 = vpop.xlane.xlu0 %875 }
 0x35c   : > { %v1504_v16 = vmax.f32 %v1501_v14, %v876_v15 }
 0x35e   : > { %v878_v17 = vsub.f32 %v1501_v14, %v1504_v16  ;;  %897 = vst.msk [vmem:[#allocation2 + $0x18] sm:$0xff] %vm372_vm4, %v1504_v16  ;;  %883 = vperm.xlu0 %1263, %v1504_v16  }
 0x360   : > { %v879_v53 = vmul.f32 1.442695, %v878_v17 }
 0x362   : > { %759 = vrot.lane.b32.xlu0 %v1157_v7, %s1320_s15 }
 0x366   : > { %899 = vrot.lane.b32.xlu0 %v1157_v7, %s1321_s16 }
 0x385   : > { %469 = vadd.xlane.f32.xlu0 %v468_v18 }
 0x3c9   : > { %v601_v19 = vpop.permute.xlu0 %600 }
 0x3ca   : > { %v603_v20 = vsub.f32 %v588_v49, %v601_v19  ;;  %v466_v49 = vld [vmem:[#allocation3] sm:$0xff] }
 0x3cb   : > { %v467_v50 = vmul.f32 %v1270_v13, %v466_v49 }
 0x3cc   : > { %v604_v21 = vmul.f32 1.442695, %v603_v20 }
 0x3cd   : > { %v620_v22 = vpop.permute.xlu0 %619 }
 0x3ce   : > { %1271 = vpow2.f32 %v604_v21  ;;  %v625_v23 = vsel %vm479_vm8, %v620_v22, 0 }
 0x3cf   : > { %1200 = vmatpush3.bf16.msra.mxu0 %v625_v23 }
 0x3d0   : > { %1211 = vmatprep.subr.bf16.mxu0 %v1315_v0 }
 0x3d1   : > { %v744_v24 = vpop.permute.xlu1 %743 }
 0x3d2   : > { %v746_v25 = vsub.f32 %v731_v55, %v744_v24 }
 0x3d4   : > { %v747_v27 = vmul.f32 1.442695, %v746_v25 }
 0x3d5   : > { %v527_v28 = vpop.permute.xlu1 %526 }
 0x3d6   : > { %1273 = vpow2.f32 %v747_v27  ;;  %v529_v29 = vmul.f32 %v527_v28, %v523_v26 }
 0x3d8   : > { %v530_v30 = vadd.f32 %v529_v29, %v1463_v44 }
 0x3d9   : > { %v884_v31 = vpop.permute.xlu0 %883 }
 0x3da   : > { %531 = vst.msk [vmem:[#allocation4] sm:$0xff] %vm402_vm1, %v530_v30  ;;  %v886_v32 = vsub.f32 %v871_v61, %v884_v31 }
 0x3db   : > { %v1272_v33 = vpop.eup %1271 }
 0x3dc   : > { %v887_v34 = vmul.f32 1.442695, %v886_v32  ;;  %v609_v35 = vsel %vm402_vm1, %v1272_v33, 0.0  ;;  %v615_v36 = vpack.c.bf16 %v1272_v33, %v1272_v33 }
 0x3dd   : > { %610 = vadd.xlane.f32.xlu1 %v609_v35  ;;  %v760_v37 = vpop.permute.xlu0 %759 }
 0x3de   : > { %1275 = vpow2.f32 %v887_v34  ;;  %1202 = vmatmul.mubr.msk.bf16.vlgmr.msra.gmra.mxu0 %vm402_vm1, %v615_v36  ;;  %v765_v38 = vsel %vm479_vm8, %v760_v37, 0 }
 0x3df   : > { %1212 = vmatpush3.bf16.msra.mxu0 %v765_v38  ;;  %1213 = vmatprep.mubr.msk.bf16.mxu0 %vm1316_vm0, %v1315_v0  ;;  %1277 = vpow2.f32 %v596_v47 }
 0x3e0   : > { %1223 = vmatprep.subr.bf16.mxu0 %v1315_v0 }
 0x3e1   : > { %v900_v39 = vpop.permute.xlu0 %899  ;;  %v667_v26 = vld [vmem:[#allocation4] sm:$0xff] }
 0x3e2   : > { %v905_v43 = vsel %vm479_vm8, %v900_v39, 0 }
 0x3e3   : > { %v1274_v40 = vpop.eup %1273 }
 0x3e4   : > { %v752_v41 = vsel %vm402_vm1, %v1274_v40, 0.0  ;;  %v758_v42 = vpack.c.bf16 %v1274_v40, %v1274_v40 }
 0x3e5   : > { %753 = vadd.xlane.f32.xlu0 %v752_v41 }
 0x3e6   : > { %1214 = vmatmul.mubr.msk.bf16.vlgmr.msra.gmra.mxu0 %vm402_vm1, %v758_v42 }
 0x3e7   : > { %1224 = vmatpush3.bf16.msra.mxu0 %v905_v43  ;;  %1225 = vmatprep.mubr.msk.bf16.mxu0 %vm1316_vm0, %v1315_v0  ;;  %v739_v0 = vmul.f32 1.442695, %v738_v12 }
 0x3e9   : > { %1279 = vpow2.f32 %v739_v0 }
 0x3ea   : > { %1281 = vpow2.f32 %v879_v53 }
 0x3eb   : > { %v1276_v44 = vpop.eup %1275 }
 0x3ec   : > { %v892_v45 = vsel %vm402_vm1, %v1276_v44, 0.0  ;;  %v898_v46 = vpack.c.bf16 %v1276_v44, %v1276_v44  ;;  %v1278_v48 = vpop.eup %1277 }
 0x3ed   : > { %893 = vadd.xlane.f32.xlu0 %v892_v45  ;;  %v608_v55 = vmul.f32 %v1278_v48, %v607_v54 }
 0x3ee   : > { %1226 = vmatmul.mubr.msk.bf16.vlgmr.msra.gmra.mxu0 %vm402_vm1, %v898_v46 }
 0x3f6   : > { %v1280_v58 = vpop.eup %1279 }
 0x3f7   : > { %v751_v60 = vmul.f32 %v1280_v58, %v750_v59  ;;  %v1282_v63 = vpop.eup %1281 }
 0x3f8   : > { %v891_v2 = vmul.f32 %v1282_v63, %v890_v1 }
 0x403   : > { %670 = vperm.xlu0 %1263, %v1278_v48  }
 0x40e   : > { %v470_v51 = vpop.xlane.xlu0 %469 }
 0x40f   : > { %v471_v52 = vadd.f32 %v470_v51, %v467_v50 }
 0x411   : > { %473 = vst.msk [vmem:[#allocation3] sm:$0xff] %vm372_vm4, %v471_v52 }
 0x418   : > { %v964_v5 = vld [vmem:[#allocation3] sm:$0xff] }
 0x419   : > { %1283 = vrcp.f32 %v964_v5 }
 0x426   : > { %v1284_v15 = vpop.eup %1283 }
 0x466   : > { %v611_v56 = vpop.xlane.xlu1 %610 }
 0x467   : > { %v612_v57 = vadd.f32 %v611_v56, %v608_v55 }
 0x469   : > { %613 = vst.msk [vmem:[#allocation3 + $0x8] sm:$0xff] %vm372_vm4, %v612_v57 }
 0x46e   : > { %v754_v61 = vpop.xlane.xlu0 %753 }
 0x46f   : > { %v755_v62 = vadd.f32 %v754_v61, %v751_v60 }
 0x470   : > { %v974_v10 = vld [vmem:[#allocation3 + $0x8] sm:$0xff] }
 0x471   : > { %756 = vst.msk [vmem:[#allocation3 + $0x10] sm:$0xff] %vm372_vm4, %v755_v62 }
 0x476   : > { %v894_v3 = vpop.xlane.xlu0 %893 }
 0x477   : > { %v895_v4 = vadd.f32 %v894_v3, %v891_v2 }
 0x478   : > { %v984_v7 = vld [vmem:[#allocation3 + $0x10] sm:$0xff] }
 0x479   : > { %896 = vst.msk [vmem:[#allocation3 + $0x18] sm:$0xff] %vm372_vm4, %v895_v4  ;;  %1285 = vrcp.f32 %v984_v7 }
 0x47a   : > { %1287 = vrcp.f32 %v974_v10 }
 0x47e   : > { %v671_v25 = vpop.permute.xlu0 %670 }
 0x47f   : > { %v673_v27 = vmul.f32 %v671_v25, %v667_v26 }
 0x480   : > { %v994_v13 = vld [vmem:[#allocation3 + $0x18] sm:$0xff] }
 0x481   : > { %1289 = vrcp.f32 %v994_v13 }
 0x486   : > { %v1286_v18 = vpop.eup %1285 }
 0x487   : > { %v1288_v21 = vpop.eup %1287 }
 0x48e   : > { %v1290_v24 = vpop.eup %1289 }
 0x49e   : > { %v661_v6 = vpop.f32.mrf.mxu0 }
 0x49f   : > { %675 = vrot.lane.b32.xlu1 %v661_v6, %s1322_s17 }
 0x4a0   : > { %v1203_v8 = vpop.f32.mrf.mxu0 }
 0x4a2   : > { %v664_v9 = vpop.f32.mrf.mxu0 }
 0x4a3   : > { %810 = vperm.xlu1 %1264, %v1280_v58  }
 0x4a4   : > { %v1204_v11 = vpop.f32.mrf.mxu0 }
 0x4a6   : > { %v801_v12 = vpop.f32.mrf.mxu0 }
 0x4a7   : > { %950 = vperm.xlu1 %1264, %v1282_v63   ;;  %815 = vrot.lane.b32.xlu0 %v801_v12, %s1323_s18 }
 0x4a8   : > { %v1215_v14 = vpop.f32.mrf.mxu0 }
 0x4aa   : > { %v804_v16 = vpop.f32.mrf.mxu0 }
 0x4ab   : > { %969 = vperm.xlu1 %1264, %v1284_v15  }
 0x4ac   : > { %v1216_v17 = vpop.f32.mrf.mxu0 }
 0x4ae   : > { %v941_v19 = vpop.f32.mrf.mxu0 }
 0x4af   : > { %989 = vperm.xlu1 %1264, %v1286_v18   ;;  %955 = vrot.lane.b32.xlu0 %v941_v19, %s1324_s23 }
 0x4b0   : > { %v1227_v20 = vpop.f32.mrf.mxu0 }
 0x4b2   : > { %v944_v22 = vpop.f32.mrf.mxu0 }
 0x4b3   : > { %979 = vperm.xlu0 %1263, %v1288_v21  }
 0x4b4   : > { %v1228_v23 = vpop.f32.mrf.mxu0 }
 0x4b7   : > { %999 = vperm.xlu0 %1263, %v1290_v24  }
 0x511   : > { %v676_v28 = vpop.permute.xlu1 %675 }
 0x512   : > { %v678_v29 = vadd.f32 %v676_v28, %v673_v27 }
 0x514   : > { %680 = vst.msk [vmem:[#allocation4] sm:$0xff] %vm679_vm10, %v678_v29 }
 0x519   : > { %v816_v33 = vpop.permute.xlu0 %815 }
 0x51b   : > { %v807_v30 = vld [vmem:[#allocation4] sm:$0xff] }
 0x51e   : > { %v811_v31 = vpop.permute.xlu1 %810 }
 0x51f   : > { %v813_v32 = vmul.f32 %v811_v31, %v807_v30 }
 0x521   : > { %v818_v34 = vadd.f32 %v816_v33, %v813_v32  ;;  %v956_v38 = vpop.permute.xlu0 %955 }
 0x522   : > { %v951_v35 = vpop.permute.xlu1 %950 }
 0x523   : > { %820 = vst.msk [vmem:[#allocation4] sm:$0xff] %vm819_vm11, %v818_v34 }
 0x526   : > { %v970_v40 = vpop.permute.xlu1 %969 }
 0x52a   : > { %v947_v36 = vld [vmem:[#allocation4] sm:$0xff]  ;;  %v990_v46 = vpop.permute.xlu1 %989 }
 0x52b   : > { %v953_v37 = vmul.f32 %v951_v35, %v947_v36 }
 0x52d   : > { %v958_v39 = vadd.f32 %v956_v38, %v953_v37 }
 0x52e   : > { %v980_v44 = vpop.permute.xlu0 %979 }
 0x52f   : > { %960 = vst.msk [vmem:[#allocation4] sm:$0xff] %vm959_vm12, %v958_v39 }
 0x532   : > { %v1000_v50 = vpop.permute.xlu0 %999 }
 0x536   : > { %v966_v41 = vld [vmem:[#allocation4] sm:$0xff] }
 0x537   : > { %v972_v42 = vmul.f32 %v970_v40, %v966_v41 }
 0x539   : > { %973 = vst.msk [vmem:[#allocation4] sm:$0xff] %vm402_vm1, %v972_v42 }
 0x540   : > { %v976_v43 = vld [vmem:[#allocation4] sm:$0xff] }
 0x541   : > { %v982_v45 = vmul.f32 %v980_v44, %v976_v43 }
 0x543   : > { %983 = vst.msk [vmem:[#allocation4] sm:$0xff] %vm679_vm10, %v982_v45 }
 0x54a   : > { %v986_v47 = vld [vmem:[#allocation4] sm:$0xff] }
 0x54b   : > { %v992_v48 = vmul.f32 %v990_v46, %v986_v47 }
 0x54d   : > { %993 = vst.msk [vmem:[#allocation4] sm:$0xff] %vm819_vm11, %v992_v48 }
 0x554   : > { %v996_v49 = vld [vmem:[#allocation4] sm:$0xff] }
 0x555   : > { %v1002_v51 = vmul.f32 %v1000_v50, %v996_v49 }
 0x557   : > { %1003 = vst.msk [vmem:[#allocation4] sm:$0xff] %vm959_vm12, %v1002_v51 }
 0x55e   : > { %v1004_v52 = vld [vmem:[#allocation4] sm:$0xff] }
 0x55f   : > { %v1005_v0 = vpack.c.bf16 %v1004_v52, %v1004_v52 }
 0x561   : > { %1007 = vst.msk [vmem:[%s366_s26] sm:$0xf] %vm1006_vm13, %v1005_v0 }
 0x562 PF: > { %s15_s20 = sadd.s32 1, %s1313_s20   ;;  %s1570_s18 = smov %s1309_s19 }
 0x563   : > { %p12_p5 = scmp.ge.s32.totalorder %s15_s20, 4   ;;  %s1571_s19 = smov %s1573_s21 }
 0x565   :  { %14 = sbr.rel (!%p12_p5) target bundleno = 2 (0x2), region = 96 }

// kernel: _lambda_.43
= control target key start
LH: loop header
LB: loop body
LE: loop exit
PB: predicated region body
PF: predicated region fallthrough
CT: control target
= control target key end

     0   :  { %vm19_vm0 = vcmask 523264   ;;  %v151_v0 = vmov 0.0   ;;  %vm152_vm1 = vmmov 0   ;;  %vm47_vm2 = vcmask 261120   ;;  %s195_s1 = inlined_call_operand.vmem [shape: bf16[32,64], index: 1, kind: input, shape index: {}]   ;;  %s196_s0 = inlined_call_operand.vmem [shape: bf16[16,32], index: 0, kind: input, shape index: {}]   ;;  %s197_s2 = inlined_call_operand.vmem [shape: f32[1,64], index: 2, kind: input, shape index: {}]   ;;  %s198_s3 = inlined_call_operand.vmem [shape: bf16[16,64], index: 3, kind: output, shape index: {}]  }
   0x1   :  { %138 = vmatprep.subr.bf16.mxu0 %v151_v0  ;;  %v148_v1 = vld [vmem:[%s195_s1 + $0x8] sm:$0xff]   ;;  %142 = vmatprep.mubr.msk.bf16.mxu0 %vm152_vm1, %v151_v0  ;;  %20 = vst.msk [vmem:[#allocation2] sm:$0xff] %vm19_vm0, %v151_v0  ;;  %21 = vst.msk [vmem:[#allocation2 + $0x8] sm:$0xff] %vm19_vm0, %v151_v0  ;;  %v149_v2 = vld [vmem:[%s195_s1] sm:$0xff]   ;;  %vm119_vm3 = vcmask 519168  }
   0x2   :  { %139 = vmatpush3.bf16.msra.mxu0 %v148_v1  ;;  %v150_v3 = vld [vmem:[%s196_s0] sm:$0xff]  }
   0x3   :  { %140 = vmatprep.subr.bf16.mxu0 %v151_v0  ;;  %v130_v12 = vld [vmem:[%s197_s2] ss:$0 sm:$0xff] }
   0x6   :  { %141 = vmatpush3.bf16.msra.mxu0 %v149_v2 }
   0x8   :  { %v22_v4 = vld [vmem:[#allocation2] sm:$0xff]  ;;  %v23_v8 = vld [vmem:[#allocation2 + $0x8] sm:$0xff] }
   0x9   :  { %143 = vmatmul.mubr.msk.bf16.vlgmr.msra.gmra.mxu0 %vm47_vm2, %v150_v3 }
  0xc9   :  { %v85_v5 = vpop.f32.mrf.mxu0 }
  0xca   :  { %v92_v6 = vadd.f32 %v85_v5, %v22_v4 }
  0xcb   :  { %v144_v7 = vpop.f32.mrf.mxu0 }
  0xcc   :  { %95 = vst.msk [vmem:[#allocation2] sm:$0xff] %vm19_vm0, %v92_v6 }
  0xcd   :  { %v88_v9 = vpop.f32.mrf.mxu0 }
  0xce   :  { %v93_v10 = vadd.f32 %v88_v9, %v23_v8 }
  0xcf   :  { %v145_v11 = vpop.f32.mrf.mxu0 }
  0xd0   :  { %96 = vst.msk [vmem:[#allocation2 + $0x8] sm:$0xff] %vm19_vm0, %v93_v10 }
  0xd3   :  { %v100_v13 = vld [vmem:[#allocation2] sm:$0xff] }
  0xd4   :  { %v109_v14 = vadd.f32 %v130_v12, %v100_v13 }
  0xd6   :  { %v133_v15 = vpack.c.bf16 %v109_v14, %v109_v14 }
  0xd7   :  { %v101_v16 = vld [vmem:[#allocation2 + $0x8] sm:$0xff] }
  0xd8   :  { %120 = vst.msk [vmem:[%s198_s3] sm:$0xf] %vm119_vm3, %v133_v15  ;;  %v110_v17 = vadd.f32 %v130_v12, %v101_v16 }
  0xda   :  { %v134_v18 = vpack.c.bf16 %v110_v17, %v110_v17 }
  0xdc   :  { %121 = vst.msk [vmem:[%s198_s3 + $0x4] sm:$0xf] %vm119_vm3, %v134_v18 }

// kernel: _lambda_.33
= control target key start
LH: loop header
LB: loop body
LE: loop exit
PB: predicated region body
PF: predicated region fallthrough
CT: control target
= control target key end

     0   :  { %vm28_vm0 = vcmask 261120   ;;  %v247_v0 = vmov 0.0   ;;  %vm248_vm1 = vmmov 0   ;;  %vm72_vm2 = vcmask 523264   ;;  %s325_s1 = inlined_call_operand.vmem [shape: bf16[64,32], index: 1, kind: input, shape index: {}]   ;;  %s326_s0 = inlined_call_operand.vmem [shape: bf16[16,64], index: 0, kind: input, shape index: {}]   ;;  %s327_s3 = inlined_call_operand.vmem [shape: bf16[16,32], index: 3, kind: input, shape index: {}]   ;;  %s328_s2 = inlined_call_operand.vmem [shape: f32[1,32], index: 2, kind: input, shape index: {}]   ;;  %s329_s4 = inlined_call_operand.vmem [shape: f32[1,32], index: 4, kind: input, shape index: {}]   ;;  %s330_s5 = inlined_call_operand.vmem [shape: f32[1,32], index: 5, kind: input, shape index: {}]   ;;  %s331_s6 = inlined_call_operand.vmem [shape: bf16[16,32], index: 6, kind: output, shape index: {}]  }
   0x1   :  { %224 = vmatprep.subr.bf16.mxu0 %v247_v0  ;;  %v238_v1 = vld [vmem:[%s325_s1 + $0x18] sm:$0xff]   ;;  %232 = vmatprep.mubr.msk.bf16.mxu0 %vm248_vm1, %v247_v0  ;;  %29 = vst.msk [vmem:[#allocation2] sm:$0xff] %vm28_vm0, %v247_v0  ;;  %30 = vst.msk [vmem:[#allocation2 + $0x8] sm:$0xff] %vm28_vm0, %v247_v0  ;;  %v239_v2 = vld [vmem:[%s325_s1 + $0x10] sm:$0xff]   ;;  %vm195_vm3 = vcmask 257024  }
   0x2   :  { %225 = vmatpush3.bf16.msra.mxu0 %v238_v1  ;;  %v240_v3 = vld [vmem:[%s325_s1 + $0x8] sm:$0xff]   ;;  %v241_v4 = vld [vmem:[%s325_s1] sm:$0xff]  }
   0x3   :  { %226 = vmatprep.subr.bf16.mxu0 %v247_v0  ;;  %v242_v5 = vld [vmem:[%s326_s0] sm:$0xff]  }
   0x4   :  { %v216_v14 = vld [vmem:[%s327_s3] sm:$0xff]  }
   0x5   :  { %v208_v15 = vld [vmem:[%s328_s2] ss:$0 sm:$0xff]  ;;  %v217_v16 = vunpack.c.l.bf16 %v216_v14  ;;  %v218_v20 = vunpack.c.h.bf16 %v216_v14 }
   0x6   :  { %227 = vmatpush3.bf16.msra.mxu0 %v239_v2  ;;  %v209_v43 = vld [vmem:[%s329_s4] ss:$0 sm:$0xff] }
   0x7   :  { %228 = vmatprep.subr.bf16.mxu0 %v247_v0  ;;  %v210_v45 = vld [vmem:[%s330_s5] ss:$0 sm:$0xff] }
   0x8   :  { %v31_v6 = vld [vmem:[#allocation2] sm:$0xff]  ;;  %v32_v10 = vld [vmem:[#allocation2 + $0x8] sm:$0xff] }
   0xa   :  { %229 = vmatpush3.bf16.msra.mxu0 %v240_v3 }
   0xb   :  { %230 = vmatprep.subr.bf16.mxu0 %v247_v0 }
   0xe   :  { %231 = vmatpush3.bf16.msra.mxu0 %v241_v4 }
  0x11   :  { %233 = vmatmul.mubr.msk.bf16.vlgmr.msra.gmra.mxu0 %vm72_vm2, %v242_v5 }
  0xd1   :  { %v110_v7 = vpop.f32.mrf.mxu0 }
  0xd2   :  { %v117_v8 = vadd.f32 %v110_v7, %v31_v6 }
  0xd3   :  { %v234_v9 = vpop.f32.mrf.mxu0 }
  0xd4   :  { %120 = vst.msk [vmem:[#allocation2] sm:$0xff] %vm28_vm0, %v117_v8 }
  0xd5   :  { %v113_v11 = vpop.f32.mrf.mxu0 }
  0xd6   :  { %v118_v12 = vadd.f32 %v113_v11, %v32_v10 }
  0xd7   :  { %v235_v13 = vpop.f32.mrf.mxu0 }
  0xd8   :  { %121 = vst.msk [vmem:[#allocation2 + $0x8] sm:$0xff] %vm28_vm0, %v118_v12 }
  0xdb   :  { %v125_v17 = vld [vmem:[#allocation2] sm:$0xff] }
  0xdc   :  { %v134_v18 = vadd.f32 %v208_v15, %v125_v17 }
  0xde   :  { %v140_v19 = vadd.f32 %v217_v16, %v134_v18 }
  0xdf   :  { %v126_v21 = vld [vmem:[#allocation2 + $0x8] sm:$0xff] }
  0xe0   :  { %v142_v22 = vsel %vm28_vm0, %v140_v19, 0.0  ;;  %v135_v23 = vadd.f32 %v208_v15, %v126_v21 }
  0xe1   :  { %143 = vadd.xlane.f32.xlu0 %v142_v22 }
  0xe2   :  { %v141_v24 = vadd.f32 %v218_v20, %v135_v23 }
  0xe4   :  { %v145_v25 = vsel %vm28_vm0, %v141_v24, 0.0 }
  0xe5   :  { %146 = vadd.xlane.f32.xlu0 %v145_v25 }
 0x16a   :  { %v144_v26 = vpop.xlane.xlu0 %143 }
 0x16b   :  { %v149_v27 = vmul.f32 0.03125, %v144_v26 }
 0x16d   :  { %v151_v28 = vsub.f32 %v140_v19, %v149_v27 }
 0x16e   :  { %v147_v29 = vpop.xlane.xlu0 %146 }
 0x16f   :  { %v150_v30 = vmul.f32 0.03125, %v147_v29  ;;  %v153_v31 = vmul.f32 %v151_v28, %v151_v28 }
 0x171   :  { %v152_v32 = vsub.f32 %v141_v24, %v150_v30  ;;  %v155_v33 = vsel %vm28_vm0, %v153_v31, 0.0 }
 0x172   :  { %156 = vadd.xlane.f32.xlu1 %v155_v33 }
 0x173   :  { %v154_v34 = vmul.f32 %v152_v32, %v152_v32 }
 0x175   :  { %v158_v35 = vsel %vm28_vm0, %v154_v34, 0.0 }
 0x176   :  { %159 = vadd.xlane.f32.xlu1 %v158_v35 }
 0x1fb   :  { %v157_v36 = vpop.xlane.xlu1 %156 }
 0x1fc   :  { %v161_v37 = vmul.f32 0.03125, %v157_v36 }
 0x1fe   :  { %v163_v38 = vadd.f32 1e-12, %v161_v37 }
 0x1ff   :  { %v160_v39 = vpop.xlane.xlu1 %159 }
 0x200   :  { %243 = vrsqrt.f32 %v163_v38  ;;  %v162_v40 = vmul.f32 0.03125, %v160_v39 }
 0x202   :  { %v164_v41 = vadd.f32 1e-12, %v162_v40 }
 0x204   :  { %245 = vrsqrt.f32 %v164_v41 }
 0x20d   :  { %v244_v42 = vpop.eup %243 }
 0x20e   :  { %v167_v44 = vmul.f32 %v244_v42, %v151_v28 }
 0x210   :  { %v176_v46 = vmul.f32 %v209_v43, %v167_v44 }
 0x211   :  { %v246_v47 = vpop.eup %245 }
 0x212   :  { %v185_v48 = vadd.f32 %v210_v45, %v176_v46  ;;  %v168_v49 = vmul.f32 %v246_v47, %v152_v32 }
 0x214   :  { %v213_v50 = vpack.c.bf16 %v185_v48, %v185_v48  ;;  %v177_v51 = vmul.f32 %v209_v43, %v168_v49 }
 0x216   :  { %196 = vst.msk [vmem:[%s331_s6] sm:$0xf] %vm195_vm3, %v213_v50  ;;  %v186_v52 = vadd.f32 %v210_v45, %v177_v51 }
 0x218   :  { %v214_v53 = vpack.c.bf16 %v186_v52, %v186_v52 }
 0x21a   :  { %197 = vst.msk [vmem:[%s331_s6 + $0x4] sm:$0xf] %vm195_vm3, %v214_v53 }

// kernel: _lambda_.42
= control target key start
LH: loop header
LB: loop body
LE: loop exit
PB: predicated region body
PF: predicated region fallthrough
CT: control target
= control target key end

     0   :  { %vm19_vm0 = vcmask 261120   ;;  %v150_v0 = vmov 0.0   ;;  %vm151_vm1 = vmmov 0   ;;  %vm118_vm2 = vcmask 257024   ;;  %s195_s1 = inlined_call_operand.vmem [shape: bf16[32,32], index: 1, kind: input, shape index: {}]   ;;  %s196_s0 = inlined_call_operand.vmem [shape: bf16[16,32], index: 0, kind: input, shape index: {}]   ;;  %s197_s2 = inlined_call_operand.vmem [shape: f32[1,32], index: 2, kind: input, shape index: {}]   ;;  %s198_s3 = inlined_call_operand.vmem [shape: bf16[16,32], index: 3, kind: output, shape index: {}]  }
   0x1   :  { %137 = vmatprep.subr.bf16.mxu0 %v150_v0  ;;  %v147_v1 = vld [vmem:[%s195_s1 + $0x8] sm:$0xff]   ;;  %141 = vmatprep.mubr.msk.bf16.mxu0 %vm151_vm1, %v150_v0  ;;  %20 = vst.msk [vmem:[#allocation2] sm:$0xff] %vm19_vm0, %v150_v0  ;;  %21 = vst.msk [vmem:[#allocation2 + $0x8] sm:$0xff] %vm19_vm0, %v150_v0  ;;  %v148_v2 = vld [vmem:[%s195_s1] sm:$0xff]  }
   0x2   :  { %138 = vmatpush3.bf16.msra.mxu0 %v147_v1  ;;  %v149_v3 = vld [vmem:[%s196_s0] sm:$0xff]  }
   0x3   :  { %139 = vmatprep.subr.bf16.mxu0 %v150_v0  ;;  %v129_v12 = vld [vmem:[%s197_s2] ss:$0 sm:$0xff] }
   0x6   :  { %140 = vmatpush3.bf16.msra.mxu0 %v148_v2 }
   0x8   :  { %v22_v4 = vld [vmem:[#allocation2] sm:$0xff]  ;;  %v23_v8 = vld [vmem:[#allocation2 + $0x8] sm:$0xff] }
   0x9   :  { %142 = vmatmul.mubr.msk.bf16.vlgmr.msra.gmra.mxu0 %vm19_vm0, %v149_v3 }
  0xc9   :  { %v85_v5 = vpop.f32.mrf.mxu0 }
  0xca   :  { %v92_v6 = vadd.f32 %v85_v5, %v22_v4 }
  0xcb   :  { %v143_v7 = vpop.f32.mrf.mxu0 }
  0xcc   :  { %94 = vst.msk [vmem:[#allocation2] sm:$0xff] %vm19_vm0, %v92_v6 }
  0xcd   :  { %v88_v9 = vpop.f32.mrf.mxu0 }
  0xce   :  { %v93_v10 = vadd.f32 %v88_v9, %v23_v8 }
  0xcf   :  { %v144_v11 = vpop.f32.mrf.mxu0 }
  0xd0   :  { %95 = vst.msk [vmem:[#allocation2 + $0x8] sm:$0xff] %vm19_vm0, %v93_v10 }
  0xd3   :  { %v99_v13 = vld [vmem:[#allocation2] sm:$0xff] }
  0xd4   :  { %v108_v14 = vadd.f32 %v129_v12, %v99_v13 }
  0xd6   :  { %v132_v15 = vpack.c.bf16 %v108_v14, %v108_v14 }
  0xd7   :  { %v100_v16 = vld [vmem:[#allocation2 + $0x8] sm:$0xff] }
  0xd8   :  { %119 = vst.msk [vmem:[%s198_s3] sm:$0xf] %vm118_vm2, %v132_v15  ;;  %v109_v17 = vadd.f32 %v129_v12, %v100_v16 }
  0xda   :  { %v133_v18 = vpack.c.bf16 %v109_v17, %v109_v17 }
  0xdc   :  { %120 = vst.msk [vmem:[%s198_s3 + $0x4] sm:$0xf] %vm118_vm2, %v133_v18 }

// kernel: _lambda_.57
= control target key start
LH: loop header
LB: loop body
LE: loop exit
PB: predicated region body
PF: predicated region fallthrough
CT: control target
= control target key end

     0   :  { %v175_v1 = vmov 0.0   ;;  %vm176_vm0 = vmmov 0   ;;  %vm20_vm1 = vcmask 261120   ;;  %s222_s0 = inlined_call_operand.vmem [shape: bf16[16,32], index: 0, kind: input, shape index: {}]   ;;  %s223_s1 = inlined_call_operand.vmem [shape: bf16[32,32], index: 1, kind: input, shape index: {}]   ;;  %s224_s2 = inlined_call_operand.vmem [shape: f32[1,32], index: 2, kind: input, shape index: {}]   ;;  %s225_s3 = inlined_call_operand.hbm [shape: f32[16,32], index: 3, kind: output, shape index: {}]  }
   0x1   :  { %v150_v0 = vld [vmem:[%s223_s1 + $0x8] sm:$0xff]   ;;  %137 = vmatprep.subr.bf16.mxu0 %v175_v1  ;;  %v151_v2 = vld [vmem:[%s223_s1] sm:$0xff]   ;;  %141 = vmatprep.mubr.msk.bf16.mxu0 %vm176_vm0, %v175_v1  ;;  %21 = vst.msk [vmem:[#allocation2] sm:$0xff] %vm20_vm1, %v175_v1  ;;  %22 = vst.msk [vmem:[#allocation2 + $0x8] sm:$0xff] %vm20_vm1, %v175_v1 }
   0x2   :  { %138 = vmatpush3.bf16.msra.mxu0 %v150_v0 }
   0x3   :  { %139 = vmatprep.subr.bf16.mxu0 %v175_v1 }
   0x4   :  { %8 = vsyncpa [#allocation4], 0  ;;  %v152_v3 = vld [vmem:[%s222_s0] sm:$0xff]   ;;  %s177_s0 = smov [#allocation3]  }
   0x5   :  { %v133_v12 = vld [vmem:[%s224_s2] ss:$0 sm:$0xff]  ;;  %s118_s19 = sshll.u32 %s177_s0, 4  ;;  %s119_s19 = int_to_ptr.vmem [resolvable:$true] %s118_s19 }
   0x6   :  { %140 = vmatpush3.bf16.msra.mxu0 %v151_v2  ;;  %s153_s20 = scalar_lea.vmem %s119_s19, 256  ;;  %p158_p1 = scmp.lt.s32.totalorder %s119_s19, %s119_s19 }
   0x7   :  { %p154_p0 = scmp.ne.s32.totalorder %s119_s19, %s153_s20  ;;  %p159_p2 = scmp.lt.s32.totalorder %s153_s20, %s153_s20 }
   0x8   :  { %v23_v4 = vld [vmem:[#allocation2] sm:$0xff]  ;;  %v24_v8 = vld [vmem:[#allocation2 + $0x8] sm:$0xff] }
   0x9   :  { %142 = vmatmul.mubr.msk.bf16.vlgmr.msra.gmra.mxu0 %vm20_vm1, %v152_v3  ;;  %p160_p3 = por %p159_p2, %p158_p1 }
   0xb   :  { %p161_p4 = pnand %p160_p3, %p154_p0 }
  0xc9   :  { %v86_v5 = vpop.f32.mrf.mxu0 }
  0xca   :  { %v93_v6 = vadd.f32 %v86_v5, %v23_v4 }
  0xcb   :  { %v143_v7 = vpop.f32.mrf.mxu0 }
  0xcc   :  { %95 = vst.msk [vmem:[#allocation2] sm:$0xff] %vm20_vm1, %v93_v6 }
  0xcd   :  { %v89_v9 = vpop.f32.mrf.mxu0 }
  0xce   :  { %v94_v10 = vadd.f32 %v89_v9, %v24_v8 }
  0xcf   :  { %v144_v11 = vpop.f32.mrf.mxu0 }
  0xd0   :  { %96 = vst.msk [vmem:[#allocation2 + $0x8] sm:$0xff] %vm20_vm1, %v94_v10 }
  0xd3   :  { %v100_v13 = vld [vmem:[#allocation2] sm:$0xff] }
  0xd4   :  { %v109_v14 = vadd.f32 %v133_v12, %v100_v13 }
  0xd6   :  { %111 = vst.msk [vmem:[#allocation3] sm:$0xff] %vm20_vm1, %v109_v14 }
  0xd7   :  { %v101_v15 = vld [vmem:[#allocation2 + $0x8] sm:$0xff] }
  0xd8   :  { %v110_v16 = vadd.f32 %v133_v12, %v101_v15 }
  0xda   :  { %112 = vst.msk [vmem:[#allocation3 + $0x8] sm:$0xff] %vm20_vm1, %v110_v16 }
  0xdb   :  { %164 = shalt.err (!%p161_p4)
}
  0xdc   :  { %s178_s21 = smov 128   ;;  %s179_s2 = smov 8  }
  0xdd   :  { %124 = dma.vmem_to_hbm [thread:$0]  %s119_s19, 256, %s225_s3, [#allocation4], %s178_s21, %s178_s21, %s179_s2  }
  0xde   :  { %173 = dma.done.wait [#allocation4], 256  }
  0xdf   :  { %174 = vsyncadd [#allocation4], 4294967040 }
  0xe0   :  { %128 = vsyncpa [#allocation4], 1 }

// kernel: _lambda_.40
= control target key start
LH: loop header
LB: loop body
LE: loop exit
PB: predicated region body
PF: predicated region fallthrough
CT: control target
= control target key end

     0   :  { %s1367_s18 = smov 0   ;;  %s1369_s19 = smov 0   ;;  %s1574_s0 = inlined_call_operand.vmem [shape: bf16[2,8,32], index: 0, kind: input, shape index: {}]   ;;  %s1575_s1 = inlined_call_operand.vmem [shape: bf16[2,8,32], index: 1, kind: input, shape index: {}]   ;;  %s1576_s2 = inlined_call_operand.vmem [shape: bf16[2,8,32], index: 2, kind: input, shape index: {}]   ;;  %s1577_s3 = inlined_call_operand.vmem [shape: f32[2,8,1], index: 3, kind: input, shape index: {}]   ;;  %s1578_s4 = inlined_call_operand.vmem [shape: f32[2,1,8], index: 4, kind: input, shape index: {}]   ;;  %s1579_s5 = inlined_call_operand.vmem [shape: bf16[2,8,32], index: 5, kind: output, shape index: {}]  }
   0x1   :  { %s1371_s20 = smov 0  }
   0x2 LB: > { %s34_s21 = sadd.s32 1, %s1321_s19  ;;  %p1158_p0 = scmp.ge.s32.totalorder %s1325_s20, 1  ;;  %s1325_s20 = sphi %s1371_s20, %s15_s20   ;;  %s1321_s19 = sphi %s1369_s19, %s1583_s19   ;;  %s1317_s18 = sphi %s1367_s18, %s1582_s18  }
   0x3   : > { %p36_p1 = scmp.ge.s32.totalorder %s34_s21, 2  ;;  %p267_p2 = scmp.lt.s32.totalorder %s1325_s20, 3 }
   0x5   : > { %s1585_s21 = smov (%p36_p1, %s34_s21), 0  ;;  %p268_p3 = pnand %p1158_p0, %p267_p2 }
   0x6   : > { %p326_p4 = scmp.lt.s32.totalorder (!%p268_p3), %s1317_s18, 1  ;;  %s1331_s14 = smov (!%p268_p3), 120  }
   0x7   : > { %271 = sbr.rel (%p268_p3) target bundleno = 1378 (0x562), region = 40  ;;  %s1332_s15 = smov (!%p268_p3), 112  }
   0x8   : > { %s1333_s16 = smov (!%p268_p3), 104   ;;  %s1334_s17 = smov (!%p268_p3), 8  }
   0xc   : > { %v1327_v0 = vmov 0.0   ;;  %vm1328_vm0 = vmmov 0   ;;  %s1587_s18 = smov (!%p326_p4, %s1317_s18), 1  ;;  %v1329_v1 = vmov 0   ;;  %vm414_vm1 = vcmask 64512  }
   0xd   : > { %1193 = vmatprep.subr.bf16.mxu0 %v1327_v0  ;;  %1195 = vmatprep.mubr.msk.bf16.mxu0 %vm1328_vm0, %v1327_v0  ;;  %s1391_s22 = sshll.u32 %s1587_s18, 2  ;;  %s1162_s23 = sshll.u32 %s1587_s18, 3  ;;  %vm372_vm4 = vcmask 7168   ;;  %v1330_v9 = vmov -1e+30   ;;  %v388_v10 = vlaneseq  ;;  %vm491_vm10 = vcmask 1043456  }
   0xe   : > { %1275 = vset.pattern.permute.xlu0 %v1329_v1  ;;  %1276 = vset.pattern.permute.xlu1 %v1329_v1  ;;  %s339_s26 = scalar_lea.vmem %s1575_s1, %s1391_s22  ;;  %s353_s29 = scalar_lea.vmem %s1577_s3, %s1162_s23  ;;  %373 = vst.msk [vmem:[#allocation2] sm:$0xff] %vm372_vm4, %v1330_v9  ;;  %374 = vst.msk [vmem:[#allocation2 + $0x8] sm:$0xff] %vm372_vm4, %v1330_v9  ;;  %vm381_vm11 = vcmask 261120   ;;  %vm691_vm12 = vcmask 130112   ;;  %vm831_vm13 = vcmask 195712   ;;  %vm971_vm14 = vcmask 261312  }
   0xf   : > { %1199 = vmatprep.subr.bf16.mxu1 %v1327_v0  ;;  %1201 = vmatprep.mubr.msk.bf16.mxu1 %vm1328_vm0, %v1327_v0  ;;  %v412_v2 = vld [vmem:[%s339_s26] sm:$0xf]  ;;  %s359_s7 = scalar_lea.vmem %s1578_s4, %s1587_s18  ;;  %s332_s10 = scalar_lea.vmem %s1574_s0, %s1391_s22  ;;  %375 = vst.msk [vmem:[#allocation2 + $0x10] sm:$0xff] %vm372_vm4, %v1330_v9  ;;  %376 = vst.msk [vmem:[#allocation2 + $0x18] sm:$0xff] %vm372_vm4, %v1330_v9  ;;  %v389_v11 = vshrl.u32 %v388_v10, 7  ;;  %v406_v15 = vand.u32 127, %v388_v10 }
  0x10   : > { %v419_v3 = vsel %vm414_vm1, %v412_v2, 0  ;;  %v385_v4 = vld [vmem:[%s353_s29] sm:$0xff]  ;;  %377 = vst.msk [vmem:[#allocation3] sm:$0xff] %vm372_vm4, %v1327_v0  ;;  %378 = vst.msk [vmem:[#allocation3 + $0x8] sm:$0xff] %vm372_vm4, %v1327_v0  ;;  %v1167_v26 = vcombine.low %v412_v2, %v412_v2  ;;  %s346_s13 = scalar_lea.vmem %s1576_s2, %s1391_s22  ;;  %s1335_s18 = smov 16   ;;  %vm1018_vm15 = vcmask 257024  }
  0x11   : > { %1194 = vmatpush3.bf16.xpose.msra.mxu0 %v419_v3  ;;  %vm386_vm2 = vcmp.gt.f32.partialorder %v385_v4, 0.0  ;;  %v383_v5 = vld [vmem:[%s359_s7] sm:$0x1]  ;;  %379 = vst.msk [vmem:[#allocation3 + $0x10] sm:$0xff] %vm372_vm4, %v1327_v0  ;;  %380 = vst.msk [vmem:[#allocation3 + $0x18] sm:$0xff] %vm372_vm4, %v1327_v0  ;;  %v390_v12 = vsub.s32 0, %v389_v11  ;;  %vm409_vm7 = vcmp.le.s32.totalorder %v406_v15, %v389_v11  ;;  %s366_s26 = scalar_lea.vmem %s1579_s5, %s1391_s22 }
  0x12   : > { %v393_v6 = vsel %vm386_vm2, 1, %v1329_v1  ;;  %vm384_vm3 = vcmp.gt.f32.partialorder %v383_v5, 0.0  ;;  %1211 = vmatprep.subr.bf16.mxu0 %v1327_v0  ;;  %v411_v8 = vld [vmem:[%s332_s10] sm:$0xf]  ;;  %382 = vst.msk [vmem:[#allocation4] sm:$0xff] %vm381_vm11, %v1327_v0  ;;  %s1336_s23 = smov 24  }
  0x13   : > { %395 = vperm.xlu0 %1275, %v393_v6   ;;  %v387_v7 = vsel %vm384_vm3, 1, %v1329_v1  ;;  %v1445_v28 = vld [vmem:[%s346_s13] sm:$0xf]  ;;  %v1166_v30 = vcombine.low %v411_v8, %v411_v8 }
  0x14   : > { %v391_v13 = vrot.slane %v387_v7, %v390_v12  ;;  %v493_v29 = vsel %vm491_vm10, %v1445_v28, 0 }
  0x15   : > { %v1431_v23 = vld [vmem:[#allocation2] sm:$0xff]  ;;  %1200 = vmatpush3.bf16.msra.mxu1 %v493_v29  ;;  %v1489_v5 = vld [vmem:[#allocation2 + $0x8] sm:$0xff] }
  0x16   : > { %vm392_vm5 = vcmp.eq.s32.totalorder %v391_v13, 1  ;;  %1205 = vmatprep.subr.bf16.mxu1 %v1327_v0  ;;  %v1502_v10 = vld [vmem:[#allocation2 + $0x10] sm:$0xff]  ;;  %v1513_v15 = vld [vmem:[#allocation2 + $0x18] sm:$0xff] }
  0x18   : > { %1196 = vmatmul.mubr.msk.bf16.vlgmr.msra.gmra.mxu0 %vm414_vm1, %v411_v8  ;;  %v1169_v8 = vcombine.low %v1445_v28, %v1445_v28 }
  0x19   : > { %1213 = vmatprep.mubr.msk.bf16.mxu0 %vm1328_vm0, %v1327_v0 }
  0x8e   : > { %v396_v14 = vpop.permute.xlu0 %395 }
  0x8f   : > { %vm397_vm6 = vcmp.eq.s32.totalorder %v396_v14, 1 }
  0x90   : > { %vm398_vm8 = vmand %vm392_vm5, %vm397_vm6 }
  0x91   : > { %vm1424_vm9 = vmand %vm398_vm8, %vm409_vm7 }
  0xd8   : > { %v455_v17 = vpop.f32.mrf.mxu0 }
  0xd9   : > { %v461_v18 = vsel %vm1424_vm9, %v455_v17, -1e+09 }
  0xda   : > { %v1197_v19 = vpop.f32.mrf.mxu0  ;;  %v463_v20 = vsel %vm414_vm1, %v461_v18, -inf }
  0xdb   : > { %464 = vmax.xlane.f32.xlu0 %v463_v20 }
  0xdc   : > { %v458_v21 = vpop.f32.mrf.mxu0 }
  0xde   : > { %v1198_v22 = vpop.f32.mrf.mxu0 }
 0x164   : > { %v465_v24 = vpop.xlane.xlu0 %464 }
 0x165   : > { %v1434_v25 = vmax.f32 %v1431_v23, %v465_v24 }
 0x167   : > { %v467_v27 = vsub.f32 %v1431_v23, %v1434_v25  ;;  %486 = vst.msk [vmem:[#allocation2] sm:$0xff] %vm372_vm4, %v1434_v25  ;;  %472 = vperm.xlu1 %1276, %v1434_v25  }
 0x169   : > { %v468_v4 = vmul.f32 1.442695, %v467_v27  ;;  %v535_v27 = vld [vmem:[#allocation4] sm:$0xff] }
 0x16b   : > { %552 = vrot.lane.b32.xlu1 %v1167_v26, %s1331_s14 }
 0x16f   : > { %547 = vrot.lane.b32.xlu1 %v1166_v30, %s1331_s14 }
 0x173   : > { %695 = vrot.lane.b32.xlu1 %v1167_v26, %s1332_s15 }
 0x177   : > { %693 = vrot.lane.b32.xlu1 %v1166_v30, %s1332_s15 }
 0x17b   : > { %835 = vrot.lane.b32.xlu1 %v1167_v26, %s1333_s16 }
 0x17f   : > { %833 = vrot.lane.b32.xlu1 %v1166_v30, %s1333_s16 }
 0x1e2   : > { %v473_v31 = vpop.permute.xlu1 %472 }
 0x1e3   : > { %v475_v32 = vsub.f32 %v461_v18, %v473_v31 }
 0x1e5   : > { %v476_v33 = vmul.f32 1.442695, %v475_v32 }
 0x1e6   : > { %v553_v34 = vpop.permute.xlu1 %552 }
 0x1e7   : > { %1279 = vpow2.f32 %v476_v33  ;;  %v558_v37 = vsel %vm414_vm1, %v553_v34, 0 }
 0x1e8   : > { %1281 = vpow2.f32 %v468_v4 }
 0x1ea   : > { %v548_v35 = vpop.permute.xlu1 %547 }
 0x1ee   : > { %v696_v39 = vpop.permute.xlu1 %695 }
 0x1ef   : > { %v701_v41 = vsel %vm414_vm1, %v696_v39, 0 }
 0x1f2   : > { %v694_v40 = vpop.permute.xlu1 %693 }
 0x1f4   : > { %v1456_v36 = vpop.eup %1279 }
 0x1f5   : > { %v487_v38 = vpack.c.bf16 %v1456_v36, %v1456_v36  ;;  %v1282_v14 = vpop.eup %1281  ;;  %v480_v19 = vsel %vm414_vm1, %v1456_v36, 0.0 }
 0x1f6   : > { %v836_v42 = vpop.permute.xlu1 %835 }
 0x1f7   : > { %1202 = vmatmul.mubr.msk.bf16.vlgmr.msra.gmra.mxu1 %vm414_vm1, %v487_v38  ;;  %v841_v43 = vsel %vm414_vm1, %v836_v42, 0 }
 0x1f8   : > { %1206 = vmatpush3.bf16.xpose.msra.mxu1 %v558_v37  ;;  %1207 = vmatprep.mubr.msk.bf16.mxu1 %vm1328_vm0, %v1327_v0 }
 0x1f9   : > { %1217 = vmatprep.subr.bf16.mxu1 %v1327_v0 }
 0x1fa   : > { %v834_v44 = vpop.permute.xlu1 %833 }
 0x1ff   : > { %1208 = vmatmul.mubr.msk.bf16.vlgmr.msra.gmra.mxu1 %vm414_vm1, %v548_v35 }
 0x200   : > { %1218 = vmatpush3.bf16.xpose.msra.mxu1 %v701_v41  ;;  %1219 = vmatprep.mubr.msk.bf16.mxu1 %vm1328_vm0, %v1327_v0 }
 0x201   : > { %1229 = vmatprep.subr.bf16.mxu1 %v1327_v0 }
 0x207   : > { %1220 = vmatmul.mubr.msk.bf16.vlgmr.msra.gmra.mxu1 %vm414_vm1, %v694_v40 }
 0x208   : > { %1230 = vmatpush3.bf16.xpose.msra.mxu1 %v841_v43  ;;  %1231 = vmatprep.mubr.msk.bf16.mxu1 %vm1328_vm0, %v1327_v0 }
 0x20f   : > { %1232 = vmatmul.mubr.msk.bf16.vlgmr.msra.gmra.mxu1 %vm414_vm1, %v834_v44 }
 0x2b7   : > { %v1475_v45 = vpop.f32.mrf.mxu1 }
 0x2b9   : > { %v1203_v46 = vpop.f32.mrf.mxu1 }
 0x2bb   : > { %v532_v47 = vpop.f32.mrf.mxu1 }
 0x2bd   : > { %v1204_v48 = vpop.f32.mrf.mxu1 }
 0x2bf   : > { %v594_v49 = vpop.f32.mrf.mxu1 }
 0x2c0   : > { %v600_v50 = vsel %vm1424_vm9, %v594_v49, -1e+09 }
 0x2c1   : > { %v1209_v51 = vpop.f32.mrf.mxu1  ;;  %v603_v52 = vsel %vm414_vm1, %v600_v50, -inf }
 0x2c2   : > { %604 = vmax.xlane.f32.xlu1 %v603_v52 }
 0x2c3   : > { %v597_v53 = vpop.f32.mrf.mxu1 }
 0x2c5   : > { %v1210_v54 = vpop.f32.mrf.mxu1 }
 0x2c7   : > { %v737_v55 = vpop.f32.mrf.mxu1 }
 0x2c8   : > { %v743_v56 = vsel %vm1424_vm9, %v737_v55, -1e+09  ;;  %v619_v55 = vld [vmem:[#allocation3 + $0x8] sm:$0xff] }
 0x2c9   : > { %v1221_v57 = vpop.f32.mrf.mxu1  ;;  %v746_v58 = vsel %vm414_vm1, %v743_v56, -inf }
 0x2ca   : > { %747 = vmax.xlane.f32.xlu0 %v746_v58 }
 0x2cb   : > { %v740_v59 = vpop.f32.mrf.mxu1 }
 0x2cd   : > { %v1222_v60 = vpop.f32.mrf.mxu1 }
 0x2ce   : > { %v762_v60 = vld [vmem:[#allocation3 + $0x10] sm:$0xff] }
 0x2cf   : > { %v877_v61 = vpop.f32.mrf.mxu1 }
 0x2d0   : > { %v883_v62 = vsel %vm1424_vm9, %v877_v61, -1e+09 }
 0x2d1   : > { %v1233_v63 = vpop.f32.mrf.mxu1  ;;  %v886_v1 = vsel %vm414_vm1, %v883_v62, -inf }
 0x2d2   : > { %887 = vmax.xlane.f32.xlu0 %v886_v1 }
 0x2d3   : > { %v880_v2 = vpop.f32.mrf.mxu1 }
 0x2d4   : > { %v902_v2 = vld [vmem:[#allocation3 + $0x18] sm:$0xff] }
 0x2d5   : > { %v1234_v3 = vpop.f32.mrf.mxu1 }
 0x34b   : > { %v605_v6 = vpop.xlane.xlu1 %604 }
 0x34c   : > { %v1492_v7 = vmax.f32 %v1489_v5, %v605_v6 }
 0x34e   : > { %v607_v9 = vsub.f32 %v1489_v5, %v1492_v7  ;;  %626 = vst.msk [vmem:[#allocation2 + $0x8] sm:$0xff] %vm372_vm4, %v1492_v7  ;;  %612 = vperm.xlu0 %1275, %v1492_v7  }
 0x350   : > { %v608_v48 = vmul.f32 1.442695, %v607_v9 }
 0x352   : > { %631 = vrot.lane.b32.xlu0 %v1169_v8, %s1331_s14 }
 0x353   : > { %v748_v11 = vpop.xlane.xlu0 %747 }
 0x354   : > { %v1506_v12 = vmax.f32 %v1502_v10, %v748_v11 }
 0x356   : > { %v750_v13 = vsub.f32 %v1502_v10, %v1506_v12  ;;  %769 = vst.msk [vmem:[#allocation2 + $0x10] sm:$0xff] %vm372_vm4, %v1506_v12  ;;  %755 = vperm.xlu1 %1276, %v1506_v12  }
 0x35a   : > { %538 = vperm.xlu1 %1276, %v1282_v14  }
 0x35b   : > { %v888_v16 = vpop.xlane.xlu0 %887 }
 0x35c   : > { %v1516_v17 = vmax.f32 %v1513_v15, %v888_v16 }
 0x35e   : > { %v890_v18 = vsub.f32 %v1513_v15, %v1516_v17  ;;  %909 = vst.msk [vmem:[#allocation2 + $0x18] sm:$0xff] %vm372_vm4, %v1516_v17  ;;  %895 = vperm.xlu0 %1275, %v1516_v17  }
 0x360   : > { %v891_v54 = vmul.f32 1.442695, %v890_v18 }
 0x362   : > { %771 = vrot.lane.b32.xlu0 %v1169_v8, %s1332_s15 }
 0x366   : > { %911 = vrot.lane.b32.xlu0 %v1169_v8, %s1333_s16 }
 0x385   : > { %481 = vadd.xlane.f32.xlu0 %v480_v19 }
 0x3c9   : > { %v613_v20 = vpop.permute.xlu0 %612 }
 0x3ca   : > { %v615_v21 = vsub.f32 %v600_v50, %v613_v20  ;;  %v478_v50 = vld [vmem:[#allocation3] sm:$0xff] }
 0x3cb   : > { %v479_v51 = vmul.f32 %v1282_v14, %v478_v50 }
 0x3cc   : > { %v616_v22 = vmul.f32 1.442695, %v615_v21 }
 0x3cd   : > { %v632_v23 = vpop.permute.xlu0 %631 }
 0x3ce   : > { %1283 = vpow2.f32 %v616_v22  ;;  %v637_v24 = vsel %vm491_vm10, %v632_v23, 0 }
 0x3cf   : > { %1212 = vmatpush3.bf16.msra.mxu0 %v637_v24 }
 0x3d0   : > { %1223 = vmatprep.subr.bf16.mxu0 %v1327_v0 }
 0x3d1   : > { %v756_v25 = vpop.permute.xlu1 %755 }
 0x3d2   : > { %v758_v26 = vsub.f32 %v743_v56, %v756_v25 }
 0x3d4   : > { %v759_v28 = vmul.f32 1.442695, %v758_v26 }
 0x3d5   : > { %v539_v29 = vpop.permute.xlu1 %538 }
 0x3d6   : > { %1285 = vpow2.f32 %v759_v28  ;;  %v541_v30 = vmul.f32 %v539_v29, %v535_v27 }
 0x3d8   : > { %v542_v31 = vadd.f32 %v541_v30, %v1475_v45 }
 0x3d9   : > { %v896_v32 = vpop.permute.xlu0 %895 }
 0x3da   : > { %543 = vst.msk [vmem:[#allocation4] sm:$0xff] %vm414_vm1, %v542_v31  ;;  %v898_v33 = vsub.f32 %v883_v62, %v896_v32 }
 0x3db   : > { %v1284_v34 = vpop.eup %1283 }
 0x3dc   : > { %v899_v35 = vmul.f32 1.442695, %v898_v33  ;;  %v621_v36 = vsel %vm414_vm1, %v1284_v34, 0.0  ;;  %v627_v37 = vpack.c.bf16 %v1284_v34, %v1284_v34 }
 0x3dd   : > { %622 = vadd.xlane.f32.xlu1 %v621_v36  ;;  %v772_v38 = vpop.permute.xlu0 %771 }
 0x3de   : > { %1287 = vpow2.f32 %v899_v35  ;;  %1214 = vmatmul.mubr.msk.bf16.vlgmr.msra.gmra.mxu0 %vm414_vm1, %v627_v37  ;;  %v777_v39 = vsel %vm491_vm10, %v772_v38, 0 }
 0x3df   : > { %1224 = vmatpush3.bf16.msra.mxu0 %v777_v39  ;;  %1225 = vmatprep.mubr.msk.bf16.mxu0 %vm1328_vm0, %v1327_v0  ;;  %1289 = vpow2.f32 %v608_v48 }
 0x3e0   : > { %1235 = vmatprep.subr.bf16.mxu0 %v1327_v0 }
 0x3e1   : > { %v912_v40 = vpop.permute.xlu0 %911  ;;  %v679_v27 = vld [vmem:[#allocation4] sm:$0xff] }
 0x3e2   : > { %v917_v44 = vsel %vm491_vm10, %v912_v40, 0 }
 0x3e3   : > { %v1286_v41 = vpop.eup %1285 }
 0x3e4   : > { %v764_v42 = vsel %vm414_vm1, %v1286_v41, 0.0  ;;  %v770_v43 = vpack.c.bf16 %v1286_v41, %v1286_v41 }
 0x3e5   : > { %765 = vadd.xlane.f32.xlu0 %v764_v42 }
 0x3e6   : > { %1226 = vmatmul.mubr.msk.bf16.vlgmr.msra.gmra.mxu0 %vm414_vm1, %v770_v43 }
 0x3e7   : > { %1236 = vmatpush3.bf16.msra.mxu0 %v917_v44  ;;  %1237 = vmatprep.mubr.msk.bf16.mxu0 %vm1328_vm0, %v1327_v0  ;;  %v751_v0 = vmul.f32 1.442695, %v750_v13 }
 0x3e9   : > { %1291 = vpow2.f32 %v751_v0 }
 0x3ea   : > { %1293 = vpow2.f32 %v891_v54 }
 0x3eb   : > { %v1288_v45 = vpop.eup %1287 }
 0x3ec   : > { %v904_v46 = vsel %vm414_vm1, %v1288_v45, 0.0  ;;  %v910_v47 = vpack.c.bf16 %v1288_v45, %v1288_v45  ;;  %v1290_v49 = vpop.eup %1289 }
 0x3ed   : > { %905 = vadd.xlane.f32.xlu0 %v904_v46  ;;  %v620_v56 = vmul.f32 %v1290_v49, %v619_v55 }
 0x3ee   : > { %1238 = vmatmul.mubr.msk.bf16.vlgmr.msra.gmra.mxu0 %vm414_vm1, %v910_v47 }
 0x3f6   : > { %v1292_v59 = vpop.eup %1291 }
 0x3f7   : > { %v763_v61 = vmul.f32 %v1292_v59, %v762_v60  ;;  %v1294_v1 = vpop.eup %1293 }
 0x3f8   : > { %v903_v3 = vmul.f32 %v1294_v1, %v902_v2 }
 0x403   : > { %682 = vperm.xlu0 %1275, %v1290_v49  }
 0x40e   : > { %v482_v52 = vpop.xlane.xlu0 %481 }
 0x40f   : > { %v483_v53 = vadd.f32 %v482_v52, %v479_v51 }
 0x411   : > { %485 = vst.msk [vmem:[#allocation3] sm:$0xff] %vm372_vm4, %v483_v53 }
 0x418   : > { %v976_v6 = vld [vmem:[#allocation3] sm:$0xff] }
 0x419   : > { %1295 = vrcp.f32 %v976_v6 }
 0x426   : > { %v1296_v16 = vpop.eup %1295 }
 0x466   : > { %v623_v57 = vpop.xlane.xlu1 %622 }
 0x467   : > { %v624_v58 = vadd.f32 %v623_v57, %v620_v56 }
 0x469   : > { %625 = vst.msk [vmem:[#allocation3 + $0x8] sm:$0xff] %vm372_vm4, %v624_v58 }
 0x46e   : > { %v766_v62 = vpop.xlane.xlu0 %765 }
 0x46f   : > { %v767_v63 = vadd.f32 %v766_v62, %v763_v61 }
 0x470   : > { %v986_v11 = vld [vmem:[#allocation3 + $0x8] sm:$0xff] }
 0x471   : > { %768 = vst.msk [vmem:[#allocation3 + $0x10] sm:$0xff] %vm372_vm4, %v767_v63 }
 0x476   : > { %v906_v4 = vpop.xlane.xlu0 %905 }
 0x477   : > { %v907_v5 = vadd.f32 %v906_v4, %v903_v3 }
 0x478   : > { %v996_v8 = vld [vmem:[#allocation3 + $0x10] sm:$0xff] }
 0x479   : > { %908 = vst.msk [vmem:[#allocation3 + $0x18] sm:$0xff] %vm372_vm4, %v907_v5  ;;  %1297 = vrcp.f32 %v996_v8 }
 0x47a   : > { %1299 = vrcp.f32 %v986_v11 }
 0x47e   : > { %v683_v26 = vpop.permute.xlu0 %682 }
 0x47f   : > { %v685_v28 = vmul.f32 %v683_v26, %v679_v27 }
 0x480   : > { %v1006_v14 = vld [vmem:[#allocation3 + $0x18] sm:$0xff] }
 0x481   : > { %1301 = vrcp.f32 %v1006_v14 }
 0x486   : > { %v1298_v19 = vpop.eup %1297 }
 0x487   : > { %v1300_v22 = vpop.eup %1299 }
 0x48e   : > { %v1302_v25 = vpop.eup %1301 }
 0x49e   : > { %v673_v7 = vpop.f32.mrf.mxu0 }
 0x49f   : > { %687 = vrot.lane.b32.xlu1 %v673_v7, %s1334_s17 }
 0x4a0   : > { %v1215_v9 = vpop.f32.mrf.mxu0 }
 0x4a2   : > { %v676_v10 = vpop.f32.mrf.mxu0 }
 0x4a3   : > { %822 = vperm.xlu1 %1276, %v1292_v59  }
 0x4a4   : > { %v1216_v12 = vpop.f32.mrf.mxu0 }
 0x4a6   : > { %v813_v13 = vpop.f32.mrf.mxu0 }
 0x4a7   : > { %962 = vperm.xlu1 %1276, %v1294_v1   ;;  %827 = vrot.lane.b32.xlu0 %v813_v13, %s1335_s18 }
 0x4a8   : > { %v1227_v15 = vpop.f32.mrf.mxu0 }
 0x4aa   : > { %v816_v17 = vpop.f32.mrf.mxu0 }
 0x4ab   : > { %981 = vperm.xlu1 %1276, %v1296_v16  }
 0x4ac   : > { %v1228_v18 = vpop.f32.mrf.mxu0 }
 0x4ae   : > { %v953_v20 = vpop.f32.mrf.mxu0 }
 0x4af   : > { %1001 = vperm.xlu1 %1276, %v1298_v19   ;;  %967 = vrot.lane.b32.xlu0 %v953_v20, %s1336_s23 }
 0x4b0   : > { %v1239_v21 = vpop.f32.mrf.mxu0 }
 0x4b2   : > { %v956_v23 = vpop.f32.mrf.mxu0 }
 0x4b3   : > { %991 = vperm.xlu0 %1275, %v1300_v22  }
 0x4b4   : > { %v1240_v24 = vpop.f32.mrf.mxu0 }
 0x4b7   : > { %1011 = vperm.xlu0 %1275, %v1302_v25  }
 0x511   : > { %v688_v29 = vpop.permute.xlu1 %687 }
 0x512   : > { %v690_v30 = vadd.f32 %v688_v29, %v685_v28 }
 0x514   : > { %692 = vst.msk [vmem:[#allocation4] sm:$0xff] %vm691_vm12, %v690_v30 }
 0x519   : > { %v828_v34 = vpop.permute.xlu0 %827 }
 0x51b   : > { %v819_v31 = vld [vmem:[#allocation4] sm:$0xff] }
 0x51e   : > { %v823_v32 = vpop.permute.xlu1 %822 }
 0x51f   : > { %v825_v33 = vmul.f32 %v823_v32, %v819_v31 }
 0x521   : > { %v830_v35 = vadd.f32 %v828_v34, %v825_v33  ;;  %v968_v39 = vpop.permute.xlu0 %967 }
 0x522   : > { %v963_v36 = vpop.permute.xlu1 %962 }
 0x523   : > { %832 = vst.msk [vmem:[#allocation4] sm:$0xff] %vm831_vm13, %v830_v35 }
 0x526   : > { %v982_v41 = vpop.permute.xlu1 %981 }
 0x52a   : > { %v959_v37 = vld [vmem:[#allocation4] sm:$0xff]  ;;  %v1002_v47 = vpop.permute.xlu1 %1001 }
 0x52b   : > { %v965_v38 = vmul.f32 %v963_v36, %v959_v37 }
 0x52d   : > { %v970_v40 = vadd.f32 %v968_v39, %v965_v38 }
 0x52e   : > { %v992_v45 = vpop.permute.xlu0 %991 }
 0x52f   : > { %972 = vst.msk [vmem:[#allocation4] sm:$0xff] %vm971_vm14, %v970_v40 }
 0x532   : > { %v1012_v51 = vpop.permute.xlu0 %1011 }
 0x536   : > { %v978_v42 = vld [vmem:[#allocation4] sm:$0xff] }
 0x537   : > { %v984_v43 = vmul.f32 %v982_v41, %v978_v42 }
 0x539   : > { %985 = vst.msk [vmem:[#allocation4] sm:$0xff] %vm414_vm1, %v984_v43 }
 0x540   : > { %v988_v44 = vld [vmem:[#allocation4] sm:$0xff] }
 0x541   : > { %v994_v46 = vmul.f32 %v992_v45, %v988_v44 }
 0x543   : > { %995 = vst.msk [vmem:[#allocation4] sm:$0xff] %vm691_vm12, %v994_v46 }
 0x54a   : > { %v998_v48 = vld [vmem:[#allocation4] sm:$0xff] }
 0x54b   : > { %v1004_v49 = vmul.f32 %v1002_v47, %v998_v48 }
 0x54d   : > { %1005 = vst.msk [vmem:[#allocation4] sm:$0xff] %vm831_vm13, %v1004_v49 }
 0x554   : > { %v1008_v50 = vld [vmem:[#allocation4] sm:$0xff] }
 0x555   : > { %v1014_v52 = vmul.f32 %v1012_v51, %v1008_v50 }
 0x557   : > { %1015 = vst.msk [vmem:[#allocation4] sm:$0xff] %vm971_vm14, %v1014_v52 }
 0x55e   : > { %v1016_v53 = vld [vmem:[#allocation4] sm:$0xff] }
 0x55f   : > { %v1017_v0 = vpack.c.bf16 %v1016_v53, %v1016_v53 }
 0x561   : > { %1019 = vst.msk [vmem:[%s366_s26] sm:$0xf] %vm1018_vm15, %v1017_v0 }
 0x562 PF: > { %s15_s20 = sadd.s32 1, %s1325_s20   ;;  %s1582_s18 = smov %s1321_s19 }
 0x563   : > { %p12_p5 = scmp.ge.s32.totalorder %s15_s20, 4   ;;  %s1583_s19 = smov %s1585_s21 }
 0x565   :  { %14 = sbr.rel (!%p12_p5) target bundleno = 2 (0x2), region = 96 }

</bundles_post_ra>
